<compile_context>
chip_gen: v7x
topology: tpu7x:2x2x1
jax: 0.10.0
libtpu: 0.0.40
codegen_flags: <defaults>
</compile_context>

<pallas_src>
import functools

import jax
import jax.numpy as jnp
from jax import lax
from jax.experimental import pallas as pl
from jax.experimental.pallas import tpu as pltpu

BIG = 1e9  # effective +infinity for distances


def _pert_sp_kernel(dT_ref, w1_ref, b1_ref, w2_ref, b2_ref,
                    no_left_ref, no_right_ref, out_ref, *, m):
    n = m * m

    # ---------- MLP (feature-major: batch on the lane axis) ----------
    dT = dT_ref[...]                                                    # (C, Bb)
    h = jnp.dot(w1_ref[...], dT, preferred_element_type=jnp.float32) + b1_ref[...]
    h = jnp.where(h > 0, h, 0.1 * h)                                    # LeakyReLU(0.1)
    w = jnp.dot(w2_ref[...], h, preferred_element_type=jnp.float32) + b2_ref[...]  # (n, Bb)

    Bb = dT.shape[1]
    half_c = (0.5 * w)[None]                  # (1, n, Bb)  loop-invariant, hoisted

    # ---------- hoisted loop invariants ----------
    big_m = jnp.full((2, m, Bb), BIG, jnp.float32)    # fill for +/- m sublane shifts
    big_1 = jnp.full((2, 1, Bb), BIG, jnp.float32)    # fill for +/- 1 sublane shifts
    no_left = no_left_ref[...] > 0.5                  # (n, 1): flat idx with col == 0
    no_right = no_right_ref[...] > 0.5                # (n, 1): flat idx with col == m-1

    # ---------- init distances: [0] from source (0,0), [1] from sink (m-1,m-1) ----------
    z1 = jnp.zeros((1, 1, Bb), jnp.float32)
    bn = jnp.full((1, n - 1, Bb), BIG, jnp.float32)
    d_init = jnp.concatenate([
        jnp.concatenate([z1, bn], axis=1),            # dist from source (flat idx 0)
        jnp.concatenate([bn, z1], axis=1),            # dist to sink (flat idx n-1)
    ], axis=0)                                        # (2, n, Bb)

    # ---------- bidirectional Bellman-Ford (Jacobi) sweeps ----------
    def sweep(_, dist):
        hh = dist + half_c                            # D[u] + 0.5*c[u]
        up = jnp.concatenate([big_m, hh[:, :n - m]], axis=1)                 # u = k - m
        down = jnp.concatenate([hh[:, m:], big_m], axis=1)                   # u = k + m
        left = jnp.where(no_left, BIG,
                         jnp.concatenate([big_1, hh[:, :n - 1]], axis=1))    # u = k - 1
        right = jnp.where(no_right, BIG,
                          jnp.concatenate([hh[:, 1:], big_1], axis=1))       # u = k + 1
        nmin = jnp.minimum(jnp.minimum(up, down), jnp.minimum(left, right))
        return jnp.minimum(dist, nmin + half_c)

    # <= n-1 sweeps settle every shortest path; tiny body -> fully unrolled.
    dist = lax.fori_loop(0, n - 1, sweep, d_init, unroll=True)

    # ---------- path recovery: v on shortest path <=> d_src[v] + d_snk[v] == total ----------
    d_src = dist[0]                                   # (n, Bb)
    d_snk = dist[1]                                   # (n, Bb)
    total = d_src[n - 1:, :]                          # (1, Bb) source->sink distance
    tol = 1e-4 * (jnp.abs(total) + 1.0)
    on_path = (d_src + d_snk) <= (total + tol)
    out_ref[...] = on_path.astype(jnp.float32)        # lane-dense (n, Bb) store


def pert_shortest_path_net(d, W1, b1, W2, b2, m):
    """Eval-mode forward of Pert_ShortestPathNet.

    d : (B, context_size) context vectors.
    W1: (2*context, context), b1: (2*context,)   -- PyTorch fc_1 layout.
    W2: (m*m, 2*context),     b2: (m*m,)         -- PyTorch fc_2 layout.
    Returns the binary shortest-path grid, shape (B, m, m), float32.
    """
    B, C = d.shape
    H = W1.shape[0]
    n = m * m

    Bb = B if B <= 128 else 128
    assert B % Bb == 0, "batch must be <= 128 or a multiple of 128"

    # Host-precomputed grid-column boundary masks (row-major flat indexing).
    cols = jnp.arange(n, dtype=jnp.int32) % m
    no_left = (cols == 0).astype(jnp.float32).reshape(n, 1)
    no_right = (cols == m - 1).astype(jnp.float32).reshape(n, 1)

    full = lambda shape: pl.BlockSpec(shape, lambda i: (0, 0))

    outT = pl.pallas_call(
        functools.partial(_pert_sp_kernel, m=m),
        out_shape=jax.ShapeDtypeStruct((n, B), jnp.float32),
        grid=(B // Bb,),
        in_specs=[
            pl.BlockSpec((C, Bb), lambda i: (0, i)),   # d^T, batch blocked on lanes
            full((H, C)),                              # fc_1 weight (PyTorch layout)
            full((H, 1)),                              # fc_1 bias
            full((n, H)),                              # fc_2 weight (PyTorch layout)
            full((n, 1)),                              # fc_2 bias
            full((n, 1)),                              # no-left-neighbor mask
            full((n, 1)),                              # no-right-neighbor mask
        ],
        out_specs=pl.BlockSpec((n, Bb), lambda i: (0, i)),
        compiler_params=pltpu.CompilerParams(
            dimension_semantics=("parallel",)),
    )(
        d.T.astype(jnp.float32),
        W1.astype(jnp.float32),
        b1.reshape(-1, 1).astype(jnp.float32),
        W2.astype(jnp.float32),
        b2.reshape(-1, 1).astype(jnp.float32),
        no_left,
        no_right,
    )
    # Layout plumbing outside the kernel: (m*m, B) -> (B, m, m).
    return outT.T.reshape(B, m, m)


if __name__ == "__main__":
    key = jax.random.PRNGKey(0)
    k_d, k_w1, k_b1, k_w2, k_b2 = jax.random.split(key, 5)

    m = 5                       # 5x5 grid -> 25 vertex costs
    context_size = 8
    hidden = 2 * context_size   # 16
    batch = 8

    # PyTorch nn.Linear-style init (uniform +/- 1/sqrt(fan_in)).
    s1 = 1.0 / jnp.sqrt(jnp.float32(context_size))
    s2 = 1.0 / jnp.sqrt(jnp.float32(hidden))
    W1 = jax.random.uniform(k_w1, (hidden, context_size), jnp.float32, -s1, s1)
    b1 = jax.random.uniform(k_b1, (hidden,), jnp.float32, -s1, s1)
    W2 = jax.random.uniform(k_w2, (m * m, hidden), jnp.float32, -s2, s2)
    b2 = jax.random.uniform(k_b2, (m * m,), jnp.float32, -s2, s2)

    d = jax.random.normal(k_d, (batch, context_size), jnp.float32)

    path = pert_shortest_path_net(d, W1, b1, W2, b2, m)
    jax.block_until_ready(path)

    assert path.shape == (batch, m, m) and path.dtype == jnp.float32
    assert bool(jnp.all((path == 0.0) | (path == 1.0)))
    print("KERNEL_OK")
</pallas_src>

<mosaic_0001>
module attributes {stable_mosaic.version = 11 : i64} {
  func.func @_pert_sp_kernel(%arg0: i32, %arg1: memref<8x8xf32, #tpu.memory_space<vmem>>, %arg2: memref<16x8xf32, #tpu.memory_space<vmem>>, %arg3: memref<16x1xf32, #tpu.memory_space<vmem>>, %arg4: memref<25x16xf32, #tpu.memory_space<vmem>>, %arg5: memref<25x1xf32, #tpu.memory_space<vmem>>, %arg6: memref<25x1xf32, #tpu.memory_space<vmem>>, %arg7: memref<25x1xf32, #tpu.memory_space<vmem>>, %arg8: memref<25x8xf32, #tpu.memory_space<vmem>>) attributes {dimension_semantics = [#tpu.dimension_semantics<parallel>], iteration_bounds = array<i64: 1>, scalar_prefetch = 0 : i64, scratch_operands = 0 : i64, tpu.core_type = #tpu.core_type<tc>, window_params = [{transform_indices = @transform_0, window_bounds = array<i64: 8, 8>}, {pipeline_mode = #tpu.pipeline_mode<synchronous>, transform_indices = @transform_1, window_bounds = array<i64: 16, 8>}, {pipeline_mode = #tpu.pipeline_mode<synchronous>, transform_indices = @transform_2, window_bounds = array<i64: 16, 1>}, {pipeline_mode = #tpu.pipeline_mode<synchronous>, transform_indices = @transform_3, window_bounds = array<i64: 25, 16>}, {pipeline_mode = #tpu.pipeline_mode<synchronous>, transform_indices = @transform_4, window_bounds = array<i64: 25, 1>}, {pipeline_mode = #tpu.pipeline_mode<synchronous>, transform_indices = @transform_5, window_bounds = array<i64: 25, 1>}, {pipeline_mode = #tpu.pipeline_mode<synchronous>, transform_indices = @transform_6, window_bounds = array<i64: 25, 1>}, {transform_indices = @transform_7, window_bounds = array<i64: 25, 8>}]} {
    %c0 = arith.constant 0 : index
    %c0_0 = arith.constant 0 : index
    %0 = vector.load %arg1[%c0, %c0_0] : memref<8x8xf32, #tpu.memory_space<vmem>>, vector<8x8xf32>
    %c0_1 = arith.constant 0 : index
    %c0_2 = arith.constant 0 : index
    %1 = vector.load %arg2[%c0_1, %c0_2] : memref<16x8xf32, #tpu.memory_space<vmem>>, vector<16x8xf32>
    %cst = arith.constant dense<0.000000e+00> : vector<16x8xf32>
    %2 = tpu.matmul %1, %0, %cst {dimension_numbers = #tpu.dot_dimension_numbers<[1], [0], [0], [1], [0, 0, 1, 1], [], []>} : vector<16x8xf32>, vector<8x8xf32>, vector<16x8xf32> -> vector<16x8xf32>
    %c0_3 = arith.constant 0 : index
    %c0_4 = arith.constant 0 : index
    %3 = vector.load %arg3[%c0_3, %c0_4] : memref<16x1xf32, #tpu.memory_space<vmem>>, vector<16x1xf32>
    %4 = vector.broadcast %3 : vector<16x1xf32> to vector<16x8xf32>
    %5 = arith.addf %2, %4 : vector<16x8xf32>
    %cst_5 = arith.constant 0.000000e+00 : f32
    %6 = vector.broadcast %cst_5 : f32 to vector<16x8xf32>
    %7 = arith.cmpf ogt, %5, %6 : vector<16x8xf32>
    %cst_6 = arith.constant 1.000000e-01 : f32
    %8 = vector.broadcast %cst_6 : f32 to vector<16x8xf32>
    %9 = arith.mulf %8, %5 : vector<16x8xf32>
    %10 = arith.select %7, %5, %9 : vector<16x8xi1>, vector<16x8xf32>
    %c0_7 = arith.constant 0 : index
    %c0_8 = arith.constant 0 : index
    %11 = vector.load %arg4[%c0_7, %c0_8] : memref<25x16xf32, #tpu.memory_space<vmem>>, vector<25x16xf32>
    %cst_9 = arith.constant dense<0.000000e+00> : vector<25x8xf32>
    %12 = tpu.matmul %11, %10, %cst_9 {dimension_numbers = #tpu.dot_dimension_numbers<[1], [0], [0], [1], [0, 0, 1, 1], [], []>} : vector<25x16xf32>, vector<16x8xf32>, vector<25x8xf32> -> vector<25x8xf32>
    %c0_10 = arith.constant 0 : index
    %c0_11 = arith.constant 0 : index
    %13 = vector.load %arg5[%c0_10, %c0_11] : memref<25x1xf32, #tpu.memory_space<vmem>>, vector<25x1xf32>
    %14 = vector.broadcast %13 : vector<25x1xf32> to vector<25x8xf32>
    %15 = arith.addf %12, %14 : vector<25x8xf32>
    %cst_12 = arith.constant 5.000000e-01 : f32
    %16 = vector.broadcast %cst_12 : f32 to vector<25x8xf32>
    %17 = arith.mulf %16, %15 : vector<25x8xf32>
    %18 = vector.shape_cast %17 : vector<25x8xf32> to vector<1x25x8xf32>
    %cst_13 = arith.constant 1.000000e+09 : f32
    %19 = vector.broadcast %cst_13 : f32 to vector<2x5x8xf32>
    %cst_14 = arith.constant 1.000000e+09 : f32
    %20 = vector.broadcast %cst_14 : f32 to vector<2x1x8xf32>
    %c0_15 = arith.constant 0 : index
    %c0_16 = arith.constant 0 : index
    %21 = vector.load %arg6[%c0_15, %c0_16] : memref<25x1xf32, #tpu.memory_space<vmem>>, vector<25x1xf32>
    %cst_17 = arith.constant 5.000000e-01 : f32
    %22 = vector.broadcast %cst_17 : f32 to vector<25x1xf32>
    %23 = arith.cmpf ogt, %21, %22 : vector<25x1xf32>
    %c0_18 = arith.constant 0 : index
    %c0_19 = arith.constant 0 : index
    %24 = vector.load %arg7[%c0_18, %c0_19] : memref<25x1xf32, #tpu.memory_space<vmem>>, vector<25x1xf32>
    %cst_20 = arith.constant 5.000000e-01 : f32
    %25 = vector.broadcast %cst_20 : f32 to vector<25x1xf32>
    %26 = arith.cmpf ogt, %24, %25 : vector<25x1xf32>
    %cst_21 = arith.constant 0.000000e+00 : f32
    %27 = vector.broadcast %cst_21 : f32 to vector<1x1x8xf32>
    %cst_22 = arith.constant 1.000000e+09 : f32
    %28 = vector.broadcast %cst_22 : f32 to vector<1x24x8xf32>
    %29 = tpu.concatenate %27, %28 in 1 : vector<1x1x8xf32>, vector<1x24x8xf32> -> vector<1x25x8xf32>
    %30 = tpu.concatenate %28, %27 in 1 : vector<1x24x8xf32>, vector<1x1x8xf32> -> vector<1x25x8xf32>
    %31 = tpu.concatenate %29, %30 in 0 : vector<1x25x8xf32>, vector<1x25x8xf32> -> vector<2x25x8xf32>
    %c0_i32 = arith.constant 0 : i32
    %32 = vector.broadcast %18 : vector<1x25x8xf32> to vector<2x25x8xf32>
    %33 = arith.addf %31, %32 : vector<2x25x8xf32>
    %34 = vector.extract_strided_slice %33 {offsets = [0, 0, 0], sizes = [2, 20, 8], strides = [1, 1, 1]} : vector<2x25x8xf32> to vector<2x20x8xf32>
    %35 = tpu.concatenate %19, %34 in 1 : vector<2x5x8xf32>, vector<2x20x8xf32> -> vector<2x25x8xf32>
    %36 = vector.extract_strided_slice %33 {offsets = [0, 5, 0], sizes = [2, 20, 8], strides = [1, 1, 1]} : vector<2x25x8xf32> to vector<2x20x8xf32>
    %37 = tpu.concatenate %36, %19 in 1 : vector<2x20x8xf32>, vector<2x5x8xf32> -> vector<2x25x8xf32>
    %38 = vector.extract_strided_slice %33 {offsets = [0, 0, 0], sizes = [2, 24, 8], strides = [1, 1, 1]} : vector<2x25x8xf32> to vector<2x24x8xf32>
    %39 = tpu.concatenate %20, %38 in 1 : vector<2x1x8xf32>, vector<2x24x8xf32> -> vector<2x25x8xf32>
    %cst_23 = arith.constant 1.000000e+09 : f32
    %40 = vector.shape_cast %23 : vector<25x1xi1> to vector<1x25x1xi1>
    %41 = vector.broadcast %40 : vector<1x25x1xi1> to vector<2x25x8xi1>
    %42 = vector.broadcast %cst_23 : f32 to vector<2x25x8xf32>
    %43 = arith.select %41, %42, %39 : vector<2x25x8xi1>, vector<2x25x8xf32>
    %44 = vector.extract_strided_slice %33 {offsets = [0, 1, 0], sizes = [2, 24, 8], strides = [1, 1, 1]} : vector<2x25x8xf32> to vector<2x24x8xf32>
    %45 = tpu.concatenate %44, %20 in 1 : vector<2x24x8xf32>, vector<2x1x8xf32> -> vector<2x25x8xf32>
    %cst_24 = arith.constant 1.000000e+09 : f32
    %46 = vector.shape_cast %26 : vector<25x1xi1> to vector<1x25x1xi1>
    %47 = vector.broadcast %46 : vector<1x25x1xi1> to vector<2x25x8xi1>
    %48 = vector.broadcast %cst_24 : f32 to vector<2x25x8xf32>
    %49 = arith.select %47, %48, %45 : vector<2x25x8xi1>, vector<2x25x8xf32>
    %50 = arith.minimumf %35, %37 : vector<2x25x8xf32>
    %51 = arith.minimumf %43, %49 : vector<2x25x8xf32>
    %52 = arith.minimumf %50, %51 : vector<2x25x8xf32>
    %53 = vector.broadcast %18 : vector<1x25x8xf32> to vector<2x25x8xf32>
    %54 = arith.addf %52, %53 : vector<2x25x8xf32>
    %55 = arith.minimumf %31, %54 : vector<2x25x8xf32>
    %c1_i32 = arith.constant 1 : i32
    %56 = vector.broadcast %18 : vector<1x25x8xf32> to vector<2x25x8xf32>
    %57 = arith.addf %55, %56 : vector<2x25x8xf32>
    %58 = vector.extract_strided_slice %57 {offsets = [0, 0, 0], sizes = [2, 20, 8], strides = [1, 1, 1]} : vector<2x25x8xf32> to vector<2x20x8xf32>
    %59 = tpu.concatenate %19, %58 in 1 : vector<2x5x8xf32>, vector<2x20x8xf32> -> vector<2x25x8xf32>
    %60 = vector.extract_strided_slice %57 {offsets = [0, 5, 0], sizes = [2, 20, 8], strides = [1, 1, 1]} : vector<2x25x8xf32> to vector<2x20x8xf32>
    %61 = tpu.concatenate %60, %19 in 1 : vector<2x20x8xf32>, vector<2x5x8xf32> -> vector<2x25x8xf32>
    %62 = vector.extract_strided_slice %57 {offsets = [0, 0, 0], sizes = [2, 24, 8], strides = [1, 1, 1]} : vector<2x25x8xf32> to vector<2x24x8xf32>
    %63 = tpu.concatenate %20, %62 in 1 : vector<2x1x8xf32>, vector<2x24x8xf32> -> vector<2x25x8xf32>
    %cst_25 = arith.constant 1.000000e+09 : f32
    %64 = vector.shape_cast %23 : vector<25x1xi1> to vector<1x25x1xi1>
    %65 = vector.broadcast %64 : vector<1x25x1xi1> to vector<2x25x8xi1>
    %66 = vector.broadcast %cst_25 : f32 to vector<2x25x8xf32>
    %67 = arith.select %65, %66, %63 : vector<2x25x8xi1>, vector<2x25x8xf32>
    %68 = vector.extract_strided_slice %57 {offsets = [0, 1, 0], sizes = [2, 24, 8], strides = [1, 1, 1]} : vector<2x25x8xf32> to vector<2x24x8xf32>
    %69 = tpu.concatenate %68, %20 in 1 : vector<2x24x8xf32>, vector<2x1x8xf32> -> vector<2x25x8xf32>
    %cst_26 = arith.constant 1.000000e+09 : f32
    %70 = vector.shape_cast %26 : vector<25x1xi1> to vector<1x25x1xi1>
    %71 = vector.broadcast %70 : vector<1x25x1xi1> to vector<2x25x8xi1>
    %72 = vector.broadcast %cst_26 : f32 to vector<2x25x8xf32>
    %73 = arith.select %71, %72, %69 : vector<2x25x8xi1>, vector<2x25x8xf32>
    %74 = arith.minimumf %59, %61 : vector<2x25x8xf32>
    %75 = arith.minimumf %67, %73 : vector<2x25x8xf32>
    %76 = arith.minimumf %74, %75 : vector<2x25x8xf32>
    %77 = vector.broadcast %18 : vector<1x25x8xf32> to vector<2x25x8xf32>
    %78 = arith.addf %76, %77 : vector<2x25x8xf32>
    %79 = arith.minimumf %55, %78 : vector<2x25x8xf32>
    %c2_i32 = arith.constant 2 : i32
    %80 = vector.broadcast %18 : vector<1x25x8xf32> to vector<2x25x8xf32>
    %81 = arith.addf %79, %80 : vector<2x25x8xf32>
    %82 = vector.extract_strided_slice %81 {offsets = [0, 0, 0], sizes = [2, 20, 8], strides = [1, 1, 1]} : vector<2x25x8xf32> to vector<2x20x8xf32>
    %83 = tpu.concatenate %19, %82 in 1 : vector<2x5x8xf32>, vector<2x20x8xf32> -> vector<2x25x8xf32>
    %84 = vector.extract_strided_slice %81 {offsets = [0, 5, 0], sizes = [2, 20, 8], strides = [1, 1, 1]} : vector<2x25x8xf32> to vector<2x20x8xf32>
    %85 = tpu.concatenate %84, %19 in 1 : vector<2x20x8xf32>, vector<2x5x8xf32> -> vector<2x25x8xf32>
    %86 = vector.extract_strided_slice %81 {offsets = [0, 0, 0], sizes = [2, 24, 8], strides = [1, 1, 1]} : vector<2x25x8xf32> to vector<2x24x8xf32>
    %87 = tpu.concatenate %20, %86 in 1 : vector<2x1x8xf32>, vector<2x24x8xf32> -> vector<2x25x8xf32>
    %cst_27 = arith.constant 1.000000e+09 : f32
    %88 = vector.shape_cast %23 : vector<25x1xi1> to vector<1x25x1xi1>
    %89 = vector.broadcast %88 : vector<1x25x1xi1> to vector<2x25x8xi1>
    %90 = vector.broadcast %cst_27 : f32 to vector<2x25x8xf32>
    %91 = arith.select %89, %90, %87 : vector<2x25x8xi1>, vector<2x25x8xf32>
    %92 = vector.extract_strided_slice %81 {offsets = [0, 1, 0], sizes = [2, 24, 8], strides = [1, 1, 1]} : vector<2x25x8xf32> to vector<2x24x8xf32>
    %93 = tpu.concatenate %92, %20 in 1 : vector<2x24x8xf32>, vector<2x1x8xf32> -> vector<2x25x8xf32>
    %cst_28 = arith.constant 1.000000e+09 : f32
    %94 = vector.shape_cast %26 : vector<25x1xi1> to vector<1x25x1xi1>
    %95 = vector.broadcast %94 : vector<1x25x1xi1> to vector<2x25x8xi1>
    %96 = vector.broadcast %cst_28 : f32 to vector<2x25x8xf32>
    %97 = arith.select %95, %96, %93 : vector<2x25x8xi1>, vector<2x25x8xf32>
    %98 = arith.minimumf %83, %85 : vector<2x25x8xf32>
    %99 = arith.minimumf %91, %97 : vector<2x25x8xf32>
    %100 = arith.minimumf %98, %99 : vector<2x25x8xf32>
    %101 = vector.broadcast %18 : vector<1x25x8xf32> to vector<2x25x8xf32>
    %102 = arith.addf %100, %101 : vector<2x25x8xf32>
    %103 = arith.minimumf %79, %102 : vector<2x25x8xf32>
    %c3_i32 = arith.constant 3 : i32
    %104 = vector.broadcast %18 : vector<1x25x8xf32> to vector<2x25x8xf32>
    %105 = arith.addf %103, %104 : vector<2x25x8xf32>
    %106 = vector.extract_strided_slice %105 {offsets = [0, 0, 0], sizes = [2, 20, 8], strides = [1, 1, 1]} : vector<2x25x8xf32> to vector<2x20x8xf32>
    %107 = tpu.concatenate %19, %106 in 1 : vector<2x5x8xf32>, vector<2x20x8xf32> -> vector<2x25x8xf32>
    %108 = vector.extract_strided_slice %105 {offsets = [0, 5, 0], sizes = [2, 20, 8], strides = [1, 1, 1]} : vector<2x25x8xf32> to vector<2x20x8xf32>
    %109 = tpu.concatenate %108, %19 in 1 : vector<2x20x8xf32>, vector<2x5x8xf32> -> vector<2x25x8xf32>
    %110 = vector.extract_strided_slice %105 {offsets = [0, 0, 0], sizes = [2, 24, 8], strides = [1, 1, 1]} : vector<2x25x8xf32> to vector<2x24x8xf32>
    %111 = tpu.concatenate %20, %110 in 1 : vector<2x1x8xf32>, vector<2x24x8xf32> -> vector<2x25x8xf32>
    %cst_29 = arith.constant 1.000000e+09 : f32
    %112 = vector.shape_cast %23 : vector<25x1xi1> to vector<1x25x1xi1>
    %113 = vector.broadcast %112 : vector<1x25x1xi1> to vector<2x25x8xi1>
    %114 = vector.broadcast %cst_29 : f32 to vector<2x25x8xf32>
    %115 = arith.select %113, %114, %111 : vector<2x25x8xi1>, vector<2x25x8xf32>
    %116 = vector.extract_strided_slice %105 {offsets = [0, 1, 0], sizes = [2, 24, 8], strides = [1, 1, 1]} : vector<2x25x8xf32> to vector<2x24x8xf32>
    %117 = tpu.concatenate %116, %20 in 1 : vector<2x24x8xf32>, vector<2x1x8xf32> -> vector<2x25x8xf32>
    %cst_30 = arith.constant 1.000000e+09 : f32
    %118 = vector.shape_cast %26 : vector<25x1xi1> to vector<1x25x1xi1>
    %119 = vector.broadcast %118 : vector<1x25x1xi1> to vector<2x25x8xi1>
    %120 = vector.broadcast %cst_30 : f32 to vector<2x25x8xf32>
    %121 = arith.select %119, %120, %117 : vector<2x25x8xi1>, vector<2x25x8xf32>
    %122 = arith.minimumf %107, %109 : vector<2x25x8xf32>
    %123 = arith.minimumf %115, %121 : vector<2x25x8xf32>
    %124 = arith.minimumf %122, %123 : vector<2x25x8xf32>
    %125 = vector.broadcast %18 : vector<1x25x8xf32> to vector<2x25x8xf32>
    %126 = arith.addf %124, %125 : vector<2x25x8xf32>
    %127 = arith.minimumf %103, %126 : vector<2x25x8xf32>
    %c4_i32 = arith.constant 4 : i32
    %128 = vector.broadcast %18 : vector<1x25x8xf32> to vector<2x25x8xf32>
    %129 = arith.addf %127, %128 : vector<2x25x8xf32>
    %130 = vector.extract_strided_slice %129 {offsets = [0, 0, 0], sizes = [2, 20, 8], strides = [1, 1, 1]} : vector<2x25x8xf32> to vector<2x20x8xf32>
    %131 = tpu.concatenate %19, %130 in 1 : vector<2x5x8xf32>, vector<2x20x8xf32> -> vector<2x25x8xf32>
    %132 = vector.extract_strided_slice %129 {offsets = [0, 5, 0], sizes = [2, 20, 8], strides = [1, 1, 1]} : vector<2x25x8xf32> to vector<2x20x8xf32>
    %133 = tpu.concatenate %132, %19 in 1 : vector<2x20x8xf32>, vector<2x5x8xf32> -> vector<2x25x8xf32>
    %134 = vector.extract_strided_slice %129 {offsets = [0, 0, 0], sizes = [2, 24, 8], strides = [1, 1, 1]} : vector<2x25x8xf32> to vector<2x24x8xf32>
    %135 = tpu.concatenate %20, %134 in 1 : vector<2x1x8xf32>, vector<2x24x8xf32> -> vector<2x25x8xf32>
    %cst_31 = arith.constant 1.000000e+09 : f32
    %136 = vector.shape_cast %23 : vector<25x1xi1> to vector<1x25x1xi1>
    %137 = vector.broadcast %136 : vector<1x25x1xi1> to vector<2x25x8xi1>
    %138 = vector.broadcast %cst_31 : f32 to vector<2x25x8xf32>
    %139 = arith.select %137, %138, %135 : vector<2x25x8xi1>, vector<2x25x8xf32>
    %140 = vector.extract_strided_slice %129 {offsets = [0, 1, 0], sizes = [2, 24, 8], strides = [1, 1, 1]} : vector<2x25x8xf32> to vector<2x24x8xf32>
    %141 = tpu.concatenate %140, %20 in 1 : vector<2x24x8xf32>, vector<2x1x8xf32> -> vector<2x25x8xf32>
    %cst_32 = arith.constant 1.000000e+09 : f32
    %142 = vector.shape_cast %26 : vector<25x1xi1> to vector<1x25x1xi1>
    %143 = vector.broadcast %142 : vector<1x25x1xi1> to vector<2x25x8xi1>
    %144 = vector.broadcast %cst_32 : f32 to vector<2x25x8xf32>
    %145 = arith.select %143, %144, %141 : vector<2x25x8xi1>, vector<2x25x8xf32>
    %146 = arith.minimumf %131, %133 : vector<2x25x8xf32>
    %147 = arith.minimumf %139, %145 : vector<2x25x8xf32>
    %148 = arith.minimumf %146, %147 : vector<2x25x8xf32>
    %149 = vector.broadcast %18 : vector<1x25x8xf32> to vector<2x25x8xf32>
    %150 = arith.addf %148, %149 : vector<2x25x8xf32>
    %151 = arith.minimumf %127, %150 : vector<2x25x8xf32>
    %c5_i32 = arith.constant 5 : i32
    %152 = vector.broadcast %18 : vector<1x25x8xf32> to vector<2x25x8xf32>
    %153 = arith.addf %151, %152 : vector<2x25x8xf32>
    %154 = vector.extract_strided_slice %153 {offsets = [0, 0, 0], sizes = [2, 20, 8], strides = [1, 1, 1]} : vector<2x25x8xf32> to vector<2x20x8xf32>
    %155 = tpu.concatenate %19, %154 in 1 : vector<2x5x8xf32>, vector<2x20x8xf32> -> vector<2x25x8xf32>
    %156 = vector.extract_strided_slice %153 {offsets = [0, 5, 0], sizes = [2, 20, 8], strides = [1, 1, 1]} : vector<2x25x8xf32> to vector<2x20x8xf32>
    %157 = tpu.concatenate %156, %19 in 1 : vector<2x20x8xf32>, vector<2x5x8xf32> -> vector<2x25x8xf32>
    %158 = vector.extract_strided_slice %153 {offsets = [0, 0, 0], sizes = [2, 24, 8], strides = [1, 1, 1]} : vector<2x25x8xf32> to vector<2x24x8xf32>
    %159 = tpu.concatenate %20, %158 in 1 : vector<2x1x8xf32>, vector<2x24x8xf32> -> vector<2x25x8xf32>
    %cst_33 = arith.constant 1.000000e+09 : f32
    %160 = vector.shape_cast %23 : vector<25x1xi1> to vector<1x25x1xi1>
    %161 = vector.broadcast %160 : vector<1x25x1xi1> to vector<2x25x8xi1>
    %162 = vector.broadcast %cst_33 : f32 to vector<2x25x8xf32>
    %163 = arith.select %161, %162, %159 : vector<2x25x8xi1>, vector<2x25x8xf32>
    %164 = vector.extract_strided_slice %153 {offsets = [0, 1, 0], sizes = [2, 24, 8], strides = [1, 1, 1]} : vector<2x25x8xf32> to vector<2x24x8xf32>
    %165 = tpu.concatenate %164, %20 in 1 : vector<2x24x8xf32>, vector<2x1x8xf32> -> vector<2x25x8xf32>
    %cst_34 = arith.constant 1.000000e+09 : f32
    %166 = vector.shape_cast %26 : vector<25x1xi1> to vector<1x25x1xi1>
    %167 = vector.broadcast %166 : vector<1x25x1xi1> to vector<2x25x8xi1>
    %168 = vector.broadcast %cst_34 : f32 to vector<2x25x8xf32>
    %169 = arith.select %167, %168, %165 : vector<2x25x8xi1>, vector<2x25x8xf32>
    %170 = arith.minimumf %155, %157 : vector<2x25x8xf32>
    %171 = arith.minimumf %163, %169 : vector<2x25x8xf32>
    %172 = arith.minimumf %170, %171 : vector<2x25x8xf32>
    %173 = vector.broadcast %18 : vector<1x25x8xf32> to vector<2x25x8xf32>
    %174 = arith.addf %172, %173 : vector<2x25x8xf32>
    %175 = arith.minimumf %151, %174 : vector<2x25x8xf32>
    %c6_i32 = arith.constant 6 : i32
    %176 = vector.broadcast %18 : vector<1x25x8xf32> to vector<2x25x8xf32>
    %177 = arith.addf %175, %176 : vector<2x25x8xf32>
    %178 = vector.extract_strided_slice %177 {offsets = [0, 0, 0], sizes = [2, 20, 8], strides = [1, 1, 1]} : vector<2x25x8xf32> to vector<2x20x8xf32>
    %179 = tpu.concatenate %19, %178 in 1 : vector<2x5x8xf32>, vector<2x20x8xf32> -> vector<2x25x8xf32>
    %180 = vector.extract_strided_slice %177 {offsets = [0, 5, 0], sizes = [2, 20, 8], strides = [1, 1, 1]} : vector<2x25x8xf32> to vector<2x20x8xf32>
    %181 = tpu.concatenate %180, %19 in 1 : vector<2x20x8xf32>, vector<2x5x8xf32> -> vector<2x25x8xf32>
    %182 = vector.extract_strided_slice %177 {offsets = [0, 0, 0], sizes = [2, 24, 8], strides = [1, 1, 1]} : vector<2x25x8xf32> to vector<2x24x8xf32>
    %183 = tpu.concatenate %20, %182 in 1 : vector<2x1x8xf32>, vector<2x24x8xf32> -> vector<2x25x8xf32>
    %cst_35 = arith.constant 1.000000e+09 : f32
    %184 = vector.shape_cast %23 : vector<25x1xi1> to vector<1x25x1xi1>
    %185 = vector.broadcast %184 : vector<1x25x1xi1> to vector<2x25x8xi1>
    %186 = vector.broadcast %cst_35 : f32 to vector<2x25x8xf32>
    %187 = arith.select %185, %186, %183 : vector<2x25x8xi1>, vector<2x25x8xf32>
    %188 = vector.extract_strided_slice %177 {offsets = [0, 1, 0], sizes = [2, 24, 8], strides = [1, 1, 1]} : vector<2x25x8xf32> to vector<2x24x8xf32>
    %189 = tpu.concatenate %188, %20 in 1 : vector<2x24x8xf32>, vector<2x1x8xf32> -> vector<2x25x8xf32>
    %cst_36 = arith.constant 1.000000e+09 : f32
    %190 = vector.shape_cast %26 : vector<25x1xi1> to vector<1x25x1xi1>
    %191 = vector.broadcast %190 : vector<1x25x1xi1> to vector<2x25x8xi1>
    %192 = vector.broadcast %cst_36 : f32 to vector<2x25x8xf32>
    %193 = arith.select %191, %192, %189 : vector<2x25x8xi1>, vector<2x25x8xf32>
    %194 = arith.minimumf %179, %181 : vector<2x25x8xf32>
    %195 = arith.minimumf %187, %193 : vector<2x25x8xf32>
    %196 = arith.minimumf %194, %195 : vector<2x25x8xf32>
    %197 = vector.broadcast %18 : vector<1x25x8xf32> to vector<2x25x8xf32>
    %198 = arith.addf %196, %197 : vector<2x25x8xf32>
    %199 = arith.minimumf %175, %198 : vector<2x25x8xf32>
    %c7_i32 = arith.constant 7 : i32
    %200 = vector.broadcast %18 : vector<1x25x8xf32> to vector<2x25x8xf32>
    %201 = arith.addf %199, %200 : vector<2x25x8xf32>
    %202 = vector.extract_strided_slice %201 {offsets = [0, 0, 0], sizes = [2, 20, 8], strides = [1, 1, 1]} : vector<2x25x8xf32> to vector<2x20x8xf32>
    %203 = tpu.concatenate %19, %202 in 1 : vector<2x5x8xf32>, vector<2x20x8xf32> -> vector<2x25x8xf32>
    %204 = vector.extract_strided_slice %201 {offsets = [0, 5, 0], sizes = [2, 20, 8], strides = [1, 1, 1]} : vector<2x25x8xf32> to vector<2x20x8xf32>
    %205 = tpu.concatenate %204, %19 in 1 : vector<2x20x8xf32>, vector<2x5x8xf32> -> vector<2x25x8xf32>
    %206 = vector.extract_strided_slice %201 {offsets = [0, 0, 0], sizes = [2, 24, 8], strides = [1, 1, 1]} : vector<2x25x8xf32> to vector<2x24x8xf32>
    %207 = tpu.concatenate %20, %206 in 1 : vector<2x1x8xf32>, vector<2x24x8xf32> -> vector<2x25x8xf32>
    %cst_37 = arith.constant 1.000000e+09 : f32
    %208 = vector.shape_cast %23 : vector<25x1xi1> to vector<1x25x1xi1>
    %209 = vector.broadcast %208 : vector<1x25x1xi1> to vector<2x25x8xi1>
    %210 = vector.broadcast %cst_37 : f32 to vector<2x25x8xf32>
    %211 = arith.select %209, %210, %207 : vector<2x25x8xi1>, vector<2x25x8xf32>
    %212 = vector.extract_strided_slice %201 {offsets = [0, 1, 0], sizes = [2, 24, 8], strides = [1, 1, 1]} : vector<2x25x8xf32> to vector<2x24x8xf32>
    %213 = tpu.concatenate %212, %20 in 1 : vector<2x24x8xf32>, vector<2x1x8xf32> -> vector<2x25x8xf32>
    %cst_38 = arith.constant 1.000000e+09 : f32
    %214 = vector.shape_cast %26 : vector<25x1xi1> to vector<1x25x1xi1>
    %215 = vector.broadcast %214 : vector<1x25x1xi1> to vector<2x25x8xi1>
    %216 = vector.broadcast %cst_38 : f32 to vector<2x25x8xf32>
    %217 = arith.select %215, %216, %213 : vector<2x25x8xi1>, vector<2x25x8xf32>
    %218 = arith.minimumf %203, %205 : vector<2x25x8xf32>
    %219 = arith.minimumf %211, %217 : vector<2x25x8xf32>
    %220 = arith.minimumf %218, %219 : vector<2x25x8xf32>
    %221 = vector.broadcast %18 : vector<1x25x8xf32> to vector<2x25x8xf32>
    %222 = arith.addf %220, %221 : vector<2x25x8xf32>
    %223 = arith.minimumf %199, %222 : vector<2x25x8xf32>
    %c8_i32 = arith.constant 8 : i32
    %224 = vector.broadcast %18 : vector<1x25x8xf32> to vector<2x25x8xf32>
    %225 = arith.addf %223, %224 : vector<2x25x8xf32>
    %226 = vector.extract_strided_slice %225 {offsets = [0, 0, 0], sizes = [2, 20, 8], strides = [1, 1, 1]} : vector<2x25x8xf32> to vector<2x20x8xf32>
    %227 = tpu.concatenate %19, %226 in 1 : vector<2x5x8xf32>, vector<2x20x8xf32> -> vector<2x25x8xf32>
    %228 = vector.extract_strided_slice %225 {offsets = [0, 5, 0], sizes = [2, 20, 8], strides = [1, 1, 1]} : vector<2x25x8xf32> to vector<2x20x8xf32>
    %229 = tpu.concatenate %228, %19 in 1 : vector<2x20x8xf32>, vector<2x5x8xf32> -> vector<2x25x8xf32>
    %230 = vector.extract_strided_slice %225 {offsets = [0, 0, 0], sizes = [2, 24, 8], strides = [1, 1, 1]} : vector<2x25x8xf32> to vector<2x24x8xf32>
    %231 = tpu.concatenate %20, %230 in 1 : vector<2x1x8xf32>, vector<2x24x8xf32> -> vector<2x25x8xf32>
    %cst_39 = arith.constant 1.000000e+09 : f32
    %232 = vector.shape_cast %23 : vector<25x1xi1> to vector<1x25x1xi1>
    %233 = vector.broadcast %232 : vector<1x25x1xi1> to vector<2x25x8xi1>
    %234 = vector.broadcast %cst_39 : f32 to vector<2x25x8xf32>
    %235 = arith.select %233, %234, %231 : vector<2x25x8xi1>, vector<2x25x8xf32>
    %236 = vector.extract_strided_slice %225 {offsets = [0, 1, 0], sizes = [2, 24, 8], strides = [1, 1, 1]} : vector<2x25x8xf32> to vector<2x24x8xf32>
    %237 = tpu.concatenate %236, %20 in 1 : vector<2x24x8xf32>, vector<2x1x8xf32> -> vector<2x25x8xf32>
    %cst_40 = arith.constant 1.000000e+09 : f32
    %238 = vector.shape_cast %26 : vector<25x1xi1> to vector<1x25x1xi1>
    %239 = vector.broadcast %238 : vector<1x25x1xi1> to vector<2x25x8xi1>
    %240 = vector.broadcast %cst_40 : f32 to vector<2x25x8xf32>
    %241 = arith.select %239, %240, %237 : vector<2x25x8xi1>, vector<2x25x8xf32>
    %242 = arith.minimumf %227, %229 : vector<2x25x8xf32>
    %243 = arith.minimumf %235, %241 : vector<2x25x8xf32>
    %244 = arith.minimumf %242, %243 : vector<2x25x8xf32>
    %245 = vector.broadcast %18 : vector<1x25x8xf32> to vector<2x25x8xf32>
    %246 = arith.addf %244, %245 : vector<2x25x8xf32>
    %247 = arith.minimumf %223, %246 : vector<2x25x8xf32>
    %c9_i32 = arith.constant 9 : i32
    %248 = vector.broadcast %18 : vector<1x25x8xf32> to vector<2x25x8xf32>
    %249 = arith.addf %247, %248 : vector<2x25x8xf32>
    %250 = vector.extract_strided_slice %249 {offsets = [0, 0, 0], sizes = [2, 20, 8], strides = [1, 1, 1]} : vector<2x25x8xf32> to vector<2x20x8xf32>
    %251 = tpu.concatenate %19, %250 in 1 : vector<2x5x8xf32>, vector<2x20x8xf32> -> vector<2x25x8xf32>
    %252 = vector.extract_strided_slice %249 {offsets = [0, 5, 0], sizes = [2, 20, 8], strides = [1, 1, 1]} : vector<2x25x8xf32> to vector<2x20x8xf32>
    %253 = tpu.concatenate %252, %19 in 1 : vector<2x20x8xf32>, vector<2x5x8xf32> -> vector<2x25x8xf32>
    %254 = vector.extract_strided_slice %249 {offsets = [0, 0, 0], sizes = [2, 24, 8], strides = [1, 1, 1]} : vector<2x25x8xf32> to vector<2x24x8xf32>
    %255 = tpu.concatenate %20, %254 in 1 : vector<2x1x8xf32>, vector<2x24x8xf32> -> vector<2x25x8xf32>
    %cst_41 = arith.constant 1.000000e+09 : f32
    %256 = vector.shape_cast %23 : vector<25x1xi1> to vector<1x25x1xi1>
    %257 = vector.broadcast %256 : vector<1x25x1xi1> to vector<2x25x8xi1>
    %258 = vector.broadcast %cst_41 : f32 to vector<2x25x8xf32>
    %259 = arith.select %257, %258, %255 : vector<2x25x8xi1>, vector<2x25x8xf32>
    %260 = vector.extract_strided_slice %249 {offsets = [0, 1, 0], sizes = [2, 24, 8], strides = [1, 1, 1]} : vector<2x25x8xf32> to vector<2x24x8xf32>
    %261 = tpu.concatenate %260, %20 in 1 : vector<2x24x8xf32>, vector<2x1x8xf32> -> vector<2x25x8xf32>
    %cst_42 = arith.constant 1.000000e+09 : f32
    %262 = vector.shape_cast %26 : vector<25x1xi1> to vector<1x25x1xi1>
    %263 = vector.broadcast %262 : vector<1x25x1xi1> to vector<2x25x8xi1>
    %264 = vector.broadcast %cst_42 : f32 to vector<2x25x8xf32>
    %265 = arith.select %263, %264, %261 : vector<2x25x8xi1>, vector<2x25x8xf32>
    %266 = arith.minimumf %251, %253 : vector<2x25x8xf32>
    %267 = arith.minimumf %259, %265 : vector<2x25x8xf32>
    %268 = arith.minimumf %266, %267 : vector<2x25x8xf32>
    %269 = vector.broadcast %18 : vector<1x25x8xf32> to vector<2x25x8xf32>
    %270 = arith.addf %268, %269 : vector<2x25x8xf32>
    %271 = arith.minimumf %247, %270 : vector<2x25x8xf32>
    %c10_i32 = arith.constant 10 : i32
    %272 = vector.broadcast %18 : vector<1x25x8xf32> to vector<2x25x8xf32>
    %273 = arith.addf %271, %272 : vector<2x25x8xf32>
    %274 = vector.extract_strided_slice %273 {offsets = [0, 0, 0], sizes = [2, 20, 8], strides = [1, 1, 1]} : vector<2x25x8xf32> to vector<2x20x8xf32>
    %275 = tpu.concatenate %19, %274 in 1 : vector<2x5x8xf32>, vector<2x20x8xf32> -> vector<2x25x8xf32>
    %276 = vector.extract_strided_slice %273 {offsets = [0, 5, 0], sizes = [2, 20, 8], strides = [1, 1, 1]} : vector<2x25x8xf32> to vector<2x20x8xf32>
    %277 = tpu.concatenate %276, %19 in 1 : vector<2x20x8xf32>, vector<2x5x8xf32> -> vector<2x25x8xf32>
    %278 = vector.extract_strided_slice %273 {offsets = [0, 0, 0], sizes = [2, 24, 8], strides = [1, 1, 1]} : vector<2x25x8xf32> to vector<2x24x8xf32>
    %279 = tpu.concatenate %20, %278 in 1 : vector<2x1x8xf32>, vector<2x24x8xf32> -> vector<2x25x8xf32>
    %cst_43 = arith.constant 1.000000e+09 : f32
    %280 = vector.shape_cast %23 : vector<25x1xi1> to vector<1x25x1xi1>
    %281 = vector.broadcast %280 : vector<1x25x1xi1> to vector<2x25x8xi1>
    %282 = vector.broadcast %cst_43 : f32 to vector<2x25x8xf32>
    %283 = arith.select %281, %282, %279 : vector<2x25x8xi1>, vector<2x25x8xf32>
    %284 = vector.extract_strided_slice %273 {offsets = [0, 1, 0], sizes = [2, 24, 8], strides = [1, 1, 1]} : vector<2x25x8xf32> to vector<2x24x8xf32>
    %285 = tpu.concatenate %284, %20 in 1 : vector<2x24x8xf32>, vector<2x1x8xf32> -> vector<2x25x8xf32>
    %cst_44 = arith.constant 1.000000e+09 : f32
    %286 = vector.shape_cast %26 : vector<25x1xi1> to vector<1x25x1xi1>
    %287 = vector.broadcast %286 : vector<1x25x1xi1> to vector<2x25x8xi1>
    %288 = vector.broadcast %cst_44 : f32 to vector<2x25x8xf32>
    %289 = arith.select %287, %288, %285 : vector<2x25x8xi1>, vector<2x25x8xf32>
    %290 = arith.minimumf %275, %277 : vector<2x25x8xf32>
    %291 = arith.minimumf %283, %289 : vector<2x25x8xf32>
    %292 = arith.minimumf %290, %291 : vector<2x25x8xf32>
    %293 = vector.broadcast %18 : vector<1x25x8xf32> to vector<2x25x8xf32>
    %294 = arith.addf %292, %293 : vector<2x25x8xf32>
    %295 = arith.minimumf %271, %294 : vector<2x25x8xf32>
    %c11_i32 = arith.constant 11 : i32
    %296 = vector.broadcast %18 : vector<1x25x8xf32> to vector<2x25x8xf32>
    %297 = arith.addf %295, %296 : vector<2x25x8xf32>
    %298 = vector.extract_strided_slice %297 {offsets = [0, 0, 0], sizes = [2, 20, 8], strides = [1, 1, 1]} : vector<2x25x8xf32> to vector<2x20x8xf32>
    %299 = tpu.concatenate %19, %298 in 1 : vector<2x5x8xf32>, vector<2x20x8xf32> -> vector<2x25x8xf32>
    %300 = vector.extract_strided_slice %297 {offsets = [0, 5, 0], sizes = [2, 20, 8], strides = [1, 1, 1]} : vector<2x25x8xf32> to vector<2x20x8xf32>
    %301 = tpu.concatenate %300, %19 in 1 : vector<2x20x8xf32>, vector<2x5x8xf32> -> vector<2x25x8xf32>
    %302 = vector.extract_strided_slice %297 {offsets = [0, 0, 0], sizes = [2, 24, 8], strides = [1, 1, 1]} : vector<2x25x8xf32> to vector<2x24x8xf32>
    %303 = tpu.concatenate %20, %302 in 1 : vector<2x1x8xf32>, vector<2x24x8xf32> -> vector<2x25x8xf32>
    %cst_45 = arith.constant 1.000000e+09 : f32
    %304 = vector.shape_cast %23 : vector<25x1xi1> to vector<1x25x1xi1>
    %305 = vector.broadcast %304 : vector<1x25x1xi1> to vector<2x25x8xi1>
    %306 = vector.broadcast %cst_45 : f32 to vector<2x25x8xf32>
    %307 = arith.select %305, %306, %303 : vector<2x25x8xi1>, vector<2x25x8xf32>
    %308 = vector.extract_strided_slice %297 {offsets = [0, 1, 0], sizes = [2, 24, 8], strides = [1, 1, 1]} : vector<2x25x8xf32> to vector<2x24x8xf32>
    %309 = tpu.concatenate %308, %20 in 1 : vector<2x24x8xf32>, vector<2x1x8xf32> -> vector<2x25x8xf32>
    %cst_46 = arith.constant 1.000000e+09 : f32
    %310 = vector.shape_cast %26 : vector<25x1xi1> to vector<1x25x1xi1>
    %311 = vector.broadcast %310 : vector<1x25x1xi1> to vector<2x25x8xi1>
    %312 = vector.broadcast %cst_46 : f32 to vector<2x25x8xf32>
    %313 = arith.select %311, %312, %309 : vector<2x25x8xi1>, vector<2x25x8xf32>
    %314 = arith.minimumf %299, %301 : vector<2x25x8xf32>
    %315 = arith.minimumf %307, %313 : vector<2x25x8xf32>
    %316 = arith.minimumf %314, %315 : vector<2x25x8xf32>
    %317 = vector.broadcast %18 : vector<1x25x8xf32> to vector<2x25x8xf32>
    %318 = arith.addf %316, %317 : vector<2x25x8xf32>
    %319 = arith.minimumf %295, %318 : vector<2x25x8xf32>
    %c12_i32 = arith.constant 12 : i32
    %320 = vector.broadcast %18 : vector<1x25x8xf32> to vector<2x25x8xf32>
    %321 = arith.addf %319, %320 : vector<2x25x8xf32>
    %322 = vector.extract_strided_slice %321 {offsets = [0, 0, 0], sizes = [2, 20, 8], strides = [1, 1, 1]} : vector<2x25x8xf32> to vector<2x20x8xf32>
    %323 = tpu.concatenate %19, %322 in 1 : vector<2x5x8xf32>, vector<2x20x8xf32> -> vector<2x25x8xf32>
    %324 = vector.extract_strided_slice %321 {offsets = [0, 5, 0], sizes = [2, 20, 8], strides = [1, 1, 1]} : vector<2x25x8xf32> to vector<2x20x8xf32>
    %325 = tpu.concatenate %324, %19 in 1 : vector<2x20x8xf32>, vector<2x5x8xf32> -> vector<2x25x8xf32>
    %326 = vector.extract_strided_slice %321 {offsets = [0, 0, 0], sizes = [2, 24, 8], strides = [1, 1, 1]} : vector<2x25x8xf32> to vector<2x24x8xf32>
    %327 = tpu.concatenate %20, %326 in 1 : vector<2x1x8xf32>, vector<2x24x8xf32> -> vector<2x25x8xf32>
    %cst_47 = arith.constant 1.000000e+09 : f32
    %328 = vector.shape_cast %23 : vector<25x1xi1> to vector<1x25x1xi1>
    %329 = vector.broadcast %328 : vector<1x25x1xi1> to vector<2x25x8xi1>
    %330 = vector.broadcast %cst_47 : f32 to vector<2x25x8xf32>
    %331 = arith.select %329, %330, %327 : vector<2x25x8xi1>, vector<2x25x8xf32>
    %332 = vector.extract_strided_slice %321 {offsets = [0, 1, 0], sizes = [2, 24, 8], strides = [1, 1, 1]} : vector<2x25x8xf32> to vector<2x24x8xf32>
    %333 = tpu.concatenate %332, %20 in 1 : vector<2x24x8xf32>, vector<2x1x8xf32> -> vector<2x25x8xf32>
    %cst_48 = arith.constant 1.000000e+09 : f32
    %334 = vector.shape_cast %26 : vector<25x1xi1> to vector<1x25x1xi1>
    %335 = vector.broadcast %334 : vector<1x25x1xi1> to vector<2x25x8xi1>
    %336 = vector.broadcast %cst_48 : f32 to vector<2x25x8xf32>
    %337 = arith.select %335, %336, %333 : vector<2x25x8xi1>, vector<2x25x8xf32>
    %338 = arith.minimumf %323, %325 : vector<2x25x8xf32>
    %339 = arith.minimumf %331, %337 : vector<2x25x8xf32>
    %340 = arith.minimumf %338, %339 : vector<2x25x8xf32>
    %341 = vector.broadcast %18 : vector<1x25x8xf32> to vector<2x25x8xf32>
    %342 = arith.addf %340, %341 : vector<2x25x8xf32>
    %343 = arith.minimumf %319, %342 : vector<2x25x8xf32>
    %c13_i32 = arith.constant 13 : i32
    %344 = vector.broadcast %18 : vector<1x25x8xf32> to vector<2x25x8xf32>
    %345 = arith.addf %343, %344 : vector<2x25x8xf32>
    %346 = vector.extract_strided_slice %345 {offsets = [0, 0, 0], sizes = [2, 20, 8], strides = [1, 1, 1]} : vector<2x25x8xf32> to vector<2x20x8xf32>
    %347 = tpu.concatenate %19, %346 in 1 : vector<2x5x8xf32>, vector<2x20x8xf32> -> vector<2x25x8xf32>
    %348 = vector.extract_strided_slice %345 {offsets = [0, 5, 0], sizes = [2, 20, 8], strides = [1, 1, 1]} : vector<2x25x8xf32> to vector<2x20x8xf32>
    %349 = tpu.concatenate %348, %19 in 1 : vector<2x20x8xf32>, vector<2x5x8xf32> -> vector<2x25x8xf32>
    %350 = vector.extract_strided_slice %345 {offsets = [0, 0, 0], sizes = [2, 24, 8], strides = [1, 1, 1]} : vector<2x25x8xf32> to vector<2x24x8xf32>
    %351 = tpu.concatenate %20, %350 in 1 : vector<2x1x8xf32>, vector<2x24x8xf32> -> vector<2x25x8xf32>
    %cst_49 = arith.constant 1.000000e+09 : f32
    %352 = vector.shape_cast %23 : vector<25x1xi1> to vector<1x25x1xi1>
    %353 = vector.broadcast %352 : vector<1x25x1xi1> to vector<2x25x8xi1>
    %354 = vector.broadcast %cst_49 : f32 to vector<2x25x8xf32>
    %355 = arith.select %353, %354, %351 : vector<2x25x8xi1>, vector<2x25x8xf32>
    %356 = vector.extract_strided_slice %345 {offsets = [0, 1, 0], sizes = [2, 24, 8], strides = [1, 1, 1]} : vector<2x25x8xf32> to vector<2x24x8xf32>
    %357 = tpu.concatenate %356, %20 in 1 : vector<2x24x8xf32>, vector<2x1x8xf32> -> vector<2x25x8xf32>
    %cst_50 = arith.constant 1.000000e+09 : f32
    %358 = vector.shape_cast %26 : vector<25x1xi1> to vector<1x25x1xi1>
    %359 = vector.broadcast %358 : vector<1x25x1xi1> to vector<2x25x8xi1>
    %360 = vector.broadcast %cst_50 : f32 to vector<2x25x8xf32>
    %361 = arith.select %359, %360, %357 : vector<2x25x8xi1>, vector<2x25x8xf32>
    %362 = arith.minimumf %347, %349 : vector<2x25x8xf32>
    %363 = arith.minimumf %355, %361 : vector<2x25x8xf32>
    %364 = arith.minimumf %362, %363 : vector<2x25x8xf32>
    %365 = vector.broadcast %18 : vector<1x25x8xf32> to vector<2x25x8xf32>
    %366 = arith.addf %364, %365 : vector<2x25x8xf32>
    %367 = arith.minimumf %343, %366 : vector<2x25x8xf32>
    %c14_i32 = arith.constant 14 : i32
    %368 = vector.broadcast %18 : vector<1x25x8xf32> to vector<2x25x8xf32>
    %369 = arith.addf %367, %368 : vector<2x25x8xf32>
    %370 = vector.extract_strided_slice %369 {offsets = [0, 0, 0], sizes = [2, 20, 8], strides = [1, 1, 1]} : vector<2x25x8xf32> to vector<2x20x8xf32>
    %371 = tpu.concatenate %19, %370 in 1 : vector<2x5x8xf32>, vector<2x20x8xf32> -> vector<2x25x8xf32>
    %372 = vector.extract_strided_slice %369 {offsets = [0, 5, 0], sizes = [2, 20, 8], strides = [1, 1, 1]} : vector<2x25x8xf32> to vector<2x20x8xf32>
    %373 = tpu.concatenate %372, %19 in 1 : vector<2x20x8xf32>, vector<2x5x8xf32> -> vector<2x25x8xf32>
    %374 = vector.extract_strided_slice %369 {offsets = [0, 0, 0], sizes = [2, 24, 8], strides = [1, 1, 1]} : vector<2x25x8xf32> to vector<2x24x8xf32>
    %375 = tpu.concatenate %20, %374 in 1 : vector<2x1x8xf32>, vector<2x24x8xf32> -> vector<2x25x8xf32>
    %cst_51 = arith.constant 1.000000e+09 : f32
    %376 = vector.shape_cast %23 : vector<25x1xi1> to vector<1x25x1xi1>
    %377 = vector.broadcast %376 : vector<1x25x1xi1> to vector<2x25x8xi1>
    %378 = vector.broadcast %cst_51 : f32 to vector<2x25x8xf32>
    %379 = arith.select %377, %378, %375 : vector<2x25x8xi1>, vector<2x25x8xf32>
    %380 = vector.extract_strided_slice %369 {offsets = [0, 1, 0], sizes = [2, 24, 8], strides = [1, 1, 1]} : vector<2x25x8xf32> to vector<2x24x8xf32>
    %381 = tpu.concatenate %380, %20 in 1 : vector<2x24x8xf32>, vector<2x1x8xf32> -> vector<2x25x8xf32>
    %cst_52 = arith.constant 1.000000e+09 : f32
    %382 = vector.shape_cast %26 : vector<25x1xi1> to vector<1x25x1xi1>
    %383 = vector.broadcast %382 : vector<1x25x1xi1> to vector<2x25x8xi1>
    %384 = vector.broadcast %cst_52 : f32 to vector<2x25x8xf32>
    %385 = arith.select %383, %384, %381 : vector<2x25x8xi1>, vector<2x25x8xf32>
    %386 = arith.minimumf %371, %373 : vector<2x25x8xf32>
    %387 = arith.minimumf %379, %385 : vector<2x25x8xf32>
    %388 = arith.minimumf %386, %387 : vector<2x25x8xf32>
    %389 = vector.broadcast %18 : vector<1x25x8xf32> to vector<2x25x8xf32>
    %390 = arith.addf %388, %389 : vector<2x25x8xf32>
    %391 = arith.minimumf %367, %390 : vector<2x25x8xf32>
    %c15_i32 = arith.constant 15 : i32
    %392 = vector.broadcast %18 : vector<1x25x8xf32> to vector<2x25x8xf32>
    %393 = arith.addf %391, %392 : vector<2x25x8xf32>
    %394 = vector.extract_strided_slice %393 {offsets = [0, 0, 0], sizes = [2, 20, 8], strides = [1, 1, 1]} : vector<2x25x8xf32> to vector<2x20x8xf32>
    %395 = tpu.concatenate %19, %394 in 1 : vector<2x5x8xf32>, vector<2x20x8xf32> -> vector<2x25x8xf32>
    %396 = vector.extract_strided_slice %393 {offsets = [0, 5, 0], sizes = [2, 20, 8], strides = [1, 1, 1]} : vector<2x25x8xf32> to vector<2x20x8xf32>
    %397 = tpu.concatenate %396, %19 in 1 : vector<2x20x8xf32>, vector<2x5x8xf32> -> vector<2x25x8xf32>
    %398 = vector.extract_strided_slice %393 {offsets = [0, 0, 0], sizes = [2, 24, 8], strides = [1, 1, 1]} : vector<2x25x8xf32> to vector<2x24x8xf32>
    %399 = tpu.concatenate %20, %398 in 1 : vector<2x1x8xf32>, vector<2x24x8xf32> -> vector<2x25x8xf32>
    %cst_53 = arith.constant 1.000000e+09 : f32
    %400 = vector.shape_cast %23 : vector<25x1xi1> to vector<1x25x1xi1>
    %401 = vector.broadcast %400 : vector<1x25x1xi1> to vector<2x25x8xi1>
    %402 = vector.broadcast %cst_53 : f32 to vector<2x25x8xf32>
    %403 = arith.select %401, %402, %399 : vector<2x25x8xi1>, vector<2x25x8xf32>
    %404 = vector.extract_strided_slice %393 {offsets = [0, 1, 0], sizes = [2, 24, 8], strides = [1, 1, 1]} : vector<2x25x8xf32> to vector<2x24x8xf32>
    %405 = tpu.concatenate %404, %20 in 1 : vector<2x24x8xf32>, vector<2x1x8xf32> -> vector<2x25x8xf32>
    %cst_54 = arith.constant 1.000000e+09 : f32
    %406 = vector.shape_cast %26 : vector<25x1xi1> to vector<1x25x1xi1>
    %407 = vector.broadcast %406 : vector<1x25x1xi1> to vector<2x25x8xi1>
    %408 = vector.broadcast %cst_54 : f32 to vector<2x25x8xf32>
    %409 = arith.select %407, %408, %405 : vector<2x25x8xi1>, vector<2x25x8xf32>
    %410 = arith.minimumf %395, %397 : vector<2x25x8xf32>
    %411 = arith.minimumf %403, %409 : vector<2x25x8xf32>
    %412 = arith.minimumf %410, %411 : vector<2x25x8xf32>
    %413 = vector.broadcast %18 : vector<1x25x8xf32> to vector<2x25x8xf32>
    %414 = arith.addf %412, %413 : vector<2x25x8xf32>
    %415 = arith.minimumf %391, %414 : vector<2x25x8xf32>
    %c16_i32 = arith.constant 16 : i32
    %416 = vector.broadcast %18 : vector<1x25x8xf32> to vector<2x25x8xf32>
    %417 = arith.addf %415, %416 : vector<2x25x8xf32>
    %418 = vector.extract_strided_slice %417 {offsets = [0, 0, 0], sizes = [2, 20, 8], strides = [1, 1, 1]} : vector<2x25x8xf32> to vector<2x20x8xf32>
    %419 = tpu.concatenate %19, %418 in 1 : vector<2x5x8xf32>, vector<2x20x8xf32> -> vector<2x25x8xf32>
    %420 = vector.extract_strided_slice %417 {offsets = [0, 5, 0], sizes = [2, 20, 8], strides = [1, 1, 1]} : vector<2x25x8xf32> to vector<2x20x8xf32>
    %421 = tpu.concatenate %420, %19 in 1 : vector<2x20x8xf32>, vector<2x5x8xf32> -> vector<2x25x8xf32>
    %422 = vector.extract_strided_slice %417 {offsets = [0, 0, 0], sizes = [2, 24, 8], strides = [1, 1, 1]} : vector<2x25x8xf32> to vector<2x24x8xf32>
    %423 = tpu.concatenate %20, %422 in 1 : vector<2x1x8xf32>, vector<2x24x8xf32> -> vector<2x25x8xf32>
    %cst_55 = arith.constant 1.000000e+09 : f32
    %424 = vector.shape_cast %23 : vector<25x1xi1> to vector<1x25x1xi1>
    %425 = vector.broadcast %424 : vector<1x25x1xi1> to vector<2x25x8xi1>
    %426 = vector.broadcast %cst_55 : f32 to vector<2x25x8xf32>
    %427 = arith.select %425, %426, %423 : vector<2x25x8xi1>, vector<2x25x8xf32>
    %428 = vector.extract_strided_slice %417 {offsets = [0, 1, 0], sizes = [2, 24, 8], strides = [1, 1, 1]} : vector<2x25x8xf32> to vector<2x24x8xf32>
    %429 = tpu.concatenate %428, %20 in 1 : vector<2x24x8xf32>, vector<2x1x8xf32> -> vector<2x25x8xf32>
    %cst_56 = arith.constant 1.000000e+09 : f32
    %430 = vector.shape_cast %26 : vector<25x1xi1> to vector<1x25x1xi1>
    %431 = vector.broadcast %430 : vector<1x25x1xi1> to vector<2x25x8xi1>
    %432 = vector.broadcast %cst_56 : f32 to vector<2x25x8xf32>
    %433 = arith.select %431, %432, %429 : vector<2x25x8xi1>, vector<2x25x8xf32>
    %434 = arith.minimumf %419, %421 : vector<2x25x8xf32>
    %435 = arith.minimumf %427, %433 : vector<2x25x8xf32>
    %436 = arith.minimumf %434, %435 : vector<2x25x8xf32>
    %437 = vector.broadcast %18 : vector<1x25x8xf32> to vector<2x25x8xf32>
    %438 = arith.addf %436, %437 : vector<2x25x8xf32>
    %439 = arith.minimumf %415, %438 : vector<2x25x8xf32>
    %c17_i32 = arith.constant 17 : i32
    %440 = vector.broadcast %18 : vector<1x25x8xf32> to vector<2x25x8xf32>
    %441 = arith.addf %439, %440 : vector<2x25x8xf32>
    %442 = vector.extract_strided_slice %441 {offsets = [0, 0, 0], sizes = [2, 20, 8], strides = [1, 1, 1]} : vector<2x25x8xf32> to vector<2x20x8xf32>
    %443 = tpu.concatenate %19, %442 in 1 : vector<2x5x8xf32>, vector<2x20x8xf32> -> vector<2x25x8xf32>
    %444 = vector.extract_strided_slice %441 {offsets = [0, 5, 0], sizes = [2, 20, 8], strides = [1, 1, 1]} : vector<2x25x8xf32> to vector<2x20x8xf32>
    %445 = tpu.concatenate %444, %19 in 1 : vector<2x20x8xf32>, vector<2x5x8xf32> -> vector<2x25x8xf32>
    %446 = vector.extract_strided_slice %441 {offsets = [0, 0, 0], sizes = [2, 24, 8], strides = [1, 1, 1]} : vector<2x25x8xf32> to vector<2x24x8xf32>
    %447 = tpu.concatenate %20, %446 in 1 : vector<2x1x8xf32>, vector<2x24x8xf32> -> vector<2x25x8xf32>
    %cst_57 = arith.constant 1.000000e+09 : f32
    %448 = vector.shape_cast %23 : vector<25x1xi1> to vector<1x25x1xi1>
    %449 = vector.broadcast %448 : vector<1x25x1xi1> to vector<2x25x8xi1>
    %450 = vector.broadcast %cst_57 : f32 to vector<2x25x8xf32>
    %451 = arith.select %449, %450, %447 : vector<2x25x8xi1>, vector<2x25x8xf32>
    %452 = vector.extract_strided_slice %441 {offsets = [0, 1, 0], sizes = [2, 24, 8], strides = [1, 1, 1]} : vector<2x25x8xf32> to vector<2x24x8xf32>
    %453 = tpu.concatenate %452, %20 in 1 : vector<2x24x8xf32>, vector<2x1x8xf32> -> vector<2x25x8xf32>
    %cst_58 = arith.constant 1.000000e+09 : f32
    %454 = vector.shape_cast %26 : vector<25x1xi1> to vector<1x25x1xi1>
    %455 = vector.broadcast %454 : vector<1x25x1xi1> to vector<2x25x8xi1>
    %456 = vector.broadcast %cst_58 : f32 to vector<2x25x8xf32>
    %457 = arith.select %455, %456, %453 : vector<2x25x8xi1>, vector<2x25x8xf32>
    %458 = arith.minimumf %443, %445 : vector<2x25x8xf32>
    %459 = arith.minimumf %451, %457 : vector<2x25x8xf32>
    %460 = arith.minimumf %458, %459 : vector<2x25x8xf32>
    %461 = vector.broadcast %18 : vector<1x25x8xf32> to vector<2x25x8xf32>
    %462 = arith.addf %460, %461 : vector<2x25x8xf32>
    %463 = arith.minimumf %439, %462 : vector<2x25x8xf32>
    %c18_i32 = arith.constant 18 : i32
    %464 = vector.broadcast %18 : vector<1x25x8xf32> to vector<2x25x8xf32>
    %465 = arith.addf %463, %464 : vector<2x25x8xf32>
    %466 = vector.extract_strided_slice %465 {offsets = [0, 0, 0], sizes = [2, 20, 8], strides = [1, 1, 1]} : vector<2x25x8xf32> to vector<2x20x8xf32>
    %467 = tpu.concatenate %19, %466 in 1 : vector<2x5x8xf32>, vector<2x20x8xf32> -> vector<2x25x8xf32>
    %468 = vector.extract_strided_slice %465 {offsets = [0, 5, 0], sizes = [2, 20, 8], strides = [1, 1, 1]} : vector<2x25x8xf32> to vector<2x20x8xf32>
    %469 = tpu.concatenate %468, %19 in 1 : vector<2x20x8xf32>, vector<2x5x8xf32> -> vector<2x25x8xf32>
    %470 = vector.extract_strided_slice %465 {offsets = [0, 0, 0], sizes = [2, 24, 8], strides = [1, 1, 1]} : vector<2x25x8xf32> to vector<2x24x8xf32>
    %471 = tpu.concatenate %20, %470 in 1 : vector<2x1x8xf32>, vector<2x24x8xf32> -> vector<2x25x8xf32>
    %cst_59 = arith.constant 1.000000e+09 : f32
    %472 = vector.shape_cast %23 : vector<25x1xi1> to vector<1x25x1xi1>
    %473 = vector.broadcast %472 : vector<1x25x1xi1> to vector<2x25x8xi1>
    %474 = vector.broadcast %cst_59 : f32 to vector<2x25x8xf32>
    %475 = arith.select %473, %474, %471 : vector<2x25x8xi1>, vector<2x25x8xf32>
    %476 = vector.extract_strided_slice %465 {offsets = [0, 1, 0], sizes = [2, 24, 8], strides = [1, 1, 1]} : vector<2x25x8xf32> to vector<2x24x8xf32>
    %477 = tpu.concatenate %476, %20 in 1 : vector<2x24x8xf32>, vector<2x1x8xf32> -> vector<2x25x8xf32>
    %cst_60 = arith.constant 1.000000e+09 : f32
    %478 = vector.shape_cast %26 : vector<25x1xi1> to vector<1x25x1xi1>
    %479 = vector.broadcast %478 : vector<1x25x1xi1> to vector<2x25x8xi1>
    %480 = vector.broadcast %cst_60 : f32 to vector<2x25x8xf32>
    %481 = arith.select %479, %480, %477 : vector<2x25x8xi1>, vector<2x25x8xf32>
    %482 = arith.minimumf %467, %469 : vector<2x25x8xf32>
    %483 = arith.minimumf %475, %481 : vector<2x25x8xf32>
    %484 = arith.minimumf %482, %483 : vector<2x25x8xf32>
    %485 = vector.broadcast %18 : vector<1x25x8xf32> to vector<2x25x8xf32>
    %486 = arith.addf %484, %485 : vector<2x25x8xf32>
    %487 = arith.minimumf %463, %486 : vector<2x25x8xf32>
    %c19_i32 = arith.constant 19 : i32
    %488 = vector.broadcast %18 : vector<1x25x8xf32> to vector<2x25x8xf32>
    %489 = arith.addf %487, %488 : vector<2x25x8xf32>
    %490 = vector.extract_strided_slice %489 {offsets = [0, 0, 0], sizes = [2, 20, 8], strides = [1, 1, 1]} : vector<2x25x8xf32> to vector<2x20x8xf32>
    %491 = tpu.concatenate %19, %490 in 1 : vector<2x5x8xf32>, vector<2x20x8xf32> -> vector<2x25x8xf32>
    %492 = vector.extract_strided_slice %489 {offsets = [0, 5, 0], sizes = [2, 20, 8], strides = [1, 1, 1]} : vector<2x25x8xf32> to vector<2x20x8xf32>
    %493 = tpu.concatenate %492, %19 in 1 : vector<2x20x8xf32>, vector<2x5x8xf32> -> vector<2x25x8xf32>
    %494 = vector.extract_strided_slice %489 {offsets = [0, 0, 0], sizes = [2, 24, 8], strides = [1, 1, 1]} : vector<2x25x8xf32> to vector<2x24x8xf32>
    %495 = tpu.concatenate %20, %494 in 1 : vector<2x1x8xf32>, vector<2x24x8xf32> -> vector<2x25x8xf32>
    %cst_61 = arith.constant 1.000000e+09 : f32
    %496 = vector.shape_cast %23 : vector<25x1xi1> to vector<1x25x1xi1>
    %497 = vector.broadcast %496 : vector<1x25x1xi1> to vector<2x25x8xi1>
    %498 = vector.broadcast %cst_61 : f32 to vector<2x25x8xf32>
    %499 = arith.select %497, %498, %495 : vector<2x25x8xi1>, vector<2x25x8xf32>
    %500 = vector.extract_strided_slice %489 {offsets = [0, 1, 0], sizes = [2, 24, 8], strides = [1, 1, 1]} : vector<2x25x8xf32> to vector<2x24x8xf32>
    %501 = tpu.concatenate %500, %20 in 1 : vector<2x24x8xf32>, vector<2x1x8xf32> -> vector<2x25x8xf32>
    %cst_62 = arith.constant 1.000000e+09 : f32
    %502 = vector.shape_cast %26 : vector<25x1xi1> to vector<1x25x1xi1>
    %503 = vector.broadcast %502 : vector<1x25x1xi1> to vector<2x25x8xi1>
    %504 = vector.broadcast %cst_62 : f32 to vector<2x25x8xf32>
    %505 = arith.select %503, %504, %501 : vector<2x25x8xi1>, vector<2x25x8xf32>
    %506 = arith.minimumf %491, %493 : vector<2x25x8xf32>
    %507 = arith.minimumf %499, %505 : vector<2x25x8xf32>
    %508 = arith.minimumf %506, %507 : vector<2x25x8xf32>
    %509 = vector.broadcast %18 : vector<1x25x8xf32> to vector<2x25x8xf32>
    %510 = arith.addf %508, %509 : vector<2x25x8xf32>
    %511 = arith.minimumf %487, %510 : vector<2x25x8xf32>
    %c20_i32 = arith.constant 20 : i32
    %512 = vector.broadcast %18 : vector<1x25x8xf32> to vector<2x25x8xf32>
    %513 = arith.addf %511, %512 : vector<2x25x8xf32>
    %514 = vector.extract_strided_slice %513 {offsets = [0, 0, 0], sizes = [2, 20, 8], strides = [1, 1, 1]} : vector<2x25x8xf32> to vector<2x20x8xf32>
    %515 = tpu.concatenate %19, %514 in 1 : vector<2x5x8xf32>, vector<2x20x8xf32> -> vector<2x25x8xf32>
    %516 = vector.extract_strided_slice %513 {offsets = [0, 5, 0], sizes = [2, 20, 8], strides = [1, 1, 1]} : vector<2x25x8xf32> to vector<2x20x8xf32>
    %517 = tpu.concatenate %516, %19 in 1 : vector<2x20x8xf32>, vector<2x5x8xf32> -> vector<2x25x8xf32>
    %518 = vector.extract_strided_slice %513 {offsets = [0, 0, 0], sizes = [2, 24, 8], strides = [1, 1, 1]} : vector<2x25x8xf32> to vector<2x24x8xf32>
    %519 = tpu.concatenate %20, %518 in 1 : vector<2x1x8xf32>, vector<2x24x8xf32> -> vector<2x25x8xf32>
    %cst_63 = arith.constant 1.000000e+09 : f32
    %520 = vector.shape_cast %23 : vector<25x1xi1> to vector<1x25x1xi1>
    %521 = vector.broadcast %520 : vector<1x25x1xi1> to vector<2x25x8xi1>
    %522 = vector.broadcast %cst_63 : f32 to vector<2x25x8xf32>
    %523 = arith.select %521, %522, %519 : vector<2x25x8xi1>, vector<2x25x8xf32>
    %524 = vector.extract_strided_slice %513 {offsets = [0, 1, 0], sizes = [2, 24, 8], strides = [1, 1, 1]} : vector<2x25x8xf32> to vector<2x24x8xf32>
    %525 = tpu.concatenate %524, %20 in 1 : vector<2x24x8xf32>, vector<2x1x8xf32> -> vector<2x25x8xf32>
    %cst_64 = arith.constant 1.000000e+09 : f32
    %526 = vector.shape_cast %26 : vector<25x1xi1> to vector<1x25x1xi1>
    %527 = vector.broadcast %526 : vector<1x25x1xi1> to vector<2x25x8xi1>
    %528 = vector.broadcast %cst_64 : f32 to vector<2x25x8xf32>
    %529 = arith.select %527, %528, %525 : vector<2x25x8xi1>, vector<2x25x8xf32>
    %530 = arith.minimumf %515, %517 : vector<2x25x8xf32>
    %531 = arith.minimumf %523, %529 : vector<2x25x8xf32>
    %532 = arith.minimumf %530, %531 : vector<2x25x8xf32>
    %533 = vector.broadcast %18 : vector<1x25x8xf32> to vector<2x25x8xf32>
    %534 = arith.addf %532, %533 : vector<2x25x8xf32>
    %535 = arith.minimumf %511, %534 : vector<2x25x8xf32>
    %c21_i32 = arith.constant 21 : i32
    %536 = vector.broadcast %18 : vector<1x25x8xf32> to vector<2x25x8xf32>
    %537 = arith.addf %535, %536 : vector<2x25x8xf32>
    %538 = vector.extract_strided_slice %537 {offsets = [0, 0, 0], sizes = [2, 20, 8], strides = [1, 1, 1]} : vector<2x25x8xf32> to vector<2x20x8xf32>
    %539 = tpu.concatenate %19, %538 in 1 : vector<2x5x8xf32>, vector<2x20x8xf32> -> vector<2x25x8xf32>
    %540 = vector.extract_strided_slice %537 {offsets = [0, 5, 0], sizes = [2, 20, 8], strides = [1, 1, 1]} : vector<2x25x8xf32> to vector<2x20x8xf32>
    %541 = tpu.concatenate %540, %19 in 1 : vector<2x20x8xf32>, vector<2x5x8xf32> -> vector<2x25x8xf32>
    %542 = vector.extract_strided_slice %537 {offsets = [0, 0, 0], sizes = [2, 24, 8], strides = [1, 1, 1]} : vector<2x25x8xf32> to vector<2x24x8xf32>
    %543 = tpu.concatenate %20, %542 in 1 : vector<2x1x8xf32>, vector<2x24x8xf32> -> vector<2x25x8xf32>
    %cst_65 = arith.constant 1.000000e+09 : f32
    %544 = vector.shape_cast %23 : vector<25x1xi1> to vector<1x25x1xi1>
    %545 = vector.broadcast %544 : vector<1x25x1xi1> to vector<2x25x8xi1>
    %546 = vector.broadcast %cst_65 : f32 to vector<2x25x8xf32>
    %547 = arith.select %545, %546, %543 : vector<2x25x8xi1>, vector<2x25x8xf32>
    %548 = vector.extract_strided_slice %537 {offsets = [0, 1, 0], sizes = [2, 24, 8], strides = [1, 1, 1]} : vector<2x25x8xf32> to vector<2x24x8xf32>
    %549 = tpu.concatenate %548, %20 in 1 : vector<2x24x8xf32>, vector<2x1x8xf32> -> vector<2x25x8xf32>
    %cst_66 = arith.constant 1.000000e+09 : f32
    %550 = vector.shape_cast %26 : vector<25x1xi1> to vector<1x25x1xi1>
    %551 = vector.broadcast %550 : vector<1x25x1xi1> to vector<2x25x8xi1>
    %552 = vector.broadcast %cst_66 : f32 to vector<2x25x8xf32>
    %553 = arith.select %551, %552, %549 : vector<2x25x8xi1>, vector<2x25x8xf32>
    %554 = arith.minimumf %539, %541 : vector<2x25x8xf32>
    %555 = arith.minimumf %547, %553 : vector<2x25x8xf32>
    %556 = arith.minimumf %554, %555 : vector<2x25x8xf32>
    %557 = vector.broadcast %18 : vector<1x25x8xf32> to vector<2x25x8xf32>
    %558 = arith.addf %556, %557 : vector<2x25x8xf32>
    %559 = arith.minimumf %535, %558 : vector<2x25x8xf32>
    %c22_i32 = arith.constant 22 : i32
    %560 = vector.broadcast %18 : vector<1x25x8xf32> to vector<2x25x8xf32>
    %561 = arith.addf %559, %560 : vector<2x25x8xf32>
    %562 = vector.extract_strided_slice %561 {offsets = [0, 0, 0], sizes = [2, 20, 8], strides = [1, 1, 1]} : vector<2x25x8xf32> to vector<2x20x8xf32>
    %563 = tpu.concatenate %19, %562 in 1 : vector<2x5x8xf32>, vector<2x20x8xf32> -> vector<2x25x8xf32>
    %564 = vector.extract_strided_slice %561 {offsets = [0, 5, 0], sizes = [2, 20, 8], strides = [1, 1, 1]} : vector<2x25x8xf32> to vector<2x20x8xf32>
    %565 = tpu.concatenate %564, %19 in 1 : vector<2x20x8xf32>, vector<2x5x8xf32> -> vector<2x25x8xf32>
    %566 = vector.extract_strided_slice %561 {offsets = [0, 0, 0], sizes = [2, 24, 8], strides = [1, 1, 1]} : vector<2x25x8xf32> to vector<2x24x8xf32>
    %567 = tpu.concatenate %20, %566 in 1 : vector<2x1x8xf32>, vector<2x24x8xf32> -> vector<2x25x8xf32>
    %cst_67 = arith.constant 1.000000e+09 : f32
    %568 = vector.shape_cast %23 : vector<25x1xi1> to vector<1x25x1xi1>
    %569 = vector.broadcast %568 : vector<1x25x1xi1> to vector<2x25x8xi1>
    %570 = vector.broadcast %cst_67 : f32 to vector<2x25x8xf32>
    %571 = arith.select %569, %570, %567 : vector<2x25x8xi1>, vector<2x25x8xf32>
    %572 = vector.extract_strided_slice %561 {offsets = [0, 1, 0], sizes = [2, 24, 8], strides = [1, 1, 1]} : vector<2x25x8xf32> to vector<2x24x8xf32>
    %573 = tpu.concatenate %572, %20 in 1 : vector<2x24x8xf32>, vector<2x1x8xf32> -> vector<2x25x8xf32>
    %cst_68 = arith.constant 1.000000e+09 : f32
    %574 = vector.shape_cast %26 : vector<25x1xi1> to vector<1x25x1xi1>
    %575 = vector.broadcast %574 : vector<1x25x1xi1> to vector<2x25x8xi1>
    %576 = vector.broadcast %cst_68 : f32 to vector<2x25x8xf32>
    %577 = arith.select %575, %576, %573 : vector<2x25x8xi1>, vector<2x25x8xf32>
    %578 = arith.minimumf %563, %565 : vector<2x25x8xf32>
    %579 = arith.minimumf %571, %577 : vector<2x25x8xf32>
    %580 = arith.minimumf %578, %579 : vector<2x25x8xf32>
    %581 = vector.broadcast %18 : vector<1x25x8xf32> to vector<2x25x8xf32>
    %582 = arith.addf %580, %581 : vector<2x25x8xf32>
    %583 = arith.minimumf %559, %582 : vector<2x25x8xf32>
    %c23_i32 = arith.constant 23 : i32
    %584 = vector.broadcast %18 : vector<1x25x8xf32> to vector<2x25x8xf32>
    %585 = arith.addf %583, %584 : vector<2x25x8xf32>
    %586 = vector.extract_strided_slice %585 {offsets = [0, 0, 0], sizes = [2, 20, 8], strides = [1, 1, 1]} : vector<2x25x8xf32> to vector<2x20x8xf32>
    %587 = tpu.concatenate %19, %586 in 1 : vector<2x5x8xf32>, vector<2x20x8xf32> -> vector<2x25x8xf32>
    %588 = vector.extract_strided_slice %585 {offsets = [0, 5, 0], sizes = [2, 20, 8], strides = [1, 1, 1]} : vector<2x25x8xf32> to vector<2x20x8xf32>
    %589 = tpu.concatenate %588, %19 in 1 : vector<2x20x8xf32>, vector<2x5x8xf32> -> vector<2x25x8xf32>
    %590 = vector.extract_strided_slice %585 {offsets = [0, 0, 0], sizes = [2, 24, 8], strides = [1, 1, 1]} : vector<2x25x8xf32> to vector<2x24x8xf32>
    %591 = tpu.concatenate %20, %590 in 1 : vector<2x1x8xf32>, vector<2x24x8xf32> -> vector<2x25x8xf32>
    %cst_69 = arith.constant 1.000000e+09 : f32
    %592 = vector.shape_cast %23 : vector<25x1xi1> to vector<1x25x1xi1>
    %593 = vector.broadcast %592 : vector<1x25x1xi1> to vector<2x25x8xi1>
    %594 = vector.broadcast %cst_69 : f32 to vector<2x25x8xf32>
    %595 = arith.select %593, %594, %591 : vector<2x25x8xi1>, vector<2x25x8xf32>
    %596 = vector.extract_strided_slice %585 {offsets = [0, 1, 0], sizes = [2, 24, 8], strides = [1, 1, 1]} : vector<2x25x8xf32> to vector<2x24x8xf32>
    %597 = tpu.concatenate %596, %20 in 1 : vector<2x24x8xf32>, vector<2x1x8xf32> -> vector<2x25x8xf32>
    %cst_70 = arith.constant 1.000000e+09 : f32
    %598 = vector.shape_cast %26 : vector<25x1xi1> to vector<1x25x1xi1>
    %599 = vector.broadcast %598 : vector<1x25x1xi1> to vector<2x25x8xi1>
    %600 = vector.broadcast %cst_70 : f32 to vector<2x25x8xf32>
    %601 = arith.select %599, %600, %597 : vector<2x25x8xi1>, vector<2x25x8xf32>
    %602 = arith.minimumf %587, %589 : vector<2x25x8xf32>
    %603 = arith.minimumf %595, %601 : vector<2x25x8xf32>
    %604 = arith.minimumf %602, %603 : vector<2x25x8xf32>
    %605 = vector.broadcast %18 : vector<1x25x8xf32> to vector<2x25x8xf32>
    %606 = arith.addf %604, %605 : vector<2x25x8xf32>
    %607 = arith.minimumf %583, %606 : vector<2x25x8xf32>
    %608 = vector.extract_strided_slice %607 {offsets = [0, 0, 0], sizes = [1, 25, 8], strides = [1, 1, 1]} : vector<2x25x8xf32> to vector<1x25x8xf32>
    %609 = vector.shape_cast %608 : vector<1x25x8xf32> to vector<25x8xf32>
    %610 = vector.extract_strided_slice %607 {offsets = [1, 0, 0], sizes = [1, 25, 8], strides = [1, 1, 1]} : vector<2x25x8xf32> to vector<1x25x8xf32>
    %611 = vector.shape_cast %610 : vector<1x25x8xf32> to vector<25x8xf32>
    %612 = vector.extract_strided_slice %609 {offsets = [24, 0], sizes = [1, 8], strides = [1, 1]} : vector<25x8xf32> to vector<1x8xf32>
    %613 = math.absf %612 : vector<1x8xf32>
    %cst_71 = arith.constant 1.000000e+00 : f32
    %614 = vector.broadcast %cst_71 : f32 to vector<1x8xf32>
    %615 = arith.addf %613, %614 : vector<1x8xf32>
    %cst_72 = arith.constant 9.99999974E-5 : f32
    %616 = vector.broadcast %cst_72 : f32 to vector<1x8xf32>
    %617 = arith.mulf %616, %615 : vector<1x8xf32>
    %618 = arith.addf %609, %611 : vector<25x8xf32>
    %619 = arith.addf %612, %617 : vector<1x8xf32>
    %620 = vector.broadcast %619 : vector<1x8xf32> to vector<25x8xf32>
    %621 = arith.cmpf ole, %618, %620 : vector<25x8xf32>
    %622 = arith.extui %621 : vector<25x8xi1> to vector<25x8xi32>
    %623 = arith.sitofp %622 : vector<25x8xi32> to vector<25x8xf32>
    %c0_73 = arith.constant 0 : index
    %c0_74 = arith.constant 0 : index
    %624 = vector.load %arg8[%c0_73, %c0_74] : memref<25x8xf32, #tpu.memory_space<vmem>>, vector<25x8xf32>
    tpu.vector_store %arg8[%c0_73, %c0_74], %623 {strides = array<i32>} : memref<25x8xf32, #tpu.memory_space<vmem>>, vector<25x8xf32>,
    return
  }
  func.func @transform_0(%arg0: i32) -> (i32, i32) {
    %c0_i32 = arith.constant 0 : i32
    %c0_i32_0 = arith.constant 0 : i32
    return %c0_i32, %arg0 : i32, i32
  }
  func.func @transform_1(%arg0: i32) -> (i32, i32) {
    %c0_i32 = arith.constant 0 : i32
    %c0_i32_0 = arith.constant 0 : i32
    %c0_i32_1 = arith.constant 0 : i32
    return %c0_i32, %c0_i32_0 : i32, i32
  }
  func.func @transform_2(%arg0: i32) -> (i32, i32) {
    %c0_i32 = arith.constant 0 : i32
    %c0_i32_0 = arith.constant 0 : i32
    %c0_i32_1 = arith.constant 0 : i32
    return %c0_i32, %c0_i32_0 : i32, i32
  }
  func.func @transform_3(%arg0: i32) -> (i32, i32) {
    %c0_i32 = arith.constant 0 : i32
    %c0_i32_0 = arith.constant 0 : i32
    %c0_i32_1 = arith.constant 0 : i32
    return %c0_i32, %c0_i32_0 : i32, i32
  }
  func.func @transform_4(%arg0: i32) -> (i32, i32) {
    %c0_i32 = arith.constant 0 : i32
    %c0_i32_0 = arith.constant 0 : i32
    %c0_i32_1 = arith.constant 0 : i32
    return %c0_i32, %c0_i32_0 : i32, i32
  }
  func.func @transform_5(%arg0: i32) -> (i32, i32) {
    %c0_i32 = arith.constant 0 : i32
    %c0_i32_0 = arith.constant 0 : i32
    %c0_i32_1 = arith.constant 0 : i32
    return %c0_i32, %c0_i32_0 : i32, i32
  }
  func.func @transform_6(%arg0: i32) -> (i32, i32) {
    %c0_i32 = arith.constant 0 : i32
    %c0_i32_0 = arith.constant 0 : i32
    %c0_i32_1 = arith.constant 0 : i32
    return %c0_i32, %c0_i32_0 : i32, i32
  }
  func.func @transform_7(%arg0: i32) -> (i32, i32) {
    %c0_i32 = arith.constant 0 : i32
    %c0_i32_0 = arith.constant 0 : i32
    return %c0_i32, %arg0 : i32, i32
  }
}

</mosaic_0001>

<bundles_post_ra>
// kernel: tpu_custom_call.1
= control target key start
LH: loop header
LB: loop body
LE: loop exit
PB: predicated region body
PF: predicated region fallthrough
CT: control target
= control target key end

     0   :  { %vm41_vm0 = vcmask 64512   ;;  %v4011_v3 = vmov 0   ;;  %vm157_vm5 = vcmask 130048   ;;  %vm273_vm11 = vcmask 1040384   ;;  %s8482_s0 = inlined_call_operand.vmem [shape: f32[8,8], index: 0, kind: input, shape index: {}]   ;;  %s8483_s1 = inlined_call_operand.vmem [shape: f32[16,8], index: 1, kind: input, shape index: {}]   ;;  %s8484_s2 = inlined_call_operand.vmem [shape: f32[16,1], index: 2, kind: input, shape index: {}]   ;;  %s8485_s5 = inlined_call_operand.vmem [shape: f32[25,1], index: 5, kind: input, shape index: {}]   ;;  %s8486_s4 = inlined_call_operand.vmem [shape: f32[25,1], index: 4, kind: input, shape index: {}]   ;;  %s8487_s6 = inlined_call_operand.vmem [shape: f32[25,1], index: 6, kind: input, shape index: {}]   ;;  %s8488_s3 = inlined_call_operand.vmem [shape: f32[25,16], index: 3, kind: input, shape index: {}]   ;;  %s8489_s7 = inlined_call_operand.vmem [shape: f32[25,8], index: 7, kind: output, shape index: {}]  }
   0x1   :  { %v26_v0 = vld [vmem:[%s8482_s0] sm:$0xff]  ;;  %v28_v2 = vld [vmem:[%s8483_s1 + $0x8] sm:$0xff]  ;;  %4009 = vset.pattern.permute.xlu0 %v4011_v3  ;;  %4010 = vset.pattern.permute.xlu1 %v4011_v3  ;;  %v135_v7 = vld [vmem:[%s8486_s4 + $0x10] sm:$0xff]  ;;  %v4012_v58 = vmov 1e+09   ;;  %vm285_vm12 = vcmask 1044480  }
   0x2   :  { %v27_v1 = vld [vmem:[%s8483_s1] sm:$0xff]  ;;  %3985 = vmatprep.subr.mxu0 %v26_v0  ;;  %v30_v5 = vld [vmem:[%s8484_s2 + $0x8] sm:$0xff]  ;;  %v261_v8 = vld [vmem:[%s8485_s5 + $0x10] sm:$0xff]  ;;  %v4135_v59 = vsel %vm273_vm11, 0.0, %v4012_v58  ;;  %vm303_vm13 = vcmask 1042432   ;;  %vm320_vm14 = vcmask 1043456  }
   0x3   :  { %3987 = vmatprep.mubr.msk.f32.mxu0 %vm41_vm0, %v27_v1  ;;  %v29_v4 = vld [vmem:[%s8484_s2] sm:$0xff]  ;;  %3986 = vmatpush3.msra.mxu0 %v26_v0  ;;  %vm265_vm2 = vcmp.gt.f32.partialorder %v261_v8, 0.5  ;;  %v269_v12 = vld [vmem:[%s8487_s6 + $0x10] sm:$0xff]  ;;  %v134_v18 = vld [vmem:[%s8486_s4 + $0x8] sm:$0xff] }
   0x4   :  { %33 = vperm.xlu0 %4009, %v29_v4   ;;  %3988 = vmatmul.mubr.msk.f32.vlgmr.msra.gmra.mrb[0].mxu0 %vm41_vm0, %v28_v2  ;;  %v259_v6 = vld [vmem:[%s8485_s5] sm:$0xff]  ;;  %v340_v11 = vsel %vm265_vm2, 1, %v4011_v3  ;;  %vm272_vm4 = vcmp.gt.f32.partialorder %v269_v12, 0.5  ;;  %v131_v16 = vld [vmem:[%s8488_s3 + $0x10] sm:$0xff]  ;;  %v260_v19 = vld [vmem:[%s8485_s5 + $0x8] sm:$0xff]  ;;  %vm364_vm2 = vcmask 1046528  }
   0x5   :  { %vm263_vm1 = vcmp.gt.f32.partialorder %v259_v6, 0.5  ;;  %v267_v10 = vld [vmem:[%s8487_s6] sm:$0xff]  ;;  %v383_v14 = vsel %vm272_vm4, 1, %v4011_v3  ;;  %3997 = vmatprep.mubr.msk.f32.mxu1 %vm157_vm5, %v131_v16  ;;  %v136_v20 = vld [vmem:[%s8486_s4 + $0x18] sm:$0x1]  ;;  %vm264_vm6 = vcmp.gt.f32.partialorder %v260_v19, 0.5 }
   0x6   :  { %v338_v9 = vsel %vm263_vm1, 1, %v4011_v3  ;;  %vm270_vm3 = vcmp.gt.f32.partialorder %v267_v10, 0.5  ;;  %v129_v15 = vld [vmem:[%s8488_s3] sm:$0xff]  ;;  %v262_v21 = vld [vmem:[%s8485_s5 + $0x18] sm:$0x1]  ;;  %v339_v22 = vsel %vm264_vm6, 1, %v4011_v3 }
   0x7   :  { %v381_v13 = vsel %vm270_vm3, 1, %v4011_v3  ;;  %3994 = vmatprep.mubr.msk.f32.mxu0 %vm157_vm5, %v129_v15  ;;  %v133_v17 = vld [vmem:[%s8486_s4] sm:$0xff]  ;;  %vm266_vm7 = vcmp.gt.f32.partialorder %v262_v21, 0.5  ;;  %v268_v23 = vld [vmem:[%s8487_s6 + $0x8] sm:$0xff]  ;;  %v132_v38 = vld [vmem:[%s8488_s3 + $0x18] sm:$0x1] }
   0x8   :  { %38 = vperm.xlu0 %4009, %v30_v5   ;;  %139 = vperm.xlu1 %4010, %v133_v17   ;;  %v341_v24 = vsel %vm266_vm7, 1, %v4011_v3  ;;  %vm271_vm8 = vcmp.gt.f32.partialorder %v268_v23, 0.5  ;;  %v130_v37 = vld [vmem:[%s8488_s3 + $0x8] sm:$0xff] }
   0x9   :  { %v382_v25 = vsel %vm271_vm8, 1, %v4011_v3  ;;  %vm3960_vm8 = vcmask 57344  }
   0xc   :  { %149 = vperm.xlu0 %4009, %v135_v7   ;;  %144 = vperm.xlu1 %4010, %v134_v18  }
  0x10   :  { %343 = vperm.xlu0 %4009, %v338_v9   ;;  %154 = vperm.xlu1 %4010, %v136_v20  }
  0x14   :  { %349 = vperm.xlu0 %4009, %v340_v11   ;;  %346 = vperm.xlu1 %4010, %v339_v22  }
  0x18   :  { %385 = vperm.xlu0 %4009, %v381_v13   ;;  %352 = vperm.xlu1 %4010, %v341_v24  }
  0x1c   :  { %391 = vperm.xlu0 %4009, %v383_v14   ;;  %388 = vperm.xlu1 %4010, %v382_v25  }
  0x83   :  { %v34_v26 = vpop.permute.xlu0 %33 }
  0x87   :  { %v39_v27 = vpop.permute.xlu0 %38  ;;  %v140_v39 = vpop.permute.xlu1 %139 }
  0x8b   :  { %v150_v40 = vpop.permute.xlu0 %149  ;;  %v145_v41 = vpop.permute.xlu1 %144 }
  0x8f   :  { %v4120_v42 = vpop.permute.xlu0 %343  ;;  %v155_v43 = vpop.permute.xlu1 %154 }
  0x90   :  { %vm354_vm15 = vcmp.eq.s32.totalorder %v4120_v42, 1 }
  0x93   :  { %v4122_v44 = vpop.permute.xlu0 %349  ;;  %v4124_v45 = vpop.permute.xlu1 %346 }
  0x94   :  { %vm355_vm1 = vcmp.eq.s32.totalorder %v4124_v45, 1  ;;  %vm356_vm4 = vcmp.eq.s32.totalorder %v4122_v44, 1 }
  0x97   :  { %v4126_v46 = vpop.permute.xlu0 %385  ;;  %v4128_v47 = vpop.permute.xlu1 %352 }
  0x98   :  { %vm357_vm3 = vcmp.eq.s32.totalorder %v4128_v47, 1 }
  0x9b   :  { %v4148_v1 = vpop.permute.xlu0 %391  ;;  %v4151_v2 = vpop.permute.xlu1 %388 }
  0x9c   :  { %vm395_vm6 = vcmp.eq.s32.totalorder %v4148_v1, 1  ;;  %vm394_vm7 = vcmp.eq.s32.totalorder %v4151_v2, 1 }
  0xd7   :  { %v3989_v28 = vpop.f32.mrb[0].mxu0 }
  0xd8   :  { %v120_v29 = vadd.f32 %v3989_v28, %v39_v27  ;;  %v114_v30 = vpop.f32.mrb[1].mxu0 }
  0xd9   :  { %v115_v31 = vadd.f32 %v114_v30, %v34_v26 }
  0xda   :  { %vm124_vm9 = vcmp.gt.f32.partialorder %v120_v29, 0.0  ;;  %v126_v32 = vmul.f32 0.1, %v120_v29 }
  0xdb   :  { %vm123_vm10 = vcmp.gt.f32.partialorder %v115_v31, 0.0  ;;  %v125_v33 = vmul.f32 0.1, %v115_v31 }
  0xdc   :  { %v128_v34 = vsel %vm124_vm9, %v120_v29, %v126_v32 }
  0xdd   :  { %v127_v35 = vsel %vm123_vm10, %v115_v31, %v125_v33 }
  0xde   :  { %v4000_v36 = vpack.c.bf16 %v128_v34, %v127_v35 }
  0xe0   :  { %4001 = vmatprep.subr.bf16.mxu0 %v4000_v36  ;;  %4004 = vmatprep.subr.bf16.mxu1 %v4000_v36 }
  0xe1   :  { %4003 = vmatpush3.bf16.msra.mxu0 %v4000_v36  ;;  %4005 = vmatpush3.bf16.msra.mxu1 %v4000_v36 }
  0xe4   :  { %3995 = vmatmul.mubr.msk.f32.vlgmr.msra.gmra.mrb[2].mxu0 %vm157_vm5, %v130_v37  ;;  %3998 = vmatmul.mubr.msk.f32.vlgmr.msra.gmra.mrb[0].mxu1 %vm157_vm5, %v132_v38  ;;  %vm393_vm5 = vcmp.eq.s32.totalorder %v4126_v46, 1 }
 0x1b7   :  { %v3996_v48 = vpop.f32.mrb[2].mxu0  ;;  %v3999_v49 = vpop.f32.mrb[0].mxu1 }
 0x1b8   :  { %v242_v50 = vadd.f32 %v3996_v48, %v145_v41  ;;  %v252_v51 = vadd.f32 %v3999_v49, %v155_v43  ;;  %v236_v52 = vpop.f32.mrb[3].mxu0  ;;  %v246_v53 = vpop.f32.mrb[1].mxu1 }
 0x1b9   :  { %v237_v54 = vadd.f32 %v236_v52, %v140_v39  ;;  %v247_v55 = vadd.f32 %v246_v53, %v150_v40 }
 0x1ba   :  { %v4130_v56 = vmul.f32 0.5, %v242_v50  ;;  %v4132_v57 = vmul.f32 0.5, %v252_v51 }
 0x1bb   :  { %v4137_v60 = vmul.f32 0.5, %v237_v54  ;;  %v4139_v61 = vmul.f32 0.5, %v247_v55 }
 0x1bc   :  { %v276_v62 = vadd.f32 1e+09, %v4130_v56  ;;  %v4145_v63 = vadd.f32 1e+09, %v4132_v57  ;;  %v313_v0 = vrot.slane %v4132_v57, 5  ;;  %v374_v6 = vrot.slane %v4132_v57, 1 }
 0x1bd   :  { %v275_v3 = vadd.f32 %v4135_v59, %v4137_v60  ;;  %v277_v4 = vadd.f32 1e+09, %v4139_v61  ;;  %v279_v5 = vadd.f32 1e+09, %v4137_v60 }
 0x1be   :  { %v287_v7 = vrot.slane %v276_v62, 3  ;;  %v305_v8 = vrot.slane %v276_v62, 5  ;;  %v324_v9 = vrot.slane %v276_v62, 7  ;;  %v366_v10 = vrot.slane %v276_v62, 1 }
 0x1bf   :  { %v286_v11 = vrot.slane %v275_v3, 3  ;;  %v289_v12 = vrot.slane %v277_v4, 3  ;;  %v291_v13 = vrot.slane %v279_v5, 3  ;;  %v304_v14 = vrot.slane %v275_v3, 5 }
 0x1c0   :  { %v307_v15 = vrot.slane %v277_v4, 5  ;;  %v309_v16 = vrot.slane %v4145_v63, 5  ;;  %v311_v17 = vrot.slane %v279_v5, 5  ;;  %v323_v18 = vrot.slane %v275_v3, 7 }
 0x1c1   :  { %v288_v19 = vsel %vm285_vm12, %v286_v11, %v287_v7  ;;  %v290_v20 = vsel %vm285_vm12, %v287_v7, %v289_v12  ;;  %v292_v21 = vsel %vm285_vm12, %v291_v13, %v287_v7  ;;  %v299_v22 = vsel %vm285_vm12, 1e+09, %v286_v11 }
 0x1c2   :  { %v300_v23 = vsel %vm285_vm12, 1e+09, %v291_v13  ;;  %v306_v24 = vsel %vm303_vm13, %v304_v14, %v305_v8  ;;  %v308_v25 = vsel %vm303_vm13, %v305_v8, %v307_v15  ;;  %v310_v26 = vsel %vm303_vm13, %v307_v15, %v309_v16 }
 0x1c3   :  { %v312_v27 = vsel %vm303_vm13, %v311_v17, %v305_v8  ;;  %v314_v28 = vsel %vm303_vm13, %v307_v15, %v313_v0  ;;  %v321_v29 = vsel %vm320_vm14, %v310_v26, 1e+09  ;;  %v325_v30 = vsel %vm273_vm11, %v323_v18, %v324_v9 }
 0x1c4   :  { %v322_v31 = vsel %vm320_vm14, %v314_v28, 1e+09  ;;  %v326_v32 = vrot.slane %v277_v4, 7  ;;  %v328_v33 = vrot.slane %v279_v5, 7  ;;  %v336_v34 = vsel %vm273_vm11, 1e+09, %v323_v18 }
 0x1c5   :  { %v358_v35 = vsel %vm354_vm15, 1e+09, %v336_v34  ;;  %v359_v36 = vsel %vm355_vm1, 1e+09, %v325_v30  ;;  %v365_v37 = vrot.slane %v275_v3, 1  ;;  %v368_v38 = vrot.slane %v277_v4, 1 }
 0x1c6   :  { %v327_v39 = vsel %vm273_vm11, %v324_v9, %v326_v32  ;;  %v329_v40 = vsel %vm273_vm11, %v328_v33, %v324_v9  ;;  %v337_v41 = vsel %vm273_vm11, 1e+09, %v328_v33  ;;  %v361_v43 = vsel %vm357_vm3, 1e+09, %v326_v32 }
 0x1c7   :  { %v360_v48 = vsel %vm356_vm4, 1e+09, %v327_v39  ;;  %v362_v49 = vsel %vm354_vm15, 1e+09, %v337_v41  ;;  %v363_v50 = vsel %vm355_vm1, 1e+09, %v329_v40  ;;  %v367_v51 = vsel %vm364_vm2, %v365_v37, %v366_v10 }
 0x1c8   :  { %v369_v52 = vsel %vm364_vm2, %v366_v10, %v368_v38  ;;  %v370_v53 = vrot.slane %v4145_v63, 1  ;;  %v372_v54 = vrot.slane %v279_v5, 1  ;;  %v375_v55 = vsel %vm364_vm2, %v368_v38, %v374_v6 }
 0x1c9   :  { %v396_v58 = vsel %vm393_vm5, 1e+09, %v367_v51  ;;  %v397_v62 = vsel %vm394_vm7, 1e+09, %v369_v52  ;;  %v400_v0 = vsel %vm395_vm6, 1e+09, %v375_v55  ;;  %v401_v3 = vmin.f32 %v299_v22, %v306_v24 }
 0x1ca   :  { %v371_v4 = vsel %vm364_vm2, %v368_v38, %v370_v53  ;;  %v373_v7 = vsel %vm364_vm2, %v372_v54, %v366_v10  ;;  %v402_v8 = vmin.f32 %v288_v19, %v308_v25  ;;  %v403_v9 = vmin.f32 %v290_v20, %v321_v29 }
 0x1cb   :  { %v398_v63 = vsel %vm395_vm6, 1e+09, %v371_v4  ;;  %v399_v5 = vsel %vm393_vm5, 1e+09, %v373_v7  ;;  %v404_v6 = vmin.f32 %v289_v12, 1e+09  ;;  %v405_v11 = vmin.f32 %v300_v23, %v312_v27 }
 0x1cc   :  { %v406_v13 = vmin.f32 %v292_v21, %v308_v25  ;;  %v407_v14 = vmin.f32 %v290_v20, %v322_v31  ;;  %v408_v15 = vmin.f32 %v358_v35, %v396_v58  ;;  %v409_v16 = vmin.f32 %v359_v36, %v397_v62 }
 0x1cd   :  { %v410_v17 = vmin.f32 %v360_v48, %v398_v63  ;;  %v411_v18 = vmin.f32 %v361_v43, 1e+09  ;;  %v412_v22 = vmin.f32 %v362_v49, %v399_v5  ;;  %v413_v24 = vmin.f32 %v363_v50, %v397_v62 }
 0x1ce   :  { %v414_v26 = vmin.f32 %v360_v48, %v400_v0  ;;  %v415_v10 = vmin.f32 %v401_v3, %v408_v15  ;;  %v416_v19 = vmin.f32 %v402_v8, %v409_v16 }
 0x1cf   :  { %v417_v28 = vmin.f32 %v403_v9, %v410_v17  ;;  %v418_v29 = vmin.f32 %v404_v6, %v411_v18  ;;  %v419_v30 = vmin.f32 %v405_v11, %v412_v22  ;;  %v420_v32 = vmin.f32 %v406_v13, %v413_v24 }
 0x1d0   :  { %v421_v33 = vmin.f32 %v407_v14, %v414_v26  ;;  %v422_v34 = vadd.f32 %v415_v10, %v4137_v60  ;;  %v4210_v12 = vadd.f32 %v416_v19, %v4130_v56 }
 0x1d1   :  { %v4213_v20 = vadd.f32 %v417_v28, %v4139_v61  ;;  %v4216_v21 = vadd.f32 %v418_v29, %v4132_v57  ;;  %v4219_v23 = vadd.f32 %v419_v30, %v4137_v60  ;;  %v4222_v25 = vadd.f32 %v420_v32, %v4130_v56 }
 0x1d2   :  { %v4225_v27 = vadd.f32 %v421_v33, %v4139_v61  ;;  %v4228_v31 = vmin.f32 %v4135_v59, %v422_v34  ;;  %v430_v35 = vmin.f32 %v4210_v12, 1e+09 }
 0x1d3   :  { %v431_v36 = vmin.f32 %v4213_v20, 1e+09  ;;  %v432_v37 = vmin.f32 %v4216_v21, 1e+09  ;;  %v433_v38 = vmin.f32 %v4219_v23, 1e+09 }
 0x1d4   :  { %v8492_v39 = vmin.f32 %v4222_v25, 1e+09  ;;  %v8491_v40 = vmin.f32 %v4225_v27, 1e+09  ;;  %v8490_v41 = vmin.f32 %v4216_v21, 0.0  ;;  %v4239_v43 = vadd.f32 %v4228_v31, %v4137_v60 }
 0x1d5   :  { %v4244_v59 = vadd.f32 %v430_v35, %v4130_v56  ;;  %v4249_v48 = vadd.f32 %v431_v36, %v4139_v61  ;;  %v4254_v49 = vadd.f32 %v432_v37, %v4132_v57  ;;  %v4259_v50 = vadd.f32 %v433_v38, %v4137_v60 }
 0x1d6   :  { %v4264_v51 = vadd.f32 %v8492_v39, %v4130_v56  ;;  %v4269_v52 = vadd.f32 %v8491_v40, %v4139_v61  ;;  %v4274_v53 = vadd.f32 %v8490_v41, %v4132_v57  ;;  %v451_v54 = vrot.slane %v4239_v43, 3 }
 0x1d7   :  { %v452_v55 = vrot.slane %v4244_v59, 3  ;;  %v454_v58 = vrot.slane %v4249_v48, 3  ;;  %v456_v62 = vrot.slane %v4259_v50, 3  ;;  %v473_v0 = vrot.slane %v4239_v43, 5 }
 0x1d8   :  { %v457_v3 = vrot.slane %v4264_v51, 3  ;;  %v459_v4 = vrot.slane %v4269_v52, 3  ;;  %v4284_v7 = vsel %vm285_vm12, 1e+09, %v451_v54  ;;  %v474_v8 = vrot.slane %v4244_v59, 5 }
 0x1d9   :  { %v4288_v9 = vsel %vm285_vm12, %v451_v54, %v452_v55  ;;  %v4293_v63 = vsel %vm285_vm12, %v452_v55, %v454_v58  ;;  %v4296_v5 = vsel %vm285_vm12, 1e+09, %v456_v62  ;;  %v476_v6 = vrot.slane %v4249_v48, 5 }
 0x1da   :  { %v4300_v11 = vsel %vm285_vm12, %v456_v62, %v457_v3  ;;  %v4305_v13 = vsel %vm285_vm12, %v457_v3, %v459_v4  ;;  %v4308_v14 = vsel %vm303_vm13, %v473_v0, %v474_v8  ;;  %v478_v15 = vrot.slane %v4254_v49, 5 }
 0x1db   :  { %v4312_v16 = vsel %vm303_vm13, %v474_v8, %v476_v6  ;;  %v480_v17 = vrot.slane %v4259_v50, 5  ;;  %v481_v18 = vrot.slane %v4264_v51, 5  ;;  %v483_v22 = vrot.slane %v4269_v52, 5 }
 0x1dc   :  { %v479_v24 = vsel %vm303_vm13, %v476_v6, %v478_v15  ;;  %v485_v26 = vrot.slane %v4274_v53, 5  ;;  %v495_v10 = vrot.slane %v4239_v43, 7  ;;  %v496_v19 = vrot.slane %v4244_v59, 7 }
 0x1dd   :  { %v4322_v28 = vsel %vm303_vm13, %v480_v17, %v481_v18  ;;  %v4325_v29 = vsel %vm303_vm13, %v481_v18, %v483_v22  ;;  %v493_v30 = vsel %vm320_vm14, %v479_v24, 1e+09  ;;  %v498_v32 = vrot.slane %v4249_v48, 7 }
 0x1de   :  { %v486_v33 = vsel %vm303_vm13, %v483_v22, %v485_v26  ;;  %v497_v34 = vsel %vm273_vm11, %v495_v10, %v496_v19  ;;  %v500_v54 = vrot.slane %v4259_v50, 7  ;;  %v501_v55 = vrot.slane %v4264_v51, 7 }
 0x1df   :  { %v494_v62 = vsel %vm320_vm14, %v486_v33, 1e+09  ;;  %v499_v0 = vsel %vm273_vm11, %v496_v19, %v498_v32  ;;  %v503_v3 = vrot.slane %v4269_v52, 7  ;;  %v513_v8 = vsel %vm273_vm11, 1e+09, %v495_v10 }
 0x1e0   :  { %v502_v6 = vsel %vm273_vm11, %v500_v54, %v501_v55  ;;  %v514_v15 = vsel %vm273_vm11, 1e+09, %v500_v54  ;;  %v515_v17 = vsel %vm354_vm15, 1e+09, %v513_v8  ;;  %v516_v18 = vsel %vm355_vm1, 1e+09, %v497_v34 }
 0x1e1   :  { %v504_v22 = vsel %vm273_vm11, %v501_v55, %v503_v3  ;;  %v517_v24 = vsel %vm356_vm4, 1e+09, %v499_v0  ;;  %v518_v26 = vsel %vm357_vm3, 1e+09, %v498_v32  ;;  %v519_v10 = vsel %vm354_vm15, 1e+09, %v514_v15 }
 0x1e2   :  { %v520_v19 = vsel %vm355_vm1, 1e+09, %v502_v6  ;;  %v521_v33 = vsel %vm356_vm4, 1e+09, %v504_v22  ;;  %v522_v34 = vsel %vm357_vm3, 1e+09, %v503_v3  ;;  %v549_v54 = vmin.f32 %v4284_v7, %v4308_v14 }
 0x1e3   :  { %v523_v55 = vrot.slane %v4239_v43, 1  ;;  %v524_v0 = vrot.slane %v4244_v59, 1  ;;  %v526_v32 = vrot.slane %v4249_v48, 1  ;;  %v528_v8 = vrot.slane %v4254_v49, 1 }
 0x1e4   :  { %v530_v15 = vrot.slane %v4259_v50, 1  ;;  %v531_v6 = vrot.slane %v4264_v51, 1  ;;  %v533_v22 = vrot.slane %v4269_v52, 1  ;;  %v535_v41 = vrot.slane %v4274_v53, 1 }
 0x1e5   :  { %v525_v3 = vsel %vm364_vm2, %v523_v55, %v524_v0  ;;  %v527_v7 = vsel %vm364_vm2, %v524_v0, %v526_v32  ;;  %v529_v43 = vsel %vm364_vm2, %v526_v32, %v528_v8  ;;  %v550_v59 = vmin.f32 %v4288_v9, %v4312_v16 }
 0x1e6   :  { %v532_v14 = vsel %vm364_vm2, %v530_v15, %v531_v6  ;;  %v534_v49 = vsel %vm364_vm2, %v531_v6, %v533_v22  ;;  %v536_v50 = vsel %vm364_vm2, %v533_v22, %v535_v41  ;;  %v543_v51 = vsel %vm393_vm5, 1e+09, %v525_v3 }
 0x1e7   :  { %v544_v53 = vsel %vm394_vm7, 1e+09, %v527_v7  ;;  %v545_v55 = vsel %vm395_vm6, 1e+09, %v529_v43  ;;  %v546_v0 = vsel %vm393_vm5, 1e+09, %v532_v14  ;;  %v551_v9 = vmin.f32 %v4293_v63, %v493_v30 }
 0x1e8   :  { %v547_v16 = vsel %vm394_vm7, 1e+09, %v534_v49  ;;  %v548_v41 = vsel %vm395_vm6, 1e+09, %v536_v50  ;;  %v552_v32 = vmin.f32 %v454_v58, 1e+09  ;;  %v553_v8 = vmin.f32 %v4296_v5, %v4322_v28 }
 0x1e9   :  { %v554_v15 = vmin.f32 %v4300_v11, %v4325_v29  ;;  %v555_v6 = vmin.f32 %v4305_v13, %v494_v62  ;;  %v556_v63 = vmin.f32 %v459_v4, 1e+09  ;;  %v557_v30 = vmin.f32 %v515_v17, %v543_v51 }
 0x1ea   :  { %v558_v22 = vmin.f32 %v516_v18, %v544_v53  ;;  %v559_v3 = vmin.f32 %v517_v24, %v545_v55  ;;  %v560_v7 = vmin.f32 %v518_v26, 1e+09  ;;  %v561_v43 = vmin.f32 %v519_v10, %v546_v0 }
 0x1eb   :  { %v562_v14 = vmin.f32 %v520_v19, %v547_v16  ;;  %v563_v49 = vmin.f32 %v521_v33, %v548_v41  ;;  %v564_v48 = vmin.f32 %v522_v34, 1e+09  ;;  %v565_v58 = vmin.f32 %v549_v54, %v557_v30 }
 0x1ec   :  { %v566_v50 = vmin.f32 %v550_v59, %v558_v22  ;;  %v567_v40 = vmin.f32 %v551_v9, %v559_v3  ;;  %v568_v5 = vmin.f32 %v552_v32, %v560_v7  ;;  %v569_v28 = vmin.f32 %v553_v8, %v561_v43 }
 0x1ed   :  { %v570_v39 = vmin.f32 %v554_v15, %v562_v14  ;;  %v571_v11 = vmin.f32 %v555_v6, %v563_v49  ;;  %v572_v29 = vmin.f32 %v556_v63, %v564_v48  ;;  %v573_v13 = vadd.f32 %v565_v58, %v4137_v60 }
 0x1ee   :  { %v574_v52 = vadd.f32 %v566_v50, %v4130_v56  ;;  %v575_v4 = vadd.f32 %v567_v40, %v4139_v61  ;;  %v576_v62 = vadd.f32 %v568_v5, %v4132_v57  ;;  %v577_v17 = vadd.f32 %v569_v28, %v4137_v60 }
 0x1ef   :  { %v578_v18 = vadd.f32 %v570_v39, %v4130_v56  ;;  %v579_v24 = vadd.f32 %v571_v11, %v4139_v61  ;;  %v580_v26 = vadd.f32 %v572_v29, %v4132_v57  ;;  %v4405_v10 = vmin.f32 %v4228_v31, %v573_v13 }
 0x1f0   :  { %v4409_v19 = vmin.f32 %v430_v35, %v574_v52  ;;  %v4413_v40 = vmin.f32 %v431_v36, %v575_v4  ;;  %v4417_v33 = vmin.f32 %v432_v37, %v576_v62  ;;  %v4421_v39 = vmin.f32 %v433_v38, %v577_v17 }
 0x1f1   :  { %v8493_v34 = vmin.f32 %v4222_v25, 1e+09  ;;  %v8494_v12 = vmin.f32 %v4225_v27, 1e+09  ;;  %v8495_v20 = vmin.f32 %v4216_v21, 0.0  ;;  %v4437_v37 = vadd.f32 %v4405_v10, %v4137_v60 }
 0x1f2   :  { %v4441_v23 = vadd.f32 %v4409_v19, %v4130_v56  ;;  %v4445_v25 = vadd.f32 %v4413_v40, %v4139_v61  ;;  %v4449_v27 = vadd.f32 %v4417_v33, %v4132_v57  ;;  %v4453_v21 = vadd.f32 %v4421_v39, %v4137_v60 }
 0x1f3   :  { %v4425_v31 = vmin.f32 %v8493_v34, %v578_v18  ;;  %v4429_v35 = vmin.f32 %v8494_v12, %v579_v24  ;;  %v4433_v36 = vmin.f32 %v8495_v20, %v580_v26  ;;  %v603_v51 = vrot.slane %v4437_v37, 3 }
 0x1f4   :  { %v604_v53 = vrot.slane %v4441_v23, 3  ;;  %v606_v55 = vrot.slane %v4445_v25, 3  ;;  %v608_v0 = vrot.slane %v4453_v21, 3  ;;  %v625_v9 = vrot.slane %v4437_v37, 5 }
 0x1f5   :  { %v4457_v38 = vadd.f32 %v4425_v31, %v4130_v56  ;;  %v4461_v54 = vadd.f32 %v4429_v35, %v4139_v61  ;;  %v4465_v59 = vadd.f32 %v4433_v36, %v4132_v57  ;;  %v4475_v32 = vsel %vm285_vm12, 1e+09, %v603_v51 }
 0x1f6   :  { %v626_v8 = vrot.slane %v4441_v23, 5  ;;  %v4479_v15 = vsel %vm285_vm12, %v603_v51, %v604_v53  ;;  %v4484_v6 = vsel %vm285_vm12, %v604_v53, %v606_v55  ;;  %v4487_v63 = vsel %vm285_vm12, 1e+09, %v608_v0 }
 0x1f7   :  { %v609_v16 = vrot.slane %v4457_v38, 3  ;;  %v611_v41 = vrot.slane %v4461_v54, 3  ;;  %v628_v30 = vrot.slane %v4445_v25, 5  ;;  %v630_v43 = vrot.slane %v4449_v27, 5 }
 0x1f8   :  { %v4499_v7 = vsel %vm303_vm13, %v625_v9, %v626_v8  ;;  %v632_v49 = vrot.slane %v4453_v21, 5  ;;  %v633_v48 = vrot.slane %v4457_v38, 5  ;;  %v635_v58 = vrot.slane %v4461_v54, 5 }
 0x1f9   :  { %v4491_v22 = vsel %vm285_vm12, %v608_v0, %v609_v16  ;;  %v4496_v3 = vsel %vm285_vm12, %v609_v16, %v611_v41  ;;  %v4503_v14 = vsel %vm303_vm13, %v626_v8, %v628_v30  ;;  %v631_v50 = vsel %vm303_vm13, %v628_v30, %v630_v43 }
 0x1fa   :  { %v637_v5 = vrot.slane %v4465_v59, 5  ;;  %v647_v28 = vrot.slane %v4437_v37, 7  ;;  %v648_v11 = vrot.slane %v4441_v23, 7  ;;  %v4513_v29 = vsel %vm303_vm13, %v632_v49, %v633_v48 }
 0x1fb   :  { %v4516_v13 = vsel %vm303_vm13, %v633_v48, %v635_v58  ;;  %v645_v52 = vsel %vm320_vm14, %v631_v50, 1e+09  ;;  %v650_v4 = vrot.slane %v4445_v25, 7  ;;  %v652_v18 = vrot.slane %v4453_v21, 7 }
 0x1fc   :  { %v638_v62 = vsel %vm303_vm13, %v635_v58, %v637_v5  ;;  %v649_v17 = vsel %vm273_vm11, %v647_v28, %v648_v11  ;;  %v653_v24 = vrot.slane %v4457_v38, 7  ;;  %v655_v12 = vrot.slane %v4461_v54, 7 }
 0x1fd   :  { %v646_v26 = vsel %vm320_vm14, %v638_v62, 1e+09  ;;  %v651_v34 = vsel %vm273_vm11, %v648_v11, %v650_v4  ;;  %v665_v20 = vsel %vm273_vm11, 1e+09, %v647_v28  ;;  %v666_v53 = vsel %vm273_vm11, 1e+09, %v652_v18 }
 0x1fe   :  { %v654_v51 = vsel %vm273_vm11, %v652_v18, %v653_v24  ;;  %v667_v0 = vsel %vm354_vm15, 1e+09, %v665_v20  ;;  %v668_v9 = vsel %vm355_vm1, 1e+09, %v649_v17  ;;  %v656_v16 = vsel %vm273_vm11, %v653_v24, %v655_v12 }
 0x1ff   :  { %v669_v8 = vsel %vm356_vm4, 1e+09, %v651_v34  ;;  %v670_v30 = vsel %vm357_vm3, 1e+09, %v650_v4  ;;  %v671_v43 = vsel %vm354_vm15, 1e+09, %v666_v53  ;;  %v701_v50 = vmin.f32 %v4475_v32, %v4499_v7 }
 0x200   :  { %v672_v49 = vsel %vm355_vm1, 1e+09, %v654_v51  ;;  %v673_v48 = vsel %vm356_vm4, 1e+09, %v656_v16  ;;  %v674_v58 = vsel %vm357_vm3, 1e+09, %v655_v12  ;;  %v705_v16 = vmin.f32 %v4487_v63, %v4513_v29 }
 0x201   :  { %v675_v5 = vrot.slane %v4437_v37, 1  ;;  %v676_v28 = vrot.slane %v4441_v23, 1  ;;  %v678_v11 = vrot.slane %v4445_v25, 1  ;;  %v680_v4 = vrot.slane %v4449_v27, 1 }
 0x202   :  { %v682_v62 = vrot.slane %v4453_v21, 1  ;;  %v683_v17 = vrot.slane %v4457_v38, 1  ;;  %v685_v18 = vrot.slane %v4461_v54, 1  ;;  %v687_v24 = vrot.slane %v4465_v59, 1 }
 0x203   :  { %v677_v34 = vsel %vm364_vm2, %v675_v5, %v676_v28  ;;  %v679_v32 = vsel %vm364_vm2, %v676_v28, %v678_v11  ;;  %v681_v37 = vsel %vm364_vm2, %v678_v11, %v680_v4  ;;  %v702_v23 = vmin.f32 %v4479_v15, %v4503_v14 }
 0x204   :  { %v684_v7 = vsel %vm364_vm2, %v682_v62, %v683_v17  ;;  %v686_v27 = vsel %vm364_vm2, %v683_v17, %v685_v18  ;;  %v688_v21 = vsel %vm364_vm2, %v685_v18, %v687_v24  ;;  %v695_v38 = vsel %vm393_vm5, 1e+09, %v677_v34 }
 0x205   :  { %v696_v59 = vsel %vm394_vm7, 1e+09, %v679_v32  ;;  %v697_v12 = vsel %vm395_vm6, 1e+09, %v681_v37  ;;  %v698_v20 = vsel %vm393_vm5, 1e+09, %v684_v7  ;;  %v703_v15 = vmin.f32 %v4484_v6, %v645_v52 }
 0x206   :  { %v699_v14 = vsel %vm394_vm7, 1e+09, %v686_v27  ;;  %v700_v51 = vsel %vm395_vm6, 1e+09, %v688_v21  ;;  %v704_v53 = vmin.f32 %v606_v55, 1e+09  ;;  %v706_v5 = vmin.f32 %v4491_v22, %v4516_v13 }
 0x207   :  { %v707_v28 = vmin.f32 %v4496_v3, %v646_v26  ;;  %v708_v6 = vmin.f32 %v611_v41, 1e+09  ;;  %v709_v52 = vmin.f32 %v667_v0, %v695_v38  ;;  %v710_v11 = vmin.f32 %v668_v9, %v696_v59 }
 0x208   :  { %v711_v4 = vmin.f32 %v669_v8, %v697_v12  ;;  %v712_v62 = vmin.f32 %v670_v30, 1e+09  ;;  %v713_v17 = vmin.f32 %v671_v43, %v698_v20  ;;  %v714_v18 = vmin.f32 %v672_v49, %v699_v14 }
 0x209   :  { %v715_v24 = vmin.f32 %v673_v48, %v700_v51  ;;  %v716_v25 = vmin.f32 %v674_v58, 1e+09  ;;  %v717_v55 = vmin.f32 %v701_v50, %v709_v52  ;;  %v718_v34 = vmin.f32 %v702_v23, %v710_v11 }
 0x20a   :  { %v719_v32 = vmin.f32 %v703_v15, %v711_v4  ;;  %v720_v63 = vmin.f32 %v704_v53, %v712_v62  ;;  %v721_v29 = vmin.f32 %v705_v16, %v713_v17  ;;  %v722_v37 = vmin.f32 %v706_v5, %v714_v18 }
 0x20b   :  { %v723_v22 = vmin.f32 %v707_v28, %v715_v24  ;;  %v724_v13 = vmin.f32 %v708_v6, %v716_v25  ;;  %v725_v3 = vadd.f32 %v717_v55, %v4137_v60  ;;  %v726_v54 = vadd.f32 %v718_v34, %v4130_v56 }
 0x20c   :  { %v727_v41 = vadd.f32 %v719_v32, %v4139_v61  ;;  %v728_v26 = vadd.f32 %v720_v63, %v4132_v57  ;;  %v729_v0 = vadd.f32 %v721_v29, %v4137_v60  ;;  %v730_v9 = vadd.f32 %v722_v37, %v4130_v56 }
 0x20d   :  { %v731_v8 = vadd.f32 %v723_v22, %v4139_v61  ;;  %v732_v30 = vadd.f32 %v724_v13, %v4132_v57  ;;  %v4596_v43 = vmin.f32 %v4405_v10, %v725_v3  ;;  %v4599_v49 = vmin.f32 %v4409_v19, %v726_v54 }
 0x20e   :  { %v4602_v48 = vmin.f32 %v4413_v40, %v727_v41  ;;  %v4605_v58 = vmin.f32 %v4417_v33, %v728_v26  ;;  %v4608_v50 = vmin.f32 %v4421_v39, %v729_v0  ;;  %v4611_v23 = vmin.f32 %v4425_v31, %v730_v9 }
 0x20f   :  { %v4614_v7 = vmin.f32 %v4429_v35, %v731_v8  ;;  %v4617_v10 = vmin.f32 %v4433_v36, %v732_v30  ;;  %v4621_v19 = vadd.f32 %v4596_v43, %v4137_v60  ;;  %v4625_v40 = vadd.f32 %v4599_v49, %v4130_v56 }
 0x210   :  { %v4629_v33 = vadd.f32 %v4602_v48, %v4139_v61  ;;  %v4633_v39 = vadd.f32 %v4605_v58, %v4132_v57  ;;  %v4637_v31 = vadd.f32 %v4608_v50, %v4137_v60  ;;  %v4641_v35 = vadd.f32 %v4611_v23, %v4130_v56 }
 0x211   :  { %v4645_v36 = vadd.f32 %v4614_v7, %v4139_v61  ;;  %v4649_v27 = vadd.f32 %v4617_v10, %v4132_v57  ;;  %v755_v21 = vrot.slane %v4621_v19, 3  ;;  %v756_v38 = vrot.slane %v4625_v40, 3 }
 0x212   :  { %v758_v59 = vrot.slane %v4629_v33, 3  ;;  %v760_v12 = vrot.slane %v4637_v31, 3  ;;  %v777_v20 = vrot.slane %v4621_v19, 5  ;;  %v761_v15 = vrot.slane %v4641_v35, 3 }
 0x213   :  { %v763_v14 = vrot.slane %v4645_v36, 3  ;;  %v4659_v51 = vsel %vm285_vm12, 1e+09, %v755_v21  ;;  %v778_v53 = vrot.slane %v4625_v40, 5  ;;  %v4663_v16 = vsel %vm285_vm12, %v755_v21, %v756_v38 }
 0x214   :  { %v4668_v5 = vsel %vm285_vm12, %v756_v38, %v758_v59  ;;  %v4671_v28 = vsel %vm285_vm12, 1e+09, %v760_v12  ;;  %v780_v6 = vrot.slane %v4629_v33, 5  ;;  %v4675_v52 = vsel %vm285_vm12, %v760_v12, %v761_v15 }
 0x215   :  { %v4680_v11 = vsel %vm285_vm12, %v761_v15, %v763_v14  ;;  %v4683_v4 = vsel %vm303_vm13, %v777_v20, %v778_v53  ;;  %v782_v62 = vrot.slane %v4633_v39, 5  ;;  %v784_v18 = vrot.slane %v4637_v31, 5 }
 0x216   :  { %v4687_v17 = vsel %vm303_vm13, %v778_v53, %v780_v6  ;;  %v785_v24 = vrot.slane %v4641_v35, 5  ;;  %v787_v25 = vrot.slane %v4645_v36, 5  ;;  %v789_v34 = vrot.slane %v4649_v27, 5 }
 0x217   :  { %v783_v55 = vsel %vm303_vm13, %v780_v6, %v782_v62  ;;  %v799_v32 = vrot.slane %v4621_v19, 7  ;;  %v800_v63 = vrot.slane %v4625_v40, 7  ;;  %v802_v13 = vrot.slane %v4629_v33, 7 }
 0x218   :  { %v4697_v29 = vsel %vm303_vm13, %v784_v18, %v785_v24  ;;  %v4700_v37 = vsel %vm303_vm13, %v785_v24, %v787_v25  ;;  %v797_v22 = vsel %vm320_vm14, %v783_v55, 1e+09  ;;  %v790_v3 = vsel %vm303_vm13, %v787_v25, %v789_v34 }
 0x219   :  { %v801_v54 = vsel %vm273_vm11, %v799_v32, %v800_v63  ;;  %v804_v41 = vrot.slane %v4637_v31, 7  ;;  %v805_v26 = vrot.slane %v4641_v35, 7  ;;  %v798_v0 = vsel %vm320_vm14, %v790_v3, 1e+09 }
 0x21a   :  { %v803_v9 = vsel %vm273_vm11, %v800_v63, %v802_v13  ;;  %v807_v8 = vrot.slane %v4645_v36, 7  ;;  %v817_v30 = vsel %vm273_vm11, 1e+09, %v799_v32  ;;  %v820_v20 = vsel %vm355_vm1, 1e+09, %v801_v54 }
 0x21b   :  { %v806_v21 = vsel %vm273_vm11, %v804_v41, %v805_v26  ;;  %v818_v38 = vsel %vm273_vm11, 1e+09, %v804_v41  ;;  %v819_v12 = vsel %vm354_vm15, 1e+09, %v817_v30  ;;  %v821_v53 = vsel %vm356_vm4, 1e+09, %v803_v9 }
 0x21c   :  { %v808_v15 = vsel %vm273_vm11, %v805_v26, %v807_v8  ;;  %v822_v6 = vsel %vm357_vm3, 1e+09, %v802_v13  ;;  %v823_v62 = vsel %vm354_vm15, 1e+09, %v818_v38  ;;  %v824_v18 = vsel %vm355_vm1, 1e+09, %v806_v21 }
 0x21d   :  { %v825_v24 = vsel %vm356_vm4, 1e+09, %v808_v15  ;;  %v826_v25 = vsel %vm357_vm3, 1e+09, %v807_v8  ;;  %v853_v55 = vmin.f32 %v4659_v51, %v4683_v4  ;;  %v827_v34 = vrot.slane %v4621_v19, 1 }
 0x21e   :  { %v828_v32 = vrot.slane %v4625_v40, 1  ;;  %v830_v63 = vrot.slane %v4629_v33, 1  ;;  %v832_v13 = vrot.slane %v4633_v39, 1  ;;  %v834_v3 = vrot.slane %v4637_v31, 1 }
 0x21f   :  { %v835_v54 = vrot.slane %v4641_v35, 1  ;;  %v837_v41 = vrot.slane %v4645_v36, 1  ;;  %v839_v26 = vrot.slane %v4649_v27, 1  ;;  %v854_v40 = vmin.f32 %v4663_v16, %v4687_v17 }
 0x220   :  { %v829_v9 = vsel %vm364_vm2, %v827_v34, %v828_v32  ;;  %v831_v51 = vsel %vm364_vm2, %v828_v32, %v830_v63  ;;  %v833_v19 = vsel %vm364_vm2, %v830_v63, %v832_v13  ;;  %v855_v16 = vmin.f32 %v4668_v5, %v797_v22 }
 0x221   :  { %v836_v4 = vsel %vm364_vm2, %v834_v3, %v835_v54  ;;  %v838_v39 = vsel %vm364_vm2, %v835_v54, %v837_v41  ;;  %v840_v31 = vsel %vm364_vm2, %v837_v41, %v839_v26  ;;  %v847_v35 = vsel %vm393_vm5, 1e+09, %v829_v9 }
 0x222   :  { %v848_v27 = vsel %vm394_vm7, 1e+09, %v831_v51  ;;  %v849_v8 = vsel %vm395_vm6, 1e+09, %v833_v19  ;;  %v850_v30 = vsel %vm393_vm5, 1e+09, %v836_v4  ;;  %v857_v15 = vmin.f32 %v4671_v28, %v4697_v29 }
 0x223   :  { %v851_v17 = vsel %vm394_vm7, 1e+09, %v838_v39  ;;  %v852_v21 = vsel %vm395_vm6, 1e+09, %v840_v31  ;;  %v856_v38 = vmin.f32 %v758_v59, 1e+09  ;;  %v858_v34 = vmin.f32 %v4675_v52, %v4700_v37 }
 0x224   :  { %v859_v32 = vmin.f32 %v4680_v11, %v798_v0  ;;  %v860_v5 = vmin.f32 %v763_v14, 1e+09  ;;  %v861_v22 = vmin.f32 %v819_v12, %v847_v35  ;;  %v862_v63 = vmin.f32 %v820_v20, %v848_v27 }
 0x225   :  { %v863_v13 = vmin.f32 %v821_v53, %v849_v8  ;;  %v864_v3 = vmin.f32 %v822_v6, 1e+09  ;;  %v865_v54 = vmin.f32 %v823_v62, %v850_v30  ;;  %v866_v41 = vmin.f32 %v824_v18, %v851_v17 }
 0x226   :  { %v867_v26 = vmin.f32 %v825_v24, %v852_v21  ;;  %v868_v33 = vmin.f32 %v826_v25, 1e+09  ;;  %v869_v59 = vmin.f32 %v853_v55, %v861_v22  ;;  %v870_v9 = vmin.f32 %v854_v40, %v862_v63 }
 0x227   :  { %v871_v51 = vmin.f32 %v855_v16, %v863_v13  ;;  %v872_v28 = vmin.f32 %v856_v38, %v864_v3  ;;  %v873_v29 = vmin.f32 %v857_v15, %v865_v54  ;;  %v874_v19 = vmin.f32 %v858_v34, %v866_v41 }
 0x228   :  { %v875_v52 = vmin.f32 %v859_v32, %v867_v26  ;;  %v876_v37 = vmin.f32 %v860_v5, %v868_v33  ;;  %v877_v11 = vadd.f32 %v869_v59, %v4137_v60  ;;  %v878_v36 = vadd.f32 %v870_v9, %v4130_v56 }
 0x229   :  { %v879_v14 = vadd.f32 %v871_v51, %v4139_v61  ;;  %v880_v0 = vadd.f32 %v872_v28, %v4132_v57  ;;  %v881_v12 = vadd.f32 %v873_v29, %v4137_v60  ;;  %v882_v20 = vadd.f32 %v874_v19, %v4130_v56 }
 0x22a   :  { %v883_v53 = vadd.f32 %v875_v52, %v4139_v61  ;;  %v884_v6 = vadd.f32 %v876_v37, %v4132_v57  ;;  %v4780_v62 = vmin.f32 %v4596_v43, %v877_v11  ;;  %v4783_v18 = vmin.f32 %v4599_v49, %v878_v36 }
 0x22b   :  { %v4786_v24 = vmin.f32 %v4602_v48, %v879_v14  ;;  %v4789_v25 = vmin.f32 %v4605_v58, %v880_v0  ;;  %v4792_v55 = vmin.f32 %v4608_v50, %v881_v12  ;;  %v4795_v40 = vmin.f32 %v4611_v23, %v882_v20 }
 0x22c   :  { %v4798_v4 = vmin.f32 %v4614_v7, %v883_v53  ;;  %v4801_v43 = vmin.f32 %v4617_v10, %v884_v6  ;;  %v4805_v49 = vadd.f32 %v4780_v62, %v4137_v60  ;;  %v4809_v48 = vadd.f32 %v4783_v18, %v4130_v56 }
 0x22d   :  { %v4813_v58 = vadd.f32 %v4786_v24, %v4139_v61  ;;  %v4817_v50 = vadd.f32 %v4789_v25, %v4132_v57  ;;  %v4821_v23 = vadd.f32 %v4792_v55, %v4137_v60  ;;  %v4825_v7 = vadd.f32 %v4795_v40, %v4130_v56 }
 0x22e   :  { %v4829_v10 = vadd.f32 %v4798_v4, %v4139_v61  ;;  %v4833_v39 = vadd.f32 %v4801_v43, %v4132_v57  ;;  %v907_v31 = vrot.slane %v4805_v49, 3  ;;  %v908_v35 = vrot.slane %v4809_v48, 3 }
 0x22f   :  { %v910_v27 = vrot.slane %v4813_v58, 3  ;;  %v912_v8 = vrot.slane %v4821_v23, 3  ;;  %v929_v30 = vrot.slane %v4805_v49, 5  ;;  %v913_v16 = vrot.slane %v4825_v7, 3 }
 0x230   :  { %v915_v17 = vrot.slane %v4829_v10, 3  ;;  %v4843_v21 = vsel %vm285_vm12, 1e+09, %v907_v31  ;;  %v930_v38 = vrot.slane %v4809_v48, 5  ;;  %v4847_v15 = vsel %vm285_vm12, %v907_v31, %v908_v35 }
 0x231   :  { %v4852_v34 = vsel %vm285_vm12, %v908_v35, %v910_v27  ;;  %v4855_v32 = vsel %vm285_vm12, 1e+09, %v912_v8  ;;  %v932_v5 = vrot.slane %v4813_v58, 5  ;;  %v4859_v22 = vsel %vm285_vm12, %v912_v8, %v913_v16 }
 0x232   :  { %v4864_v63 = vsel %vm285_vm12, %v913_v16, %v915_v17  ;;  %v4867_v13 = vsel %vm303_vm13, %v929_v30, %v930_v38  ;;  %v934_v3 = vrot.slane %v4817_v50, 5  ;;  %v936_v41 = vrot.slane %v4821_v23, 5 }
 0x233   :  { %v4871_v54 = vsel %vm303_vm13, %v930_v38, %v932_v5  ;;  %v937_v26 = vrot.slane %v4825_v7, 5  ;;  %v939_v33 = vrot.slane %v4829_v10, 5  ;;  %v941_v9 = vrot.slane %v4833_v39, 5 }
 0x234   :  { %v935_v59 = vsel %vm303_vm13, %v932_v5, %v934_v3  ;;  %v951_v51 = vrot.slane %v4805_v49, 7  ;;  %v952_v28 = vrot.slane %v4809_v48, 7  ;;  %v954_v37 = vrot.slane %v4813_v58, 7 }
 0x235   :  { %v4881_v29 = vsel %vm303_vm13, %v936_v41, %v937_v26  ;;  %v4884_v19 = vsel %vm303_vm13, %v937_v26, %v939_v33  ;;  %v949_v52 = vsel %vm320_vm14, %v935_v59, 1e+09  ;;  %v942_v11 = vsel %vm303_vm13, %v939_v33, %v941_v9 }
 0x236   :  { %v953_v36 = vsel %vm273_vm11, %v951_v51, %v952_v28  ;;  %v956_v14 = vrot.slane %v4821_v23, 7  ;;  %v957_v0 = vrot.slane %v4825_v7, 7  ;;  %v950_v12 = vsel %vm320_vm14, %v942_v11, 1e+09 }
 0x237   :  { %v955_v20 = vsel %vm273_vm11, %v952_v28, %v954_v37  ;;  %v959_v53 = vrot.slane %v4829_v10, 7  ;;  %v969_v6 = vsel %vm273_vm11, 1e+09, %v951_v51  ;;  %v972_v30 = vsel %vm355_vm1, 1e+09, %v953_v36 }
 0x238   :  { %v958_v31 = vsel %vm273_vm11, %v956_v14, %v957_v0  ;;  %v970_v35 = vsel %vm273_vm11, 1e+09, %v956_v14  ;;  %v971_v8 = vsel %vm354_vm15, 1e+09, %v969_v6  ;;  %v973_v38 = vsel %vm356_vm4, 1e+09, %v955_v20 }
 0x239   :  { %v960_v16 = vsel %vm273_vm11, %v957_v0, %v959_v53  ;;  %v974_v5 = vsel %vm357_vm3, 1e+09, %v954_v37  ;;  %v975_v3 = vsel %vm354_vm15, 1e+09, %v970_v35  ;;  %v976_v41 = vsel %vm355_vm1, 1e+09, %v958_v31 }
 0x23a   :  { %v977_v26 = vsel %vm356_vm4, 1e+09, %v960_v16  ;;  %v978_v33 = vsel %vm357_vm3, 1e+09, %v959_v53  ;;  %v1005_v59 = vmin.f32 %v4843_v21, %v4867_v13  ;;  %v979_v9 = vrot.slane %v4805_v49, 1 }
 0x23b   :  { %v980_v51 = vrot.slane %v4809_v48, 1  ;;  %v982_v28 = vrot.slane %v4813_v58, 1  ;;  %v984_v37 = vrot.slane %v4817_v50, 1  ;;  %v986_v11 = vrot.slane %v4821_v23, 1 }
 0x23c   :  { %v987_v36 = vrot.slane %v4825_v7, 1  ;;  %v989_v14 = vrot.slane %v4829_v10, 1  ;;  %v991_v0 = vrot.slane %v4833_v39, 1  ;;  %v1006_v48 = vmin.f32 %v4847_v15, %v4871_v54 }
 0x23d   :  { %v981_v20 = vsel %vm364_vm2, %v979_v9, %v980_v51  ;;  %v983_v21 = vsel %vm364_vm2, %v980_v51, %v982_v28  ;;  %v985_v49 = vsel %vm364_vm2, %v982_v28, %v984_v37  ;;  %v1007_v15 = vmin.f32 %v4852_v34, %v949_v52 }
 0x23e   :  { %v988_v13 = vsel %vm364_vm2, %v986_v11, %v987_v36  ;;  %v990_v50 = vsel %vm364_vm2, %v987_v36, %v989_v14  ;;  %v992_v23 = vsel %vm364_vm2, %v989_v14, %v991_v0  ;;  %v999_v7 = vsel %vm393_vm5, 1e+09, %v981_v20 }
 0x23f   :  { %v1000_v39 = vsel %vm394_vm7, 1e+09, %v983_v21  ;;  %v1001_v53 = vsel %vm395_vm6, 1e+09, %v985_v49  ;;  %v1002_v6 = vsel %vm393_vm5, 1e+09, %v988_v13  ;;  %v1009_v16 = vmin.f32 %v4855_v32, %v4881_v29 }
 0x240   :  { %v1003_v54 = vsel %vm394_vm7, 1e+09, %v990_v50  ;;  %v1004_v31 = vsel %vm395_vm6, 1e+09, %v992_v23  ;;  %v1008_v35 = vmin.f32 %v910_v27, 1e+09  ;;  %v1010_v9 = vmin.f32 %v4859_v22, %v4884_v19 }
 0x241   :  { %v1011_v51 = vmin.f32 %v4864_v63, %v950_v12  ;;  %v1012_v34 = vmin.f32 %v915_v17, 1e+09  ;;  %v1013_v52 = vmin.f32 %v971_v8, %v999_v7  ;;  %v1014_v28 = vmin.f32 %v972_v30, %v1000_v39 }
 0x242   :  { %v1015_v37 = vmin.f32 %v973_v38, %v1001_v53  ;;  %v1016_v11 = vmin.f32 %v974_v5, 1e+09  ;;  %v1017_v36 = vmin.f32 %v975_v3, %v1002_v6  ;;  %v1018_v14 = vmin.f32 %v976_v41, %v1003_v54 }
 0x243   :  { %v1019_v0 = vmin.f32 %v977_v26, %v1004_v31  ;;  %v1020_v58 = vmin.f32 %v978_v33, 1e+09  ;;  %v1021_v27 = vmin.f32 %v1005_v59, %v1013_v52  ;;  %v1022_v20 = vmin.f32 %v1006_v48, %v1014_v28 }
 0x244   :  { %v1023_v21 = vmin.f32 %v1007_v15, %v1015_v37  ;;  %v1024_v32 = vmin.f32 %v1008_v35, %v1016_v11  ;;  %v1025_v29 = vmin.f32 %v1009_v16, %v1017_v36  ;;  %v1026_v49 = vmin.f32 %v1010_v9, %v1018_v14 }
 0x245   :  { %v1027_v22 = vmin.f32 %v1011_v51, %v1019_v0  ;;  %v1028_v19 = vmin.f32 %v1012_v34, %v1020_v58  ;;  %v1029_v63 = vadd.f32 %v1021_v27, %v4137_v60  ;;  %v1030_v10 = vadd.f32 %v1022_v20, %v4130_v56 }
 0x246   :  { %v1031_v17 = vadd.f32 %v1023_v21, %v4139_v61  ;;  %v1032_v12 = vadd.f32 %v1024_v32, %v4132_v57  ;;  %v1033_v8 = vadd.f32 %v1025_v29, %v4137_v60  ;;  %v1034_v30 = vadd.f32 %v1026_v49, %v4130_v56 }
 0x247   :  { %v1035_v38 = vadd.f32 %v1027_v22, %v4139_v61  ;;  %v1036_v5 = vadd.f32 %v1028_v19, %v4132_v57  ;;  %v4964_v3 = vmin.f32 %v4780_v62, %v1029_v63  ;;  %v4967_v41 = vmin.f32 %v4783_v18, %v1030_v10 }
 0x248   :  { %v4970_v26 = vmin.f32 %v4786_v24, %v1031_v17  ;;  %v4973_v33 = vmin.f32 %v4789_v25, %v1032_v12  ;;  %v4976_v59 = vmin.f32 %v4792_v55, %v1033_v8  ;;  %v4979_v48 = vmin.f32 %v4795_v40, %v1034_v30 }
 0x249   :  { %v4982_v13 = vmin.f32 %v4798_v4, %v1035_v38  ;;  %v4985_v62 = vmin.f32 %v4801_v43, %v1036_v5  ;;  %v4989_v18 = vadd.f32 %v4964_v3, %v4137_v60  ;;  %v4993_v24 = vadd.f32 %v4967_v41, %v4130_v56 }
 0x24a   :  { %v4997_v25 = vadd.f32 %v4970_v26, %v4139_v61  ;;  %v5001_v55 = vadd.f32 %v4973_v33, %v4132_v57  ;;  %v5005_v40 = vadd.f32 %v4976_v59, %v4137_v60  ;;  %v5009_v4 = vadd.f32 %v4979_v48, %v4130_v56 }
 0x24b   :  { %v5013_v43 = vadd.f32 %v4982_v13, %v4139_v61  ;;  %v5017_v50 = vadd.f32 %v4985_v62, %v4132_v57  ;;  %v1059_v23 = vrot.slane %v4989_v18, 3  ;;  %v1060_v7 = vrot.slane %v4993_v24, 3 }
 0x24c   :  { %v1062_v39 = vrot.slane %v4997_v25, 3  ;;  %v1064_v53 = vrot.slane %v5005_v40, 3  ;;  %v1081_v6 = vrot.slane %v4989_v18, 5  ;;  %v1065_v15 = vrot.slane %v5009_v4, 3 }
 0x24d   :  { %v1067_v54 = vrot.slane %v5013_v43, 3  ;;  %v5027_v31 = vsel %vm285_vm12, 1e+09, %v1059_v23  ;;  %v1082_v35 = vrot.slane %v4993_v24, 5  ;;  %v5031_v16 = vsel %vm285_vm12, %v1059_v23, %v1060_v7 }
 0x24e   :  { %v5036_v9 = vsel %vm285_vm12, %v1060_v7, %v1062_v39  ;;  %v5039_v51 = vsel %vm285_vm12, 1e+09, %v1064_v53  ;;  %v1084_v34 = vrot.slane %v4997_v25, 5  ;;  %v5043_v52 = vsel %vm285_vm12, %v1064_v53, %v1065_v15 }
 0x24f   :  { %v5048_v28 = vsel %vm285_vm12, %v1065_v15, %v1067_v54  ;;  %v5051_v37 = vsel %vm303_vm13, %v1081_v6, %v1082_v35  ;;  %v1086_v11 = vrot.slane %v5001_v55, 5  ;;  %v1088_v14 = vrot.slane %v5005_v40, 5 }
 0x250   :  { %v5055_v36 = vsel %vm303_vm13, %v1082_v35, %v1084_v34  ;;  %v1089_v0 = vrot.slane %v5009_v4, 5  ;;  %v1091_v58 = vrot.slane %v5013_v43, 5  ;;  %v1093_v20 = vrot.slane %v5017_v50, 5 }
 0x251   :  { %v1087_v27 = vsel %vm303_vm13, %v1084_v34, %v1086_v11  ;;  %v1103_v21 = vrot.slane %v4989_v18, 7  ;;  %v1104_v32 = vrot.slane %v4993_v24, 7  ;;  %v1106_v19 = vrot.slane %v4997_v25, 7 }
 0x252   :  { %v5065_v29 = vsel %vm303_vm13, %v1088_v14, %v1089_v0  ;;  %v5068_v49 = vsel %vm303_vm13, %v1089_v0, %v1091_v58  ;;  %v1101_v22 = vsel %vm320_vm14, %v1087_v27, 1e+09  ;;  %v1094_v63 = vsel %vm303_vm13, %v1091_v58, %v1093_v20 }
 0x253   :  { %v1105_v10 = vsel %vm273_vm11, %v1103_v21, %v1104_v32  ;;  %v1108_v17 = vrot.slane %v5005_v40, 7  ;;  %v1109_v12 = vrot.slane %v5009_v4, 7  ;;  %v1102_v8 = vsel %vm320_vm14, %v1094_v63, 1e+09 }
 0x254   :  { %v1107_v30 = vsel %vm273_vm11, %v1104_v32, %v1106_v19  ;;  %v1111_v38 = vrot.slane %v5013_v43, 7  ;;  %v1121_v5 = vsel %vm273_vm11, 1e+09, %v1103_v21  ;;  %v1124_v6 = vsel %vm355_vm1, 1e+09, %v1105_v10 }
 0x255   :  { %v1110_v23 = vsel %vm273_vm11, %v1108_v17, %v1109_v12  ;;  %v1122_v7 = vsel %vm273_vm11, 1e+09, %v1108_v17  ;;  %v1123_v53 = vsel %vm354_vm15, 1e+09, %v1121_v5  ;;  %v1125_v35 = vsel %vm356_vm4, 1e+09, %v1107_v30 }
 0x256   :  { %v1112_v15 = vsel %vm273_vm11, %v1109_v12, %v1111_v38  ;;  %v1126_v34 = vsel %vm357_vm3, 1e+09, %v1106_v19  ;;  %v1127_v11 = vsel %vm354_vm15, 1e+09, %v1122_v7  ;;  %v1128_v14 = vsel %vm355_vm1, 1e+09, %v1110_v23 }
 0x257   :  { %v1129_v0 = vsel %vm356_vm4, 1e+09, %v1112_v15  ;;  %v1130_v58 = vsel %vm357_vm3, 1e+09, %v1111_v38  ;;  %v1157_v27 = vmin.f32 %v5027_v31, %v5051_v37  ;;  %v1131_v20 = vrot.slane %v4989_v18, 1 }
 0x258   :  { %v1132_v21 = vrot.slane %v4993_v24, 1  ;;  %v1134_v32 = vrot.slane %v4997_v25, 1  ;;  %v1136_v19 = vrot.slane %v5001_v55, 1  ;;  %v1138_v63 = vrot.slane %v5005_v40, 1 }
 0x259   :  { %v1139_v10 = vrot.slane %v5009_v4, 1  ;;  %v1141_v17 = vrot.slane %v5013_v43, 1  ;;  %v1143_v12 = vrot.slane %v5017_v50, 1  ;;  %v1158_v24 = vmin.f32 %v5031_v16, %v5055_v36 }
 0x25a   :  { %v1133_v30 = vsel %vm364_vm2, %v1131_v20, %v1132_v21  ;;  %v1135_v31 = vsel %vm364_vm2, %v1132_v21, %v1134_v32  ;;  %v1137_v18 = vsel %vm364_vm2, %v1134_v32, %v1136_v19  ;;  %v1159_v16 = vmin.f32 %v5036_v9, %v1101_v22 }
 0x25b   :  { %v1140_v37 = vsel %vm364_vm2, %v1138_v63, %v1139_v10  ;;  %v1142_v55 = vsel %vm364_vm2, %v1139_v10, %v1141_v17  ;;  %v1144_v40 = vsel %vm364_vm2, %v1141_v17, %v1143_v12  ;;  %v1151_v4 = vsel %vm393_vm5, 1e+09, %v1133_v30 }
 0x25c   :  { %v1152_v50 = vsel %vm394_vm7, 1e+09, %v1135_v31  ;;  %v1153_v38 = vsel %vm395_vm6, 1e+09, %v1137_v18  ;;  %v1154_v5 = vsel %vm393_vm5, 1e+09, %v1140_v37  ;;  %v1161_v15 = vmin.f32 %v5039_v51, %v5065_v29 }
 0x25d   :  { %v1155_v36 = vsel %vm394_vm7, 1e+09, %v1142_v55  ;;  %v1156_v23 = vsel %vm395_vm6, 1e+09, %v1144_v40  ;;  %v1160_v7 = vmin.f32 %v1062_v39, 1e+09  ;;  %v1162_v20 = vmin.f32 %v5043_v52, %v5068_v49 }
 0x25e   :  { %v1163_v21 = vmin.f32 %v5048_v28, %v1102_v8  ;;  %v1164_v9 = vmin.f32 %v1067_v54, 1e+09  ;;  %v1165_v22 = vmin.f32 %v1123_v53, %v1151_v4  ;;  %v1166_v32 = vmin.f32 %v1124_v6, %v1152_v50 }
 0x25f   :  { %v1167_v19 = vmin.f32 %v1125_v35, %v1153_v38  ;;  %v1168_v63 = vmin.f32 %v1126_v34, 1e+09  ;;  %v1169_v10 = vmin.f32 %v1127_v11, %v1154_v5  ;;  %v1170_v17 = vmin.f32 %v1128_v14, %v1155_v36 }
 0x260   :  { %v1171_v12 = vmin.f32 %v1129_v0, %v1156_v23  ;;  %v1172_v25 = vmin.f32 %v1130_v58, 1e+09  ;;  %v1173_v39 = vmin.f32 %v1157_v27, %v1165_v22  ;;  %v1174_v30 = vmin.f32 %v1158_v24, %v1166_v32 }
 0x261   :  { %v1175_v31 = vmin.f32 %v1159_v16, %v1167_v19  ;;  %v1176_v51 = vmin.f32 %v1160_v7, %v1168_v63  ;;  %v1177_v29 = vmin.f32 %v1161_v15, %v1169_v10  ;;  %v1178_v18 = vmin.f32 %v1162_v20, %v1170_v17 }
 0x262   :  { %v1179_v52 = vmin.f32 %v1163_v21, %v1171_v12  ;;  %v1180_v49 = vmin.f32 %v1164_v9, %v1172_v25  ;;  %v1181_v28 = vadd.f32 %v1173_v39, %v4137_v60  ;;  %v1182_v43 = vadd.f32 %v1174_v30, %v4130_v56 }
 0x263   :  { %v1183_v54 = vadd.f32 %v1175_v31, %v4139_v61  ;;  %v1184_v8 = vadd.f32 %v1176_v51, %v4132_v57  ;;  %v1185_v53 = vadd.f32 %v1177_v29, %v4137_v60  ;;  %v1186_v6 = vadd.f32 %v1178_v18, %v4130_v56 }
 0x264   :  { %v1187_v35 = vadd.f32 %v1179_v52, %v4139_v61  ;;  %v1188_v34 = vadd.f32 %v1180_v49, %v4132_v57  ;;  %v5148_v11 = vmin.f32 %v4964_v3, %v1181_v28  ;;  %v5151_v14 = vmin.f32 %v4967_v41, %v1182_v43 }
 0x265   :  { %v5154_v0 = vmin.f32 %v4970_v26, %v1183_v54  ;;  %v5157_v58 = vmin.f32 %v4973_v33, %v1184_v8  ;;  %v5160_v27 = vmin.f32 %v4976_v59, %v1185_v53  ;;  %v5163_v24 = vmin.f32 %v4979_v48, %v1186_v6 }
 0x266   :  { %v5166_v37 = vmin.f32 %v4982_v13, %v1187_v35  ;;  %v5169_v3 = vmin.f32 %v4985_v62, %v1188_v34  ;;  %v5173_v41 = vadd.f32 %v5148_v11, %v4137_v60  ;;  %v5177_v26 = vadd.f32 %v5151_v14, %v4130_v56 }
 0x267   :  { %v5181_v33 = vadd.f32 %v5154_v0, %v4139_v61  ;;  %v5185_v59 = vadd.f32 %v5157_v58, %v4132_v57  ;;  %v5189_v48 = vadd.f32 %v5160_v27, %v4137_v60  ;;  %v5193_v13 = vadd.f32 %v5163_v24, %v4130_v56 }
 0x268   :  { %v5197_v62 = vadd.f32 %v5166_v37, %v4139_v61  ;;  %v5201_v55 = vadd.f32 %v5169_v3, %v4132_v57  ;;  %v1211_v40 = vrot.slane %v5173_v41, 3  ;;  %v1212_v4 = vrot.slane %v5177_v26, 3 }
 0x269   :  { %v1214_v50 = vrot.slane %v5181_v33, 3  ;;  %v1216_v38 = vrot.slane %v5189_v48, 3  ;;  %v1233_v5 = vrot.slane %v5173_v41, 5  ;;  %v1217_v16 = vrot.slane %v5193_v13, 3 }
 0x26a   :  { %v1219_v36 = vrot.slane %v5197_v62, 3  ;;  %v5211_v23 = vsel %vm285_vm12, 1e+09, %v1211_v40  ;;  %v1234_v7 = vrot.slane %v5177_v26, 5  ;;  %v5215_v15 = vsel %vm285_vm12, %v1211_v40, %v1212_v4 }
 0x26b   :  { %v5220_v20 = vsel %vm285_vm12, %v1212_v4, %v1214_v50  ;;  %v5223_v21 = vsel %vm285_vm12, 1e+09, %v1216_v38  ;;  %v1236_v9 = vrot.slane %v5181_v33, 5  ;;  %v5227_v22 = vsel %vm285_vm12, %v1216_v38, %v1217_v16 }
 0x26c   :  { %v5232_v32 = vsel %vm285_vm12, %v1217_v16, %v1219_v36  ;;  %v5235_v19 = vsel %vm303_vm13, %v1233_v5, %v1234_v7  ;;  %v1238_v63 = vrot.slane %v5185_v59, 5  ;;  %v1240_v17 = vrot.slane %v5189_v48, 5 }
 0x26d   :  { %v5239_v10 = vsel %vm303_vm13, %v1234_v7, %v1236_v9  ;;  %v1241_v12 = vrot.slane %v5193_v13, 5  ;;  %v1243_v25 = vrot.slane %v5197_v62, 5  ;;  %v1245_v30 = vrot.slane %v5201_v55, 5 }
 0x26e   :  { %v1239_v39 = vsel %vm303_vm13, %v1236_v9, %v1238_v63  ;;  %v1255_v31 = vrot.slane %v5173_v41, 7  ;;  %v1256_v51 = vrot.slane %v5177_v26, 7  ;;  %v1258_v49 = vrot.slane %v5181_v33, 7 }
 0x26f   :  { %v5249_v29 = vsel %vm303_vm13, %v1240_v17, %v1241_v12  ;;  %v5252_v18 = vsel %vm303_vm13, %v1241_v12, %v1243_v25  ;;  %v1253_v52 = vsel %vm320_vm14, %v1239_v39, 1e+09  ;;  %v1246_v28 = vsel %vm303_vm13, %v1243_v25, %v1245_v30 }
 0x270   :  { %v1257_v43 = vsel %vm273_vm11, %v1255_v31, %v1256_v51  ;;  %v1260_v54 = vrot.slane %v5189_v48, 7  ;;  %v1261_v8 = vrot.slane %v5193_v13, 7  ;;  %v1254_v53 = vsel %vm320_vm14, %v1246_v28, 1e+09 }
 0x271   :  { %v1259_v6 = vsel %vm273_vm11, %v1256_v51, %v1258_v49  ;;  %v1263_v35 = vrot.slane %v5197_v62, 7  ;;  %v1273_v34 = vsel %vm273_vm11, 1e+09, %v1255_v31  ;;  %v1276_v5 = vsel %vm355_vm1, 1e+09, %v1257_v43 }
 0x272   :  { %v1262_v40 = vsel %vm273_vm11, %v1260_v54, %v1261_v8  ;;  %v1274_v4 = vsel %vm273_vm11, 1e+09, %v1260_v54  ;;  %v1275_v38 = vsel %vm354_vm15, 1e+09, %v1273_v34  ;;  %v1277_v7 = vsel %vm356_vm4, 1e+09, %v1259_v6 }
 0x273   :  { %v1264_v16 = vsel %vm273_vm11, %v1261_v8, %v1263_v35  ;;  %v1278_v9 = vsel %vm357_vm3, 1e+09, %v1258_v49  ;;  %v1279_v63 = vsel %vm354_vm15, 1e+09, %v1274_v4  ;;  %v1280_v17 = vsel %vm355_vm1, 1e+09, %v1262_v40 }
 0x274   :  { %v1281_v12 = vsel %vm356_vm4, 1e+09, %v1264_v16  ;;  %v1282_v25 = vsel %vm357_vm3, 1e+09, %v1263_v35  ;;  %v1309_v39 = vmin.f32 %v5211_v23, %v5235_v19  ;;  %v1283_v30 = vrot.slane %v5173_v41, 1 }
 0x275   :  { %v1284_v31 = vrot.slane %v5177_v26, 1  ;;  %v1286_v51 = vrot.slane %v5181_v33, 1  ;;  %v1288_v49 = vrot.slane %v5185_v59, 1  ;;  %v1290_v28 = vrot.slane %v5189_v48, 1 }
 0x276   :  { %v1291_v43 = vrot.slane %v5193_v13, 1  ;;  %v1293_v54 = vrot.slane %v5197_v62, 1  ;;  %v1295_v8 = vrot.slane %v5201_v55, 1  ;;  %v1310_v26 = vmin.f32 %v5215_v15, %v5239_v10 }
 0x277   :  { %v1285_v6 = vsel %vm364_vm2, %v1283_v30, %v1284_v31  ;;  %v1287_v23 = vsel %vm364_vm2, %v1284_v31, %v1286_v51  ;;  %v1289_v41 = vsel %vm364_vm2, %v1286_v51, %v1288_v49  ;;  %v1311_v15 = vmin.f32 %v5220_v20, %v1253_v52 }
 0x278   :  { %v1292_v19 = vsel %vm364_vm2, %v1290_v28, %v1291_v43  ;;  %v1294_v59 = vsel %vm364_vm2, %v1291_v43, %v1293_v54  ;;  %v1296_v48 = vsel %vm364_vm2, %v1293_v54, %v1295_v8  ;;  %v1303_v13 = vsel %vm393_vm5, 1e+09, %v1285_v6 }
 0x279   :  { %v1304_v55 = vsel %vm394_vm7, 1e+09, %v1287_v23  ;;  %v1305_v35 = vsel %vm395_vm6, 1e+09, %v1289_v41  ;;  %v1306_v34 = vsel %vm393_vm5, 1e+09, %v1292_v19  ;;  %v1313_v16 = vmin.f32 %v5223_v21, %v5249_v29 }
 0x27a   :  { %v1307_v10 = vsel %vm394_vm7, 1e+09, %v1294_v59  ;;  %v1308_v40 = vsel %vm395_vm6, 1e+09, %v1296_v48  ;;  %v1312_v4 = vmin.f32 %v1214_v50, 1e+09  ;;  %v1314_v30 = vmin.f32 %v5227_v22, %v5252_v18 }
 0x27b   :  { %v1315_v31 = vmin.f32 %v5232_v32, %v1254_v53  ;;  %v1316_v20 = vmin.f32 %v1219_v36, 1e+09  ;;  %v1317_v52 = vmin.f32 %v1275_v38, %v1303_v13  ;;  %v1318_v51 = vmin.f32 %v1276_v5, %v1304_v55 }
 0x27c   :  { %v1319_v49 = vmin.f32 %v1277_v7, %v1305_v35  ;;  %v1320_v28 = vmin.f32 %v1278_v9, 1e+09  ;;  %v1321_v43 = vmin.f32 %v1279_v63, %v1306_v34  ;;  %v1322_v54 = vmin.f32 %v1280_v17, %v1307_v10 }
 0x27d   :  { %v1323_v8 = vmin.f32 %v1281_v12, %v1308_v40  ;;  %v1324_v33 = vmin.f32 %v1282_v25, 1e+09  ;;  %v1325_v50 = vmin.f32 %v1309_v39, %v1317_v52  ;;  %v1326_v6 = vmin.f32 %v1310_v26, %v1318_v51 }
 0x27e   :  { %v1327_v23 = vmin.f32 %v1311_v15, %v1319_v49  ;;  %v1328_v21 = vmin.f32 %v1312_v4, %v1320_v28  ;;  %v1329_v29 = vmin.f32 %v1313_v16, %v1321_v43  ;;  %v1330_v41 = vmin.f32 %v1314_v30, %v1322_v54 }
 0x27f   :  { %v1331_v22 = vmin.f32 %v1315_v31, %v1323_v8  ;;  %v1332_v18 = vmin.f32 %v1316_v20, %v1324_v33  ;;  %v1333_v32 = vadd.f32 %v1325_v50, %v4137_v60  ;;  %v1334_v62 = vadd.f32 %v1326_v6, %v4130_v56 }
 0x280   :  { %v1335_v36 = vadd.f32 %v1327_v23, %v4139_v61  ;;  %v1336_v53 = vadd.f32 %v1328_v21, %v4132_v57  ;;  %v1337_v38 = vadd.f32 %v1329_v29, %v4137_v60  ;;  %v1338_v5 = vadd.f32 %v1330_v41, %v4130_v56 }
 0x281   :  { %v1339_v7 = vadd.f32 %v1331_v22, %v4139_v61  ;;  %v1340_v9 = vadd.f32 %v1332_v18, %v4132_v57  ;;  %v5332_v63 = vmin.f32 %v5148_v11, %v1333_v32  ;;  %v5335_v17 = vmin.f32 %v5151_v14, %v1334_v62 }
 0x282   :  { %v5338_v12 = vmin.f32 %v5154_v0, %v1335_v36  ;;  %v5341_v25 = vmin.f32 %v5157_v58, %v1336_v53  ;;  %v5344_v39 = vmin.f32 %v5160_v27, %v1337_v38  ;;  %v5347_v26 = vmin.f32 %v5163_v24, %v1338_v5 }
 0x283   :  { %v5350_v19 = vmin.f32 %v5166_v37, %v1339_v7  ;;  %v5353_v11 = vmin.f32 %v5169_v3, %v1340_v9  ;;  %v5357_v14 = vadd.f32 %v5332_v63, %v4137_v60  ;;  %v5361_v0 = vadd.f32 %v5335_v17, %v4130_v56 }
 0x284   :  { %v5365_v58 = vadd.f32 %v5338_v12, %v4139_v61  ;;  %v5369_v27 = vadd.f32 %v5341_v25, %v4132_v57  ;;  %v5373_v24 = vadd.f32 %v5344_v39, %v4137_v60  ;;  %v5377_v37 = vadd.f32 %v5347_v26, %v4130_v56 }
 0x285   :  { %v5381_v3 = vadd.f32 %v5350_v19, %v4139_v61  ;;  %v5385_v59 = vadd.f32 %v5353_v11, %v4132_v57  ;;  %v1363_v48 = vrot.slane %v5357_v14, 3  ;;  %v1364_v13 = vrot.slane %v5361_v0, 3 }
 0x286   :  { %v1366_v55 = vrot.slane %v5365_v58, 3  ;;  %v1368_v35 = vrot.slane %v5373_v24, 3  ;;  %v1385_v34 = vrot.slane %v5357_v14, 5  ;;  %v1369_v15 = vrot.slane %v5377_v37, 3 }
 0x287   :  { %v1371_v10 = vrot.slane %v5381_v3, 3  ;;  %v5395_v40 = vsel %vm285_vm12, 1e+09, %v1363_v48  ;;  %v1386_v4 = vrot.slane %v5361_v0, 5  ;;  %v5399_v16 = vsel %vm285_vm12, %v1363_v48, %v1364_v13 }
 0x288   :  { %v5404_v30 = vsel %vm285_vm12, %v1364_v13, %v1366_v55  ;;  %v5407_v31 = vsel %vm285_vm12, 1e+09, %v1368_v35  ;;  %v1388_v20 = vrot.slane %v5365_v58, 5  ;;  %v5411_v52 = vsel %vm285_vm12, %v1368_v35, %v1369_v15 }
 0x289   :  { %v5416_v51 = vsel %vm285_vm12, %v1369_v15, %v1371_v10  ;;  %v5419_v49 = vsel %vm303_vm13, %v1385_v34, %v1386_v4  ;;  %v1390_v28 = vrot.slane %v5369_v27, 5  ;;  %v1392_v54 = vrot.slane %v5373_v24, 5 }
 0x28a   :  { %v5423_v43 = vsel %vm303_vm13, %v1386_v4, %v1388_v20  ;;  %v1393_v8 = vrot.slane %v5377_v37, 5  ;;  %v1395_v33 = vrot.slane %v5381_v3, 5  ;;  %v1397_v6 = vrot.slane %v5385_v59, 5 }
 0x28b   :  { %v1391_v50 = vsel %vm303_vm13, %v1388_v20, %v1390_v28  ;;  %v1407_v23 = vrot.slane %v5357_v14, 7  ;;  %v1408_v21 = vrot.slane %v5361_v0, 7  ;;  %v1410_v18 = vrot.slane %v5365_v58, 7 }
 0x28c   :  { %v5433_v29 = vsel %vm303_vm13, %v1392_v54, %v1393_v8  ;;  %v5436_v41 = vsel %vm303_vm13, %v1393_v8, %v1395_v33  ;;  %v1405_v22 = vsel %vm320_vm14, %v1391_v50, 1e+09  ;;  %v1398_v32 = vsel %vm303_vm13, %v1395_v33, %v1397_v6 }
 0x28d   :  { %v1409_v62 = vsel %vm273_vm11, %v1407_v23, %v1408_v21  ;;  %v1412_v36 = vrot.slane %v5373_v24, 7  ;;  %v1413_v53 = vrot.slane %v5377_v37, 7  ;;  %v1406_v38 = vsel %vm320_vm14, %v1398_v32, 1e+09 }
 0x28e   :  { %v1411_v5 = vsel %vm273_vm11, %v1408_v21, %v1410_v18  ;;  %v1415_v7 = vrot.slane %v5381_v3, 7  ;;  %v1425_v9 = vsel %vm273_vm11, 1e+09, %v1407_v23  ;;  %v1428_v34 = vsel %vm355_vm1, 1e+09, %v1409_v62 }
 0x28f   :  { %v1414_v48 = vsel %vm273_vm11, %v1412_v36, %v1413_v53  ;;  %v1426_v13 = vsel %vm273_vm11, 1e+09, %v1412_v36  ;;  %v1427_v35 = vsel %vm354_vm15, 1e+09, %v1425_v9  ;;  %v1429_v4 = vsel %vm356_vm4, 1e+09, %v1411_v5 }
 0x290   :  { %v1416_v15 = vsel %vm273_vm11, %v1413_v53, %v1415_v7  ;;  %v1430_v20 = vsel %vm357_vm3, 1e+09, %v1410_v18  ;;  %v1431_v28 = vsel %vm354_vm15, 1e+09, %v1426_v13  ;;  %v1432_v54 = vsel %vm355_vm1, 1e+09, %v1414_v48 }
 0x291   :  { %v1433_v8 = vsel %vm356_vm4, 1e+09, %v1416_v15  ;;  %v1434_v33 = vsel %vm357_vm3, 1e+09, %v1415_v7  ;;  %v1461_v50 = vmin.f32 %v5395_v40, %v5419_v49  ;;  %v1435_v6 = vrot.slane %v5357_v14, 1 }
 0x292   :  { %v1436_v23 = vrot.slane %v5361_v0, 1  ;;  %v1438_v21 = vrot.slane %v5365_v58, 1  ;;  %v1440_v18 = vrot.slane %v5369_v27, 1  ;;  %v1442_v32 = vrot.slane %v5373_v24, 1 }
 0x293   :  { %v1443_v62 = vrot.slane %v5377_v37, 1  ;;  %v1445_v36 = vrot.slane %v5381_v3, 1  ;;  %v1447_v53 = vrot.slane %v5385_v59, 1  ;;  %v1462_v0 = vmin.f32 %v5399_v16, %v5423_v43 }
 0x294   :  { %v1437_v5 = vsel %vm364_vm2, %v1435_v6, %v1436_v23  ;;  %v1439_v40 = vsel %vm364_vm2, %v1436_v23, %v1438_v21  ;;  %v1441_v14 = vsel %vm364_vm2, %v1438_v21, %v1440_v18  ;;  %v1463_v16 = vmin.f32 %v5404_v30, %v1405_v22 }
 0x295   :  { %v1444_v49 = vsel %vm364_vm2, %v1442_v32, %v1443_v62  ;;  %v1446_v27 = vsel %vm364_vm2, %v1443_v62, %v1445_v36  ;;  %v1448_v24 = vsel %vm364_vm2, %v1445_v36, %v1447_v53  ;;  %v1455_v37 = vsel %vm393_vm5, 1e+09, %v1437_v5 }
 0x296   :  { %v1456_v59 = vsel %vm394_vm7, 1e+09, %v1439_v40  ;;  %v1457_v7 = vsel %vm395_vm6, 1e+09, %v1441_v14  ;;  %v1458_v9 = vsel %vm393_vm5, 1e+09, %v1444_v49  ;;  %v1465_v15 = vmin.f32 %v5407_v31, %v5433_v29 }
 0x297   :  { %v1459_v43 = vsel %vm394_vm7, 1e+09, %v1446_v27  ;;  %v1460_v48 = vsel %vm395_vm6, 1e+09, %v1448_v24  ;;  %v1464_v13 = vmin.f32 %v1366_v55, 1e+09  ;;  %v1466_v6 = vmin.f32 %v5411_v52, %v5436_v41 }
 0x298   :  { %v1467_v23 = vmin.f32 %v5416_v51, %v1406_v38  ;;  %v1468_v30 = vmin.f32 %v1371_v10, 1e+09  ;;  %v1469_v22 = vmin.f32 %v1427_v35, %v1455_v37  ;;  %v1470_v21 = vmin.f32 %v1428_v34, %v1456_v59 }
 0x299   :  { %v1471_v18 = vmin.f32 %v1429_v4, %v1457_v7  ;;  %v1472_v32 = vmin.f32 %v1430_v20, 1e+09  ;;  %v1473_v62 = vmin.f32 %v1431_v28, %v1458_v9  ;;  %v1474_v36 = vmin.f32 %v1432_v54, %v1459_v43 }
 0x29a   :  { %v1475_v53 = vmin.f32 %v1433_v8, %v1460_v48  ;;  %v1476_v58 = vmin.f32 %v1434_v33, 1e+09  ;;  %v1477_v55 = vmin.f32 %v1461_v50, %v1469_v22  ;;  %v1478_v5 = vmin.f32 %v1462_v0, %v1470_v21 }
 0x29b   :  { %v1479_v40 = vmin.f32 %v1463_v16, %v1471_v18  ;;  %v1480_v31 = vmin.f32 %v1464_v13, %v1472_v32  ;;  %v1481_v29 = vmin.f32 %v1465_v15, %v1473_v62  ;;  %v1482_v14 = vmin.f32 %v1466_v6, %v1474_v36 }
 0x29c   :  { %v1483_v52 = vmin.f32 %v1467_v23, %v1475_v53  ;;  %v1484_v41 = vmin.f32 %v1468_v30, %v1476_v58  ;;  %v1485_v51 = vadd.f32 %v1477_v55, %v4137_v60  ;;  %v1486_v3 = vadd.f32 %v1478_v5, %v4130_v56 }
 0x29d   :  { %v1487_v10 = vadd.f32 %v1479_v40, %v4139_v61  ;;  %v1488_v38 = vadd.f32 %v1480_v31, %v4132_v57  ;;  %v1489_v35 = vadd.f32 %v1481_v29, %v4137_v60  ;;  %v1490_v34 = vadd.f32 %v1482_v14, %v4130_v56 }
 0x29e   :  { %v1491_v4 = vadd.f32 %v1483_v52, %v4139_v61  ;;  %v1492_v20 = vadd.f32 %v1484_v41, %v4132_v57  ;;  %v5516_v28 = vmin.f32 %v5332_v63, %v1485_v51  ;;  %v5519_v54 = vmin.f32 %v5335_v17, %v1486_v3 }
 0x29f   :  { %v5522_v8 = vmin.f32 %v5338_v12, %v1487_v10  ;;  %v5525_v33 = vmin.f32 %v5341_v25, %v1488_v38  ;;  %v5528_v50 = vmin.f32 %v5344_v39, %v1489_v35  ;;  %v5531_v0 = vmin.f32 %v5347_v26, %v1490_v34 }
 0x2a0   :  { %v5534_v49 = vmin.f32 %v5350_v19, %v1491_v4  ;;  %v5537_v63 = vmin.f32 %v5353_v11, %v1492_v20  ;;  %v5541_v17 = vadd.f32 %v5516_v28, %v4137_v60  ;;  %v5545_v12 = vadd.f32 %v5519_v54, %v4130_v56 }
 0x2a1   :  { %v5549_v25 = vadd.f32 %v5522_v8, %v4139_v61  ;;  %v5553_v39 = vadd.f32 %v5525_v33, %v4132_v57  ;;  %v5557_v26 = vadd.f32 %v5528_v50, %v4137_v60  ;;  %v5561_v19 = vadd.f32 %v5531_v0, %v4130_v56 }
 0x2a2   :  { %v5565_v11 = vadd.f32 %v5534_v49, %v4139_v61  ;;  %v5569_v27 = vadd.f32 %v5537_v63, %v4132_v57  ;;  %v1515_v24 = vrot.slane %v5541_v17, 3  ;;  %v1516_v37 = vrot.slane %v5545_v12, 3 }
 0x2a3   :  { %v1518_v59 = vrot.slane %v5549_v25, 3  ;;  %v1520_v7 = vrot.slane %v5557_v26, 3  ;;  %v1537_v9 = vrot.slane %v5541_v17, 5  ;;  %v1521_v16 = vrot.slane %v5561_v19, 3 }
 0x2a4   :  { %v1523_v43 = vrot.slane %v5565_v11, 3  ;;  %v5579_v48 = vsel %vm285_vm12, 1e+09, %v1515_v24  ;;  %v1538_v13 = vrot.slane %v5545_v12, 5  ;;  %v5583_v15 = vsel %vm285_vm12, %v1515_v24, %v1516_v37 }
 0x2a5   :  { %v5588_v6 = vsel %vm285_vm12, %v1516_v37, %v1518_v59  ;;  %v5591_v23 = vsel %vm285_vm12, 1e+09, %v1520_v7  ;;  %v1540_v30 = vrot.slane %v5549_v25, 5  ;;  %v5595_v22 = vsel %vm285_vm12, %v1520_v7, %v1521_v16 }
 0x2a6   :  { %v5600_v21 = vsel %vm285_vm12, %v1521_v16, %v1523_v43  ;;  %v5603_v18 = vsel %vm303_vm13, %v1537_v9, %v1538_v13  ;;  %v1542_v32 = vrot.slane %v5553_v39, 5  ;;  %v1544_v36 = vrot.slane %v5557_v26, 5 }
 0x2a7   :  { %v5607_v62 = vsel %vm303_vm13, %v1538_v13, %v1540_v30  ;;  %v1545_v53 = vrot.slane %v5561_v19, 5  ;;  %v1547_v58 = vrot.slane %v5565_v11, 5  ;;  %v1549_v5 = vrot.slane %v5569_v27, 5 }
 0x2a8   :  { %v1543_v55 = vsel %vm303_vm13, %v1540_v30, %v1542_v32  ;;  %v1559_v40 = vrot.slane %v5541_v17, 7  ;;  %v1560_v31 = vrot.slane %v5545_v12, 7  ;;  %v1562_v41 = vrot.slane %v5549_v25, 7 }
 0x2a9   :  { %v5617_v29 = vsel %vm303_vm13, %v1544_v36, %v1545_v53  ;;  %v5620_v14 = vsel %vm303_vm13, %v1545_v53, %v1547_v58  ;;  %v1557_v52 = vsel %vm320_vm14, %v1543_v55, 1e+09  ;;  %v1550_v51 = vsel %vm303_vm13, %v1547_v58, %v1549_v5 }
 0x2aa   :  { %v1561_v3 = vsel %vm273_vm11, %v1559_v40, %v1560_v31  ;;  %v1564_v10 = vrot.slane %v5557_v26, 7  ;;  %v1565_v38 = vrot.slane %v5561_v19, 7  ;;  %v1558_v35 = vsel %vm320_vm14, %v1550_v51, 1e+09 }
 0x2ab   :  { %v1563_v34 = vsel %vm273_vm11, %v1560_v31, %v1562_v41  ;;  %v1567_v4 = vrot.slane %v5565_v11, 7  ;;  %v1577_v20 = vsel %vm273_vm11, 1e+09, %v1559_v40  ;;  %v1580_v9 = vsel %vm355_vm1, 1e+09, %v1561_v3 }
 0x2ac   :  { %v1566_v24 = vsel %vm273_vm11, %v1564_v10, %v1565_v38  ;;  %v1578_v37 = vsel %vm273_vm11, 1e+09, %v1564_v10  ;;  %v1579_v7 = vsel %vm354_vm15, 1e+09, %v1577_v20  ;;  %v1581_v13 = vsel %vm356_vm4, 1e+09, %v1563_v34 }
 0x2ad   :  { %v1568_v16 = vsel %vm273_vm11, %v1565_v38, %v1567_v4  ;;  %v1582_v30 = vsel %vm357_vm3, 1e+09, %v1562_v41  ;;  %v1583_v32 = vsel %vm354_vm15, 1e+09, %v1578_v37  ;;  %v1584_v36 = vsel %vm355_vm1, 1e+09, %v1566_v24 }
 0x2ae   :  { %v1585_v53 = vsel %vm356_vm4, 1e+09, %v1568_v16  ;;  %v1586_v58 = vsel %vm357_vm3, 1e+09, %v1567_v4  ;;  %v1613_v55 = vmin.f32 %v5579_v48, %v5603_v18  ;;  %v1587_v5 = vrot.slane %v5541_v17, 1 }
 0x2af   :  { %v1588_v40 = vrot.slane %v5545_v12, 1  ;;  %v1590_v31 = vrot.slane %v5549_v25, 1  ;;  %v1592_v41 = vrot.slane %v5553_v39, 1  ;;  %v1594_v51 = vrot.slane %v5557_v26, 1 }
 0x2b0   :  { %v1595_v3 = vrot.slane %v5561_v19, 1  ;;  %v1597_v10 = vrot.slane %v5565_v11, 1  ;;  %v1599_v38 = vrot.slane %v5569_v27, 1  ;;  %v1614_v12 = vmin.f32 %v5583_v15, %v5607_v62 }
 0x2b1   :  { %v1589_v34 = vsel %vm364_vm2, %v1587_v5, %v1588_v40  ;;  %v1591_v48 = vsel %vm364_vm2, %v1588_v40, %v1590_v31  ;;  %v1593_v17 = vsel %vm364_vm2, %v1590_v31, %v1592_v41  ;;  %v1615_v15 = vmin.f32 %v5588_v6, %v1557_v52 }
 0x2b2   :  { %v1596_v18 = vsel %vm364_vm2, %v1594_v51, %v1595_v3  ;;  %v1598_v39 = vsel %vm364_vm2, %v1595_v3, %v1597_v10  ;;  %v1600_v26 = vsel %vm364_vm2, %v1597_v10, %v1599_v38  ;;  %v1607_v19 = vsel %vm393_vm5, 1e+09, %v1589_v34 }
 0x2b3   :  { %v1608_v27 = vsel %vm394_vm7, 1e+09, %v1591_v48  ;;  %v1609_v4 = vsel %vm395_vm6, 1e+09, %v1593_v17  ;;  %v1610_v20 = vsel %vm393_vm5, 1e+09, %v1596_v18  ;;  %v1617_v16 = vmin.f32 %v5591_v23, %v5617_v29 }
 0x2b4   :  { %v1611_v62 = vsel %vm394_vm7, 1e+09, %v1598_v39  ;;  %v1612_v24 = vsel %vm395_vm6, 1e+09, %v1600_v26  ;;  %v1616_v37 = vmin.f32 %v1518_v59, 1e+09  ;;  %v1618_v5 = vmin.f32 %v5595_v22, %v5620_v14 }
 0x2b5   :  { %v1619_v40 = vmin.f32 %v5600_v21, %v1558_v35  ;;  %v1620_v6 = vmin.f32 %v1523_v43, 1e+09  ;;  %v1621_v52 = vmin.f32 %v1579_v7, %v1607_v19  ;;  %v1622_v31 = vmin.f32 %v1580_v9, %v1608_v27 }
 0x2b6   :  { %v1623_v41 = vmin.f32 %v1581_v13, %v1609_v4  ;;  %v1624_v51 = vmin.f32 %v1582_v30, 1e+09  ;;  %v1625_v3 = vmin.f32 %v1583_v32, %v1610_v20  ;;  %v1626_v10 = vmin.f32 %v1584_v36, %v1611_v62 }
 0x2b7   :  { %v1627_v38 = vmin.f32 %v1585_v53, %v1612_v24  ;;  %v1628_v25 = vmin.f32 %v1586_v58, 1e+09  ;;  %v1629_v59 = vmin.f32 %v1613_v55, %v1621_v52  ;;  %v1630_v34 = vmin.f32 %v1614_v12, %v1622_v31 }
 0x2b8   :  { %v1631_v48 = vmin.f32 %v1615_v15, %v1623_v41  ;;  %v1632_v23 = vmin.f32 %v1616_v37, %v1624_v51  ;;  %v1633_v29 = vmin.f32 %v1617_v16, %v1625_v3  ;;  %v1634_v17 = vmin.f32 %v1618_v5, %v1626_v10 }
 0x2b9   :  { %v1635_v22 = vmin.f32 %v1619_v40, %v1627_v38  ;;  %v1636_v14 = vmin.f32 %v1620_v6, %v1628_v25  ;;  %v1637_v21 = vadd.f32 %v1629_v59, %v4137_v60  ;;  %v1638_v11 = vadd.f32 %v1630_v34, %v4130_v56 }
 0x2ba   :  { %v1639_v43 = vadd.f32 %v1631_v48, %v4139_v61  ;;  %v1640_v35 = vadd.f32 %v1632_v23, %v4132_v57  ;;  %v1641_v7 = vadd.f32 %v1633_v29, %v4137_v60  ;;  %v1642_v9 = vadd.f32 %v1634_v17, %v4130_v56 }
 0x2bb   :  { %v1643_v13 = vadd.f32 %v1635_v22, %v4139_v61  ;;  %v1644_v30 = vadd.f32 %v1636_v14, %v4132_v57  ;;  %v5700_v32 = vmin.f32 %v5516_v28, %v1637_v21  ;;  %v5703_v36 = vmin.f32 %v5519_v54, %v1638_v11 }
 0x2bc   :  { %v5706_v53 = vmin.f32 %v5522_v8, %v1639_v43  ;;  %v5709_v58 = vmin.f32 %v5525_v33, %v1640_v35  ;;  %v5712_v55 = vmin.f32 %v5528_v50, %v1641_v7  ;;  %v5715_v12 = vmin.f32 %v5531_v0, %v1642_v9 }
 0x2bd   :  { %v5718_v18 = vmin.f32 %v5534_v49, %v1643_v13  ;;  %v5721_v28 = vmin.f32 %v5537_v63, %v1644_v30  ;;  %v5725_v54 = vadd.f32 %v5700_v32, %v4137_v60  ;;  %v5729_v8 = vadd.f32 %v5703_v36, %v4130_v56 }
 0x2be   :  { %v5733_v33 = vadd.f32 %v5706_v53, %v4139_v61  ;;  %v5737_v50 = vadd.f32 %v5709_v58, %v4132_v57  ;;  %v5741_v0 = vadd.f32 %v5712_v55, %v4137_v60  ;;  %v5745_v49 = vadd.f32 %v5715_v12, %v4130_v56 }
 0x2bf   :  { %v5749_v63 = vadd.f32 %v5718_v18, %v4139_v61  ;;  %v5753_v39 = vadd.f32 %v5721_v28, %v4132_v57  ;;  %v1667_v26 = vrot.slane %v5725_v54, 3  ;;  %v1668_v19 = vrot.slane %v5729_v8, 3 }
 0x2c0   :  { %v1670_v27 = vrot.slane %v5733_v33, 3  ;;  %v1672_v4 = vrot.slane %v5741_v0, 3  ;;  %v1689_v20 = vrot.slane %v5725_v54, 5  ;;  %v1673_v15 = vrot.slane %v5745_v49, 3 }
 0x2c1   :  { %v1675_v62 = vrot.slane %v5749_v63, 3  ;;  %v5763_v24 = vsel %vm285_vm12, 1e+09, %v1667_v26  ;;  %v1690_v37 = vrot.slane %v5729_v8, 5  ;;  %v5767_v16 = vsel %vm285_vm12, %v1667_v26, %v1668_v19 }
 0x2c2   :  { %v5772_v5 = vsel %vm285_vm12, %v1668_v19, %v1670_v27  ;;  %v5775_v40 = vsel %vm285_vm12, 1e+09, %v1672_v4  ;;  %v1692_v6 = vrot.slane %v5733_v33, 5  ;;  %v5779_v52 = vsel %vm285_vm12, %v1672_v4, %v1673_v15 }
 0x2c3   :  { %v5784_v31 = vsel %vm285_vm12, %v1673_v15, %v1675_v62  ;;  %v5787_v41 = vsel %vm303_vm13, %v1689_v20, %v1690_v37  ;;  %v1694_v51 = vrot.slane %v5737_v50, 5  ;;  %v1696_v10 = vrot.slane %v5741_v0, 5 }
 0x2c4   :  { %v5791_v3 = vsel %vm303_vm13, %v1690_v37, %v1692_v6  ;;  %v1697_v38 = vrot.slane %v5745_v49, 5  ;;  %v1699_v25 = vrot.slane %v5749_v63, 5  ;;  %v1701_v34 = vrot.slane %v5753_v39, 5 }
 0x2c5   :  { %v1695_v59 = vsel %vm303_vm13, %v1692_v6, %v1694_v51  ;;  %v1711_v48 = vrot.slane %v5725_v54, 7  ;;  %v1712_v23 = vrot.slane %v5729_v8, 7  ;;  %v1714_v14 = vrot.slane %v5733_v33, 7 }
 0x2c6   :  { %v5801_v29 = vsel %vm303_vm13, %v1696_v10, %v1697_v38  ;;  %v5804_v17 = vsel %vm303_vm13, %v1697_v38, %v1699_v25  ;;  %v1709_v22 = vsel %vm320_vm14, %v1695_v59, 1e+09  ;;  %v1702_v21 = vsel %vm303_vm13, %v1699_v25, %v1701_v34 }
 0x2c7   :  { %v1713_v11 = vsel %vm273_vm11, %v1711_v48, %v1712_v23  ;;  %v1716_v43 = vrot.slane %v5741_v0, 7  ;;  %v1717_v35 = vrot.slane %v5745_v49, 7  ;;  %v1710_v7 = vsel %vm320_vm14, %v1702_v21, 1e+09 }
 0x2c8   :  { %v1715_v9 = vsel %vm273_vm11, %v1712_v23, %v1714_v14  ;;  %v1719_v13 = vrot.slane %v5749_v63, 7  ;;  %v1729_v30 = vsel %vm273_vm11, 1e+09, %v1711_v48  ;;  %v1732_v20 = vsel %vm355_vm1, 1e+09, %v1713_v11 }
 0x2c9   :  { %v1718_v26 = vsel %vm273_vm11, %v1716_v43, %v1717_v35  ;;  %v1730_v19 = vsel %vm273_vm11, 1e+09, %v1716_v43  ;;  %v1731_v4 = vsel %vm354_vm15, 1e+09, %v1729_v30  ;;  %v1733_v37 = vsel %vm356_vm4, 1e+09, %v1715_v9 }
 0x2ca   :  { %v1720_v15 = vsel %vm273_vm11, %v1717_v35, %v1719_v13  ;;  %v1734_v6 = vsel %vm357_vm3, 1e+09, %v1714_v14  ;;  %v1735_v51 = vsel %vm354_vm15, 1e+09, %v1730_v19  ;;  %v1736_v10 = vsel %vm355_vm1, 1e+09, %v1718_v26 }
 0x2cb   :  { %v1737_v38 = vsel %vm356_vm4, 1e+09, %v1720_v15  ;;  %v1738_v25 = vsel %vm357_vm3, 1e+09, %v1719_v13  ;;  %v1765_v59 = vmin.f32 %v5763_v24, %v5787_v41  ;;  %v1739_v34 = vrot.slane %v5725_v54, 1 }
 0x2cc   :  { %v1740_v48 = vrot.slane %v5729_v8, 1  ;;  %v1742_v23 = vrot.slane %v5733_v33, 1  ;;  %v1744_v14 = vrot.slane %v5737_v50, 1  ;;  %v1746_v21 = vrot.slane %v5741_v0, 1 }
 0x2cd   :  { %v1747_v11 = vrot.slane %v5745_v49, 1  ;;  %v1749_v43 = vrot.slane %v5749_v63, 1  ;;  %v1751_v35 = vrot.slane %v5753_v39, 1  ;;  %v1766_v8 = vmin.f32 %v5767_v16, %v5791_v3 }
 0x2ce   :  { %v1741_v9 = vsel %vm364_vm2, %v1739_v34, %v1740_v48  ;;  %v1743_v24 = vsel %vm364_vm2, %v1740_v48, %v1742_v23  ;;  %v1745_v54 = vsel %vm364_vm2, %v1742_v23, %v1744_v14  ;;  %v1767_v16 = vmin.f32 %v5772_v5, %v1709_v22 }
 0x2cf   :  { %v1748_v41 = vsel %vm364_vm2, %v1746_v21, %v1747_v11  ;;  %v1750_v50 = vsel %vm364_vm2, %v1747_v11, %v1749_v43  ;;  %v1752_v0 = vsel %vm364_vm2, %v1749_v43, %v1751_v35  ;;  %v1759_v49 = vsel %vm393_vm5, 1e+09, %v1741_v9 }
 0x2d0   :  { %v1760_v39 = vsel %vm394_vm7, 1e+09, %v1743_v24  ;;  %v1761_v13 = vsel %vm395_vm6, 1e+09, %v1745_v54  ;;  %v1762_v30 = vsel %vm393_vm5, 1e+09, %v1748_v41  ;;  %v1769_v15 = vmin.f32 %v5775_v40, %v5801_v29 }
 0x2d1   :  { %v1763_v3 = vsel %vm394_vm7, 1e+09, %v1750_v50  ;;  %v1764_v26 = vsel %vm395_vm6, 1e+09, %v1752_v0  ;;  %v1768_v19 = vmin.f32 %v1670_v27, 1e+09  ;;  %v1770_v34 = vmin.f32 %v5779_v52, %v5804_v17 }
 0x2d2   :  { %v1771_v48 = vmin.f32 %v5784_v31, %v1710_v7  ;;  %v1772_v5 = vmin.f32 %v1675_v62, 1e+09  ;;  %v1773_v22 = vmin.f32 %v1731_v4, %v1759_v49  ;;  %v1774_v23 = vmin.f32 %v1732_v20, %v1760_v39 }
 0x2d3   :  { %v1775_v14 = vmin.f32 %v1733_v37, %v1761_v13  ;;  %v1776_v21 = vmin.f32 %v1734_v6, 1e+09  ;;  %v1777_v11 = vmin.f32 %v1735_v51, %v1762_v30  ;;  %v1778_v43 = vmin.f32 %v1736_v10, %v1763_v3 }
 0x2d4   :  { %v1779_v35 = vmin.f32 %v1737_v38, %v1764_v26  ;;  %v1780_v33 = vmin.f32 %v1738_v25, 1e+09  ;;  %v1781_v27 = vmin.f32 %v1765_v59, %v1773_v22  ;;  %v1782_v9 = vmin.f32 %v1766_v8, %v1774_v23 }
 0x2d5   :  { %v1783_v24 = vmin.f32 %v1767_v16, %v1775_v14  ;;  %v1784_v40 = vmin.f32 %v1768_v19, %v1776_v21  ;;  %v1785_v29 = vmin.f32 %v1769_v15, %v1777_v11  ;;  %v1786_v54 = vmin.f32 %v1770_v34, %v1778_v43 }
 0x2d6   :  { %v1787_v52 = vmin.f32 %v1771_v48, %v1779_v35  ;;  %v1788_v17 = vmin.f32 %v1772_v5, %v1780_v33  ;;  %v1789_v31 = vadd.f32 %v1781_v27, %v4137_v60  ;;  %v1790_v63 = vadd.f32 %v1782_v9, %v4130_v56 }
 0x2d7   :  { %v1791_v62 = vadd.f32 %v1783_v24, %v4139_v61  ;;  %v1792_v7 = vadd.f32 %v1784_v40, %v4132_v57  ;;  %v1793_v4 = vadd.f32 %v1785_v29, %v4137_v60  ;;  %v1794_v20 = vadd.f32 %v1786_v54, %v4130_v56 }
 0x2d8   :  { %v1795_v37 = vadd.f32 %v1787_v52, %v4139_v61  ;;  %v1796_v6 = vadd.f32 %v1788_v17, %v4132_v57  ;;  %v5884_v51 = vmin.f32 %v5700_v32, %v1789_v31  ;;  %v5887_v10 = vmin.f32 %v5703_v36, %v1790_v63 }
 0x2d9   :  { %v5890_v38 = vmin.f32 %v5706_v53, %v1791_v62  ;;  %v5893_v25 = vmin.f32 %v5709_v58, %v1792_v7  ;;  %v5896_v59 = vmin.f32 %v5712_v55, %v1793_v4  ;;  %v5899_v8 = vmin.f32 %v5715_v12, %v1794_v20 }
 0x2da   :  { %v5902_v41 = vmin.f32 %v5718_v18, %v1795_v37  ;;  %v5905_v32 = vmin.f32 %v5721_v28, %v1796_v6  ;;  %v5909_v36 = vadd.f32 %v5884_v51, %v4137_v60  ;;  %v5913_v53 = vadd.f32 %v5887_v10, %v4130_v56 }
 0x2db   :  { %v5917_v58 = vadd.f32 %v5890_v38, %v4139_v61  ;;  %v5921_v55 = vadd.f32 %v5893_v25, %v4132_v57  ;;  %v5925_v12 = vadd.f32 %v5896_v59, %v4137_v60  ;;  %v5929_v18 = vadd.f32 %v5899_v8, %v4130_v56 }
 0x2dc   :  { %v5933_v28 = vadd.f32 %v5902_v41, %v4139_v61  ;;  %v5937_v50 = vadd.f32 %v5905_v32, %v4132_v57  ;;  %v1819_v0 = vrot.slane %v5909_v36, 3  ;;  %v1820_v49 = vrot.slane %v5913_v53, 3 }
 0x2dd   :  { %v1822_v39 = vrot.slane %v5917_v58, 3  ;;  %v1824_v13 = vrot.slane %v5925_v12, 3  ;;  %v1841_v30 = vrot.slane %v5909_v36, 5  ;;  %v1825_v16 = vrot.slane %v5929_v18, 3 }
 0x2de   :  { %v1827_v3 = vrot.slane %v5933_v28, 3  ;;  %v5947_v26 = vsel %vm285_vm12, 1e+09, %v1819_v0  ;;  %v1842_v19 = vrot.slane %v5913_v53, 5  ;;  %v5951_v15 = vsel %vm285_vm12, %v1819_v0, %v1820_v49 }
 0x2df   :  { %v5956_v34 = vsel %vm285_vm12, %v1820_v49, %v1822_v39  ;;  %v5959_v48 = vsel %vm285_vm12, 1e+09, %v1824_v13  ;;  %v1844_v5 = vrot.slane %v5917_v58, 5  ;;  %v5963_v22 = vsel %vm285_vm12, %v1824_v13, %v1825_v16 }
 0x2e0   :  { %v5968_v23 = vsel %vm285_vm12, %v1825_v16, %v1827_v3  ;;  %v5971_v14 = vsel %vm303_vm13, %v1841_v30, %v1842_v19  ;;  %v1846_v21 = vrot.slane %v5921_v55, 5  ;;  %v1848_v43 = vrot.slane %v5925_v12, 5 }
 0x2e1   :  { %v5975_v11 = vsel %vm303_vm13, %v1842_v19, %v1844_v5  ;;  %v1849_v35 = vrot.slane %v5929_v18, 5  ;;  %v1851_v33 = vrot.slane %v5933_v28, 5  ;;  %v1853_v9 = vrot.slane %v5937_v50, 5 }
 0x2e2   :  { %v1847_v27 = vsel %vm303_vm13, %v1844_v5, %v1846_v21  ;;  %v1863_v24 = vrot.slane %v5909_v36, 7  ;;  %v1864_v40 = vrot.slane %v5913_v53, 7  ;;  %v1866_v17 = vrot.slane %v5917_v58, 7 }
 0x2e3   :  { %v5985_v29 = vsel %vm303_vm13, %v1848_v43, %v1849_v35  ;;  %v5988_v54 = vsel %vm303_vm13, %v1849_v35, %v1851_v33  ;;  %v1861_v52 = vsel %vm320_vm14, %v1847_v27, 1e+09  ;;  %v1854_v31 = vsel %vm303_vm13, %v1851_v33, %v1853_v9 }
 0x2e4   :  { %v1865_v63 = vsel %vm273_vm11, %v1863_v24, %v1864_v40  ;;  %v1868_v62 = vrot.slane %v5925_v12, 7  ;;  %v1869_v7 = vrot.slane %v5929_v18, 7  ;;  %v1862_v4 = vsel %vm320_vm14, %v1854_v31, 1e+09 }
 0x2e5   :  { %v1867_v20 = vsel %vm273_vm11, %v1864_v40, %v1866_v17  ;;  %v1871_v37 = vrot.slane %v5933_v28, 7  ;;  %v1881_v6 = vsel %vm273_vm11, 1e+09, %v1863_v24  ;;  %v1884_v30 = vsel %vm355_vm1, 1e+09, %v1865_v63 }
 0x2e6   :  { %v1870_v0 = vsel %vm273_vm11, %v1868_v62, %v1869_v7  ;;  %v1882_v49 = vsel %vm273_vm11, 1e+09, %v1868_v62  ;;  %v1883_v13 = vsel %vm354_vm15, 1e+09, %v1881_v6  ;;  %v1885_v19 = vsel %vm356_vm4, 1e+09, %v1867_v20 }
 0x2e7   :  { %v1872_v16 = vsel %vm273_vm11, %v1869_v7, %v1871_v37  ;;  %v1886_v5 = vsel %vm357_vm3, 1e+09, %v1866_v17  ;;  %v1887_v21 = vsel %vm354_vm15, 1e+09, %v1882_v49  ;;  %v1888_v43 = vsel %vm355_vm1, 1e+09, %v1870_v0 }
 0x2e8   :  { %v1889_v35 = vsel %vm356_vm4, 1e+09, %v1872_v16  ;;  %v1890_v33 = vsel %vm357_vm3, 1e+09, %v1871_v37  ;;  %v1917_v27 = vmin.f32 %v5947_v26, %v5971_v14  ;;  %v1891_v9 = vrot.slane %v5909_v36, 1 }
 0x2e9   :  { %v1892_v24 = vrot.slane %v5913_v53, 1  ;;  %v1894_v40 = vrot.slane %v5917_v58, 1  ;;  %v1896_v17 = vrot.slane %v5921_v55, 1  ;;  %v1898_v31 = vrot.slane %v5925_v12, 1 }
 0x2ea   :  { %v1899_v63 = vrot.slane %v5929_v18, 1  ;;  %v1901_v62 = vrot.slane %v5933_v28, 1  ;;  %v1903_v7 = vrot.slane %v5937_v50, 1  ;;  %v1918_v53 = vmin.f32 %v5951_v15, %v5975_v11 }
 0x2eb   :  { %v1893_v20 = vsel %vm364_vm2, %v1891_v9, %v1892_v24  ;;  %v1895_v26 = vsel %vm364_vm2, %v1892_v24, %v1894_v40  ;;  %v1897_v36 = vsel %vm364_vm2, %v1894_v40, %v1896_v17  ;;  %v1919_v15 = vmin.f32 %v5956_v34, %v1861_v52 }
 0x2ec   :  { %v1900_v14 = vsel %vm364_vm2, %v1898_v31, %v1899_v63  ;;  %v1902_v55 = vsel %vm364_vm2, %v1899_v63, %v1901_v62  ;;  %v1904_v12 = vsel %vm364_vm2, %v1901_v62, %v1903_v7  ;;  %v1911_v18 = vsel %vm393_vm5, 1e+09, %v1893_v20 }
 0x2ed   :  { %v1912_v50 = vsel %vm394_vm7, 1e+09, %v1895_v26  ;;  %v1913_v37 = vsel %vm395_vm6, 1e+09, %v1897_v36  ;;  %v1914_v6 = vsel %vm393_vm5, 1e+09, %v1900_v14  ;;  %v1921_v16 = vmin.f32 %v5959_v48, %v5985_v29 }
 0x2ee   :  { %v1915_v11 = vsel %vm394_vm7, 1e+09, %v1902_v55  ;;  %v1916_v0 = vsel %vm395_vm6, 1e+09, %v1904_v12  ;;  %v1920_v49 = vmin.f32 %v1822_v39, 1e+09  ;;  %v1922_v9 = vmin.f32 %v5963_v22, %v5988_v54 }
 0x2ef   :  { %v1923_v24 = vmin.f32 %v5968_v23, %v1862_v4  ;;  %v1924_v34 = vmin.f32 %v1827_v3, 1e+09  ;;  %v1925_v52 = vmin.f32 %v1883_v13, %v1911_v18  ;;  %v1926_v40 = vmin.f32 %v1884_v30, %v1912_v50 }
 0x2f0   :  { %v1927_v17 = vmin.f32 %v1885_v19, %v1913_v37  ;;  %v1928_v31 = vmin.f32 %v1886_v5, 1e+09  ;;  %v1929_v63 = vmin.f32 %v1887_v21, %v1914_v6  ;;  %v1930_v62 = vmin.f32 %v1888_v43, %v1915_v11 }
 0x2f1   :  { %v1931_v7 = vmin.f32 %v1889_v35, %v1916_v0  ;;  %v1932_v58 = vmin.f32 %v1890_v33, 1e+09  ;;  %v1933_v39 = vmin.f32 %v1917_v27, %v1925_v52  ;;  %v1934_v20 = vmin.f32 %v1918_v53, %v1926_v40 }
 0x2f2   :  { %v1935_v26 = vmin.f32 %v1919_v15, %v1927_v17  ;;  %v1936_v48 = vmin.f32 %v1920_v49, %v1928_v31  ;;  %v1937_v29 = vmin.f32 %v1921_v16, %v1929_v63  ;;  %v1938_v36 = vmin.f32 %v1922_v9, %v1930_v62 }
 0x2f3   :  { %v1939_v22 = vmin.f32 %v1923_v24, %v1931_v7  ;;  %v1940_v54 = vmin.f32 %v1924_v34, %v1932_v58  ;;  %v1941_v23 = vadd.f32 %v1933_v39, %v4137_v60  ;;  %v1942_v28 = vadd.f32 %v1934_v20, %v4130_v56 }
 0x2f4   :  { %v1943_v3 = vadd.f32 %v1935_v26, %v4139_v61  ;;  %v1944_v4 = vadd.f32 %v1936_v48, %v4132_v57  ;;  %v1945_v13 = vadd.f32 %v1937_v29, %v4137_v60  ;;  %v1946_v30 = vadd.f32 %v1938_v36, %v4130_v56 }
 0x2f5   :  { %v1947_v19 = vadd.f32 %v1939_v22, %v4139_v61  ;;  %v1948_v5 = vadd.f32 %v1940_v54, %v4132_v57  ;;  %v6068_v21 = vmin.f32 %v5884_v51, %v1941_v23  ;;  %v6071_v43 = vmin.f32 %v5887_v10, %v1942_v28 }
 0x2f6   :  { %v6074_v35 = vmin.f32 %v5890_v38, %v1943_v3  ;;  %v6077_v33 = vmin.f32 %v5893_v25, %v1944_v4  ;;  %v6080_v27 = vmin.f32 %v5896_v59, %v1945_v13  ;;  %v6083_v53 = vmin.f32 %v5899_v8, %v1946_v30 }
 0x2f7   :  { %v6086_v14 = vmin.f32 %v5902_v41, %v1947_v19  ;;  %v6089_v51 = vmin.f32 %v5905_v32, %v1948_v5  ;;  %v6093_v10 = vadd.f32 %v6068_v21, %v4137_v60  ;;  %v6097_v38 = vadd.f32 %v6071_v43, %v4130_v56 }
 0x2f8   :  { %v6101_v25 = vadd.f32 %v6074_v35, %v4139_v61  ;;  %v6105_v59 = vadd.f32 %v6077_v33, %v4132_v57  ;;  %v6109_v8 = vadd.f32 %v6080_v27, %v4137_v60  ;;  %v6113_v41 = vadd.f32 %v6083_v53, %v4130_v56 }
 0x2f9   :  { %v6117_v32 = vadd.f32 %v6086_v14, %v4139_v61  ;;  %v6121_v55 = vadd.f32 %v6089_v51, %v4132_v57  ;;  %v1971_v12 = vrot.slane %v6093_v10, 3  ;;  %v1972_v18 = vrot.slane %v6097_v38, 3 }
 0x2fa   :  { %v1974_v50 = vrot.slane %v6101_v25, 3  ;;  %v1976_v37 = vrot.slane %v6109_v8, 3  ;;  %v1993_v6 = vrot.slane %v6093_v10, 5  ;;  %v1977_v15 = vrot.slane %v6113_v41, 3 }
 0x2fb   :  { %v1979_v11 = vrot.slane %v6117_v32, 3  ;;  %v6131_v0 = vsel %vm285_vm12, 1e+09, %v1971_v12  ;;  %v1994_v49 = vrot.slane %v6097_v38, 5  ;;  %v6135_v16 = vsel %vm285_vm12, %v1971_v12, %v1972_v18 }
 0x2fc   :  { %v6140_v9 = vsel %vm285_vm12, %v1972_v18, %v1974_v50  ;;  %v6143_v24 = vsel %vm285_vm12, 1e+09, %v1976_v37  ;;  %v1996_v34 = vrot.slane %v6101_v25, 5  ;;  %v6147_v52 = vsel %vm285_vm12, %v1976_v37, %v1977_v15 }
 0x2fd   :  { %v6152_v40 = vsel %vm285_vm12, %v1977_v15, %v1979_v11  ;;  %v6155_v17 = vsel %vm303_vm13, %v1993_v6, %v1994_v49  ;;  %v1998_v31 = vrot.slane %v6105_v59, 5  ;;  %v2000_v62 = vrot.slane %v6109_v8, 5 }
 0x2fe   :  { %v6159_v63 = vsel %vm303_vm13, %v1994_v49, %v1996_v34  ;;  %v2001_v7 = vrot.slane %v6113_v41, 5  ;;  %v2003_v58 = vrot.slane %v6117_v32, 5  ;;  %v2005_v20 = vrot.slane %v6121_v55, 5 }
 0x2ff   :  { %v1999_v39 = vsel %vm303_vm13, %v1996_v34, %v1998_v31  ;;  %v2015_v26 = vrot.slane %v6093_v10, 7  ;;  %v2016_v48 = vrot.slane %v6097_v38, 7  ;;  %v2018_v54 = vrot.slane %v6101_v25, 7 }
 0x300   :  { %v6169_v29 = vsel %vm303_vm13, %v2000_v62, %v2001_v7  ;;  %v6172_v36 = vsel %vm303_vm13, %v2001_v7, %v2003_v58  ;;  %v2013_v22 = vsel %vm320_vm14, %v1999_v39, 1e+09  ;;  %v2006_v23 = vsel %vm303_vm13, %v2003_v58, %v2005_v20 }
 0x301   :  { %v2017_v28 = vsel %vm273_vm11, %v2015_v26, %v2016_v48  ;;  %v2020_v3 = vrot.slane %v6109_v8, 7  ;;  %v2021_v4 = vrot.slane %v6113_v41, 7  ;;  %v2014_v13 = vsel %vm320_vm14, %v2006_v23, 1e+09 }
 0x302   :  { %v2019_v30 = vsel %vm273_vm11, %v2016_v48, %v2018_v54  ;;  %v2023_v19 = vrot.slane %v6117_v32, 7  ;;  %v2033_v5 = vsel %vm273_vm11, 1e+09, %v2015_v26  ;;  %v2036_v6 = vsel %vm355_vm1, 1e+09, %v2017_v28 }
 0x303   :  { %v2022_v12 = vsel %vm273_vm11, %v2020_v3, %v2021_v4  ;;  %v2034_v18 = vsel %vm273_vm11, 1e+09, %v2020_v3  ;;  %v2035_v37 = vsel %vm354_vm15, 1e+09, %v2033_v5  ;;  %v2037_v49 = vsel %vm356_vm4, 1e+09, %v2019_v30 }
 0x304   :  { %v2024_v15 = vsel %vm273_vm11, %v2021_v4, %v2023_v19  ;;  %v2038_v34 = vsel %vm357_vm3, 1e+09, %v2018_v54  ;;  %v2039_v31 = vsel %vm354_vm15, 1e+09, %v2034_v18  ;;  %v2040_v62 = vsel %vm355_vm1, 1e+09, %v2022_v12 }
 0x305   :  { %v2041_v7 = vsel %vm356_vm4, 1e+09, %v2024_v15  ;;  %v2042_v58 = vsel %vm357_vm3, 1e+09, %v2023_v19  ;;  %v2069_v39 = vmin.f32 %v6131_v0, %v6155_v17  ;;  %v2043_v20 = vrot.slane %v6093_v10, 1 }
 0x306   :  { %v2044_v26 = vrot.slane %v6097_v38, 1  ;;  %v2046_v48 = vrot.slane %v6101_v25, 1  ;;  %v2048_v54 = vrot.slane %v6105_v59, 1  ;;  %v2050_v23 = vrot.slane %v6109_v8, 1 }
 0x307   :  { %v2051_v28 = vrot.slane %v6113_v41, 1  ;;  %v2053_v3 = vrot.slane %v6117_v32, 1  ;;  %v2055_v4 = vrot.slane %v6121_v55, 1  ;;  %v2070_v38 = vmin.f32 %v6135_v16, %v6159_v63 }
 0x308   :  { %v2045_v30 = vsel %vm364_vm2, %v2043_v20, %v2044_v26  ;;  %v2047_v0 = vsel %vm364_vm2, %v2044_v26, %v2046_v48  ;;  %v2049_v10 = vsel %vm364_vm2, %v2046_v48, %v2048_v54  ;;  %v2071_v16 = vmin.f32 %v6140_v9, %v2013_v22 }
 0x309   :  { %v2052_v17 = vsel %vm364_vm2, %v2050_v23, %v2051_v28  ;;  %v2054_v59 = vsel %vm364_vm2, %v2051_v28, %v2053_v3  ;;  %v2056_v8 = vsel %vm364_vm2, %v2053_v3, %v2055_v4  ;;  %v2063_v41 = vsel %vm393_vm5, 1e+09, %v2045_v30 }
 0x30a   :  { %v2064_v55 = vsel %vm394_vm7, 1e+09, %v2047_v0  ;;  %v2065_v19 = vsel %vm395_vm6, 1e+09, %v2049_v10  ;;  %v2066_v5 = vsel %vm393_vm5, 1e+09, %v2052_v17  ;;  %v2073_v15 = vmin.f32 %v6143_v24, %v6169_v29 }
 0x30b   :  { %v2067_v63 = vsel %vm394_vm7, 1e+09, %v2054_v59  ;;  %v2068_v12 = vsel %vm395_vm6, 1e+09, %v2056_v8  ;;  %v2072_v18 = vmin.f32 %v1974_v50, 1e+09  ;;  %v2074_v20 = vmin.f32 %v6147_v52, %v6172_v36 }
 0x30c   :  { %v2075_v26 = vmin.f32 %v6152_v40, %v2014_v13  ;;  %v2076_v9 = vmin.f32 %v1979_v11, 1e+09  ;;  %v2077_v22 = vmin.f32 %v2035_v37, %v2063_v41  ;;  %v2078_v48 = vmin.f32 %v2036_v6, %v2064_v55 }
 0x30d   :  { %v2079_v54 = vmin.f32 %v2037_v49, %v2065_v19  ;;  %v2080_v23 = vmin.f32 %v2038_v34, 1e+09  ;;  %v2081_v28 = vmin.f32 %v2039_v31, %v2066_v5  ;;  %v2082_v3 = vmin.f32 %v2040_v62, %v2067_v63 }
 0x30e   :  { %v2083_v4 = vmin.f32 %v2041_v7, %v2068_v12  ;;  %v2084_v25 = vmin.f32 %v2042_v58, 1e+09  ;;  %v2085_v50 = vmin.f32 %v2069_v39, %v2077_v22  ;;  %v2086_v30 = vmin.f32 %v2070_v38, %v2078_v48 }
 0x30f   :  { %v2087_v0 = vmin.f32 %v2071_v16, %v2079_v54  ;;  %v2088_v24 = vmin.f32 %v2072_v18, %v2080_v23  ;;  %v2089_v29 = vmin.f32 %v2073_v15, %v2081_v28  ;;  %v2090_v10 = vmin.f32 %v2074_v20, %v2082_v3 }
 0x310   :  { %v2091_v52 = vmin.f32 %v2075_v26, %v2083_v4  ;;  %v2092_v36 = vmin.f32 %v2076_v9, %v2084_v25  ;;  %v2093_v40 = vadd.f32 %v2085_v50, %v4137_v60  ;;  %v2094_v32 = vadd.f32 %v2086_v30, %v4130_v56 }
 0x311   :  { %v2095_v11 = vadd.f32 %v2087_v0, %v4139_v61  ;;  %v2096_v13 = vadd.f32 %v2088_v24, %v4132_v57  ;;  %v2097_v37 = vadd.f32 %v2089_v29, %v4137_v60  ;;  %v2098_v6 = vadd.f32 %v2090_v10, %v4130_v56 }
 0x312   :  { %v2099_v49 = vadd.f32 %v2091_v52, %v4139_v61  ;;  %v2100_v34 = vadd.f32 %v2092_v36, %v4132_v57  ;;  %v6252_v31 = vmin.f32 %v6068_v21, %v2093_v40  ;;  %v6255_v62 = vmin.f32 %v6071_v43, %v2094_v32 }
 0x313   :  { %v6258_v7 = vmin.f32 %v6074_v35, %v2095_v11  ;;  %v6261_v58 = vmin.f32 %v6077_v33, %v2096_v13  ;;  %v6264_v39 = vmin.f32 %v6080_v27, %v2097_v37  ;;  %v6267_v38 = vmin.f32 %v6083_v53, %v2098_v6 }
 0x314   :  { %v6270_v17 = vmin.f32 %v6086_v14, %v2099_v49  ;;  %v6273_v21 = vmin.f32 %v6089_v51, %v2100_v34  ;;  %v6277_v43 = vadd.f32 %v6252_v31, %v4137_v60  ;;  %v6281_v35 = vadd.f32 %v6255_v62, %v4130_v56 }
 0x315   :  { %v6285_v33 = vadd.f32 %v6258_v7, %v4139_v61  ;;  %v6289_v27 = vadd.f32 %v6261_v58, %v4132_v57  ;;  %v6293_v53 = vadd.f32 %v6264_v39, %v4137_v60  ;;  %v6297_v14 = vadd.f32 %v6267_v38, %v4130_v56 }
 0x316   :  { %v6301_v51 = vadd.f32 %v6270_v17, %v4139_v61  ;;  %v6305_v59 = vadd.f32 %v6273_v21, %v4132_v57  ;;  %v2123_v8 = vrot.slane %v6277_v43, 3  ;;  %v2124_v41 = vrot.slane %v6281_v35, 3 }
 0x317   :  { %v2126_v55 = vrot.slane %v6285_v33, 3  ;;  %v2128_v19 = vrot.slane %v6293_v53, 3  ;;  %v2145_v5 = vrot.slane %v6277_v43, 5  ;;  %v2129_v16 = vrot.slane %v6297_v14, 3 }
 0x318   :  { %v2131_v63 = vrot.slane %v6301_v51, 3  ;;  %v6315_v12 = vsel %vm285_vm12, 1e+09, %v2123_v8  ;;  %v2146_v18 = vrot.slane %v6281_v35, 5  ;;  %v6319_v15 = vsel %vm285_vm12, %v2123_v8, %v2124_v41 }
 0x319   :  { %v6324_v20 = vsel %vm285_vm12, %v2124_v41, %v2126_v55  ;;  %v6327_v26 = vsel %vm285_vm12, 1e+09, %v2128_v19  ;;  %v2148_v9 = vrot.slane %v6285_v33, 5  ;;  %v6331_v22 = vsel %vm285_vm12, %v2128_v19, %v2129_v16 }
 0x31a   :  { %v6336_v48 = vsel %vm285_vm12, %v2129_v16, %v2131_v63  ;;  %v6339_v54 = vsel %vm303_vm13, %v2145_v5, %v2146_v18  ;;  %v2150_v23 = vrot.slane %v6289_v27, 5  ;;  %v2152_v3 = vrot.slane %v6293_v53, 5 }
 0x31b   :  { %v6343_v28 = vsel %vm303_vm13, %v2146_v18, %v2148_v9  ;;  %v2153_v4 = vrot.slane %v6297_v14, 5  ;;  %v2155_v25 = vrot.slane %v6301_v51, 5  ;;  %v2157_v30 = vrot.slane %v6305_v59, 5 }
 0x31c   :  { %v2151_v50 = vsel %vm303_vm13, %v2148_v9, %v2150_v23  ;;  %v2167_v0 = vrot.slane %v6277_v43, 7  ;;  %v2168_v24 = vrot.slane %v6281_v35, 7  ;;  %v2170_v36 = vrot.slane %v6285_v33, 7 }
 0x31d   :  { %v6353_v29 = vsel %vm303_vm13, %v2152_v3, %v2153_v4  ;;  %v6356_v10 = vsel %vm303_vm13, %v2153_v4, %v2155_v25  ;;  %v2165_v52 = vsel %vm320_vm14, %v2151_v50, 1e+09  ;;  %v2158_v40 = vsel %vm303_vm13, %v2155_v25, %v2157_v30 }
 0x31e   :  { %v2169_v32 = vsel %vm273_vm11, %v2167_v0, %v2168_v24  ;;  %v2172_v11 = vrot.slane %v6293_v53, 7  ;;  %v2173_v13 = vrot.slane %v6297_v14, 7  ;;  %v2166_v37 = vsel %vm320_vm14, %v2158_v40, 1e+09 }
 0x31f   :  { %v2171_v6 = vsel %vm273_vm11, %v2168_v24, %v2170_v36  ;;  %v2175_v49 = vrot.slane %v6301_v51, 7  ;;  %v2185_v34 = vsel %vm273_vm11, 1e+09, %v2167_v0  ;;  %v2188_v5 = vsel %vm355_vm1, 1e+09, %v2169_v32 }
 0x320   :  { %v2174_v8 = vsel %vm273_vm11, %v2172_v11, %v2173_v13  ;;  %v2186_v41 = vsel %vm273_vm11, 1e+09, %v2172_v11  ;;  %v2187_v19 = vsel %vm354_vm15, 1e+09, %v2185_v34  ;;  %v2189_v18 = vsel %vm356_vm4, 1e+09, %v2171_v6 }
 0x321   :  { %v2176_v16 = vsel %vm273_vm11, %v2173_v13, %v2175_v49  ;;  %v2190_v9 = vsel %vm357_vm3, 1e+09, %v2170_v36  ;;  %v2191_v23 = vsel %vm354_vm15, 1e+09, %v2186_v41  ;;  %v2192_v3 = vsel %vm355_vm1, 1e+09, %v2174_v8 }
 0x322   :  { %v2193_v4 = vsel %vm356_vm4, 1e+09, %v2176_v16  ;;  %v2194_v25 = vsel %vm357_vm3, 1e+09, %v2175_v49  ;;  %v2221_v50 = vmin.f32 %v6315_v12, %v6339_v54  ;;  %v2195_v30 = vrot.slane %v6277_v43, 1 }
 0x323   :  { %v2196_v0 = vrot.slane %v6281_v35, 1  ;;  %v2198_v24 = vrot.slane %v6285_v33, 1  ;;  %v2200_v36 = vrot.slane %v6289_v27, 1  ;;  %v2202_v40 = vrot.slane %v6293_v53, 1 }
 0x324   :  { %v2203_v32 = vrot.slane %v6297_v14, 1  ;;  %v2205_v11 = vrot.slane %v6301_v51, 1  ;;  %v2207_v13 = vrot.slane %v6305_v59, 1  ;;  %v2222_v35 = vmin.f32 %v6319_v15, %v6343_v28 }
 0x325   :  { %v2197_v6 = vsel %vm364_vm2, %v2195_v30, %v2196_v0  ;;  %v2199_v12 = vsel %vm364_vm2, %v2196_v0, %v2198_v24  ;;  %v2201_v43 = vsel %vm364_vm2, %v2198_v24, %v2200_v36  ;;  %v2223_v15 = vmin.f32 %v6324_v20, %v2165_v52 }
 0x326   :  { %v2204_v54 = vsel %vm364_vm2, %v2202_v40, %v2203_v32  ;;  %v2206_v27 = vsel %vm364_vm2, %v2203_v32, %v2205_v11  ;;  %v2208_v53 = vsel %vm364_vm2, %v2205_v11, %v2207_v13  ;;  %v2215_v14 = vsel %vm393_vm5, 1e+09, %v2197_v6 }
 0x327   :  { %v2216_v59 = vsel %vm394_vm7, 1e+09, %v2199_v12  ;;  %v2217_v49 = vsel %vm395_vm6, 1e+09, %v2201_v43  ;;  %v2218_v34 = vsel %vm393_vm5, 1e+09, %v2204_v54  ;;  %v2225_v16 = vmin.f32 %v6327_v26, %v6353_v29 }
 0x328   :  { %v2219_v28 = vsel %vm394_vm7, 1e+09, %v2206_v27  ;;  %v2220_v8 = vsel %vm395_vm6, 1e+09, %v2208_v53  ;;  %v2224_v41 = vmin.f32 %v2126_v55, 1e+09  ;;  %v2226_v30 = vmin.f32 %v6331_v22, %v6356_v10 }
 0x329   :  { %v2227_v0 = vmin.f32 %v6336_v48, %v2166_v37  ;;  %v2228_v20 = vmin.f32 %v2131_v63, 1e+09  ;;  %v2229_v52 = vmin.f32 %v2187_v19, %v2215_v14  ;;  %v2230_v24 = vmin.f32 %v2188_v5, %v2216_v59 }
 0x32a   :  { %v2231_v36 = vmin.f32 %v2189_v18, %v2217_v49  ;;  %v2232_v40 = vmin.f32 %v2190_v9, 1e+09  ;;  %v2233_v32 = vmin.f32 %v2191_v23, %v2218_v34  ;;  %v2234_v11 = vmin.f32 %v2192_v3, %v2219_v28 }
 0x32b   :  { %v2235_v13 = vmin.f32 %v2193_v4, %v2220_v8  ;;  %v2236_v33 = vmin.f32 %v2194_v25, 1e+09  ;;  %v2237_v55 = vmin.f32 %v2221_v50, %v2229_v52  ;;  %v2238_v6 = vmin.f32 %v2222_v35, %v2230_v24 }
 0x32c   :  { %v2239_v12 = vmin.f32 %v2223_v15, %v2231_v36  ;;  %v2240_v26 = vmin.f32 %v2224_v41, %v2232_v40  ;;  %v2241_v29 = vmin.f32 %v2225_v16, %v2233_v32  ;;  %v2242_v43 = vmin.f32 %v2226_v30, %v2234_v11 }
 0x32d   :  { %v2243_v22 = vmin.f32 %v2227_v0, %v2235_v13  ;;  %v2244_v10 = vmin.f32 %v2228_v20, %v2236_v33  ;;  %v2245_v48 = vadd.f32 %v2237_v55, %v4137_v60  ;;  %v2246_v51 = vadd.f32 %v2238_v6, %v4130_v56 }
 0x32e   :  { %v2247_v63 = vadd.f32 %v2239_v12, %v4139_v61  ;;  %v2248_v37 = vadd.f32 %v2240_v26, %v4132_v57  ;;  %v2249_v19 = vadd.f32 %v2241_v29, %v4137_v60  ;;  %v2250_v5 = vadd.f32 %v2242_v43, %v4130_v56 }
 0x32f   :  { %v2251_v18 = vadd.f32 %v2243_v22, %v4139_v61  ;;  %v2252_v9 = vadd.f32 %v2244_v10, %v4132_v57  ;;  %v6436_v23 = vmin.f32 %v6252_v31, %v2245_v48  ;;  %v6439_v3 = vmin.f32 %v6255_v62, %v2246_v51 }
 0x330   :  { %v6442_v4 = vmin.f32 %v6258_v7, %v2247_v63  ;;  %v6445_v25 = vmin.f32 %v6261_v58, %v2248_v37  ;;  %v6448_v50 = vmin.f32 %v6264_v39, %v2249_v19  ;;  %v6451_v35 = vmin.f32 %v6267_v38, %v2250_v5 }
 0x331   :  { %v6454_v54 = vmin.f32 %v6270_v17, %v2251_v18  ;;  %v6457_v31 = vmin.f32 %v6273_v21, %v2252_v9  ;;  %v6461_v62 = vadd.f32 %v6436_v23, %v4137_v60  ;;  %v6465_v7 = vadd.f32 %v6439_v3, %v4130_v56 }
 0x332   :  { %v6469_v58 = vadd.f32 %v6442_v4, %v4139_v61  ;;  %v6473_v39 = vadd.f32 %v6445_v25, %v4132_v57  ;;  %v6477_v38 = vadd.f32 %v6448_v50, %v4137_v60  ;;  %v6481_v17 = vadd.f32 %v6451_v35, %v4130_v56 }
 0x333   :  { %v6485_v21 = vadd.f32 %v6454_v54, %v4139_v61  ;;  %v6489_v27 = vadd.f32 %v6457_v31, %v4132_v57  ;;  %v2275_v53 = vrot.slane %v6461_v62, 3  ;;  %v2276_v14 = vrot.slane %v6465_v7, 3 }
 0x334   :  { %v2278_v59 = vrot.slane %v6469_v58, 3  ;;  %v2280_v49 = vrot.slane %v6477_v38, 3  ;;  %v2297_v34 = vrot.slane %v6461_v62, 5  ;;  %v2281_v15 = vrot.slane %v6481_v17, 3 }
 0x335   :  { %v2283_v28 = vrot.slane %v6485_v21, 3  ;;  %v6499_v8 = vsel %vm285_vm12, 1e+09, %v2275_v53  ;;  %v2298_v41 = vrot.slane %v6465_v7, 5  ;;  %v6503_v16 = vsel %vm285_vm12, %v2275_v53, %v2276_v14 }
 0x336   :  { %v6508_v30 = vsel %vm285_vm12, %v2276_v14, %v2278_v59  ;;  %v6511_v0 = vsel %vm285_vm12, 1e+09, %v2280_v49  ;;  %v2300_v20 = vrot.slane %v6469_v58, 5  ;;  %v6515_v52 = vsel %vm285_vm12, %v2280_v49, %v2281_v15 }
 0x337   :  { %v6520_v24 = vsel %vm285_vm12, %v2281_v15, %v2283_v28  ;;  %v6523_v36 = vsel %vm303_vm13, %v2297_v34, %v2298_v41  ;;  %v2302_v40 = vrot.slane %v6473_v39, 5  ;;  %v2304_v11 = vrot.slane %v6477_v38, 5 }
 0x338   :  { %v6527_v32 = vsel %vm303_vm13, %v2298_v41, %v2300_v20  ;;  %v2305_v13 = vrot.slane %v6481_v17, 5  ;;  %v2307_v33 = vrot.slane %v6485_v21, 5  ;;  %v2309_v6 = vrot.slane %v6489_v27, 5 }
 0x339   :  { %v2303_v55 = vsel %vm303_vm13, %v2300_v20, %v2302_v40  ;;  %v2319_v12 = vrot.slane %v6461_v62, 7  ;;  %v2320_v26 = vrot.slane %v6465_v7, 7  ;;  %v2322_v10 = vrot.slane %v6469_v58, 7 }
 0x33a   :  { %v6537_v29 = vsel %vm303_vm13, %v2304_v11, %v2305_v13  ;;  %v6540_v43 = vsel %vm303_vm13, %v2305_v13, %v2307_v33  ;;  %v2317_v22 = vsel %vm320_vm14, %v2303_v55, 1e+09  ;;  %v2310_v48 = vsel %vm303_vm13, %v2307_v33, %v2309_v6 }
 0x33b   :  { %v2321_v51 = vsel %vm273_vm11, %v2319_v12, %v2320_v26  ;;  %v2324_v63 = vrot.slane %v6477_v38, 7  ;;  %v2325_v37 = vrot.slane %v6481_v17, 7  ;;  %v2318_v19 = vsel %vm320_vm14, %v2310_v48, 1e+09 }
 0x33c   :  { %v2323_v5 = vsel %vm273_vm11, %v2320_v26, %v2322_v10  ;;  %v2327_v18 = vrot.slane %v6485_v21, 7  ;;  %v2337_v9 = vsel %vm273_vm11, 1e+09, %v2319_v12  ;;  %v2340_v34 = vsel %vm355_vm1, 1e+09, %v2321_v51 }
 0x33d   :  { %v2326_v53 = vsel %vm273_vm11, %v2324_v63, %v2325_v37  ;;  %v2338_v14 = vsel %vm273_vm11, 1e+09, %v2324_v63  ;;  %v2339_v49 = vsel %vm354_vm15, 1e+09, %v2337_v9  ;;  %v2341_v41 = vsel %vm356_vm4, 1e+09, %v2323_v5 }
 0x33e   :  { %v2328_v15 = vsel %vm273_vm11, %v2325_v37, %v2327_v18  ;;  %v2342_v20 = vsel %vm357_vm3, 1e+09, %v2322_v10  ;;  %v2343_v40 = vsel %vm354_vm15, 1e+09, %v2338_v14  ;;  %v2344_v11 = vsel %vm355_vm1, 1e+09, %v2326_v53 }
 0x33f   :  { %v2345_v13 = vsel %vm356_vm4, 1e+09, %v2328_v15  ;;  %v2346_v33 = vsel %vm357_vm3, 1e+09, %v2327_v18  ;;  %v2373_v55 = vmin.f32 %v6499_v8, %v6523_v36  ;;  %v2347_v6 = vrot.slane %v6461_v62, 1 }
 0x340   :  { %v2348_v12 = vrot.slane %v6465_v7, 1  ;;  %v2350_v26 = vrot.slane %v6469_v58, 1  ;;  %v2352_v10 = vrot.slane %v6473_v39, 1  ;;  %v2354_v48 = vrot.slane %v6477_v38, 1 }
 0x341   :  { %v2355_v51 = vrot.slane %v6481_v17, 1  ;;  %v2357_v63 = vrot.slane %v6485_v21, 1  ;;  %v2359_v37 = vrot.slane %v6489_v27, 1  ;;  %v2374_v7 = vmin.f32 %v6503_v16, %v6527_v32 }
 0x342   :  { %v2349_v5 = vsel %vm364_vm2, %v2347_v6, %v2348_v12  ;;  %v2351_v8 = vsel %vm364_vm2, %v2348_v12, %v2350_v26  ;;  %v2353_v62 = vsel %vm364_vm2, %v2350_v26, %v2352_v10  ;;  %v2375_v16 = vmin.f32 %v6508_v30, %v2317_v22 }
 0x343   :  { %v2356_v36 = vsel %vm364_vm2, %v2354_v48, %v2355_v51  ;;  %v2358_v39 = vsel %vm364_vm2, %v2355_v51, %v2357_v63  ;;  %v2360_v38 = vsel %vm364_vm2, %v2357_v63, %v2359_v37  ;;  %v2367_v17 = vsel %vm393_vm5, 1e+09, %v2349_v5 }
 0x344   :  { %v2368_v27 = vsel %vm394_vm7, 1e+09, %v2351_v8  ;;  %v2369_v18 = vsel %vm395_vm6, 1e+09, %v2353_v62  ;;  %v2370_v9 = vsel %vm393_vm5, 1e+09, %v2356_v36  ;;  %v2377_v15 = vmin.f32 %v6511_v0, %v6537_v29 }
 0x345   :  { %v2371_v32 = vsel %vm394_vm7, 1e+09, %v2358_v39  ;;  %v2372_v53 = vsel %vm395_vm6, 1e+09, %v2360_v38  ;;  %v2376_v14 = vmin.f32 %v2278_v59, 1e+09  ;;  %v2378_v6 = vmin.f32 %v6515_v52, %v6540_v43 }
 0x346   :  { %v2379_v12 = vmin.f32 %v6520_v24, %v2318_v19  ;;  %v2380_v30 = vmin.f32 %v2283_v28, 1e+09  ;;  %v2381_v22 = vmin.f32 %v2339_v49, %v2367_v17  ;;  %v2382_v26 = vmin.f32 %v2340_v34, %v2368_v27 }
 0x347   :  { %v2383_v10 = vmin.f32 %v2341_v41, %v2369_v18  ;;  %v2384_v48 = vmin.f32 %v2342_v20, 1e+09  ;;  %v2385_v51 = vmin.f32 %v2343_v40, %v2370_v9  ;;  %v2386_v63 = vmin.f32 %v2344_v11, %v2371_v32 }
 0x348   :  { %v2387_v37 = vmin.f32 %v2345_v13, %v2372_v53  ;;  %v2388_v58 = vmin.f32 %v2346_v33, 1e+09  ;;  %v2389_v59 = vmin.f32 %v2373_v55, %v2381_v22  ;;  %v2390_v5 = vmin.f32 %v2374_v7, %v2382_v26 }
 0x349   :  { %v2391_v8 = vmin.f32 %v2375_v16, %v2383_v10  ;;  %v2392_v0 = vmin.f32 %v2376_v14, %v2384_v48  ;;  %v2393_v29 = vmin.f32 %v2377_v15, %v2385_v51  ;;  %v2394_v62 = vmin.f32 %v2378_v6, %v2386_v63 }
 0x34a   :  { %v2395_v52 = vmin.f32 %v2379_v12, %v2387_v37  ;;  %v2396_v43 = vmin.f32 %v2380_v30, %v2388_v58  ;;  %v2397_v24 = vadd.f32 %v2389_v59, %v4137_v60  ;;  %v2398_v21 = vadd.f32 %v2390_v5, %v4130_v56 }
 0x34b   :  { %v2399_v28 = vadd.f32 %v2391_v8, %v4139_v61  ;;  %v2400_v19 = vadd.f32 %v2392_v0, %v4132_v57  ;;  %v2401_v49 = vadd.f32 %v2393_v29, %v4137_v60  ;;  %v2402_v34 = vadd.f32 %v2394_v62, %v4130_v56 }
 0x34c   :  { %v2403_v41 = vadd.f32 %v2395_v52, %v4139_v61  ;;  %v2404_v20 = vadd.f32 %v2396_v43, %v4132_v57  ;;  %v6620_v40 = vmin.f32 %v6436_v23, %v2397_v24  ;;  %v6623_v11 = vmin.f32 %v6439_v3, %v2398_v21 }
 0x34d   :  { %v6626_v13 = vmin.f32 %v6442_v4, %v2399_v28  ;;  %v6629_v33 = vmin.f32 %v6445_v25, %v2400_v19  ;;  %v6632_v55 = vmin.f32 %v6448_v50, %v2401_v49  ;;  %v6635_v7 = vmin.f32 %v6451_v35, %v2402_v34 }
 0x34e   :  { %v6638_v36 = vmin.f32 %v6454_v54, %v2403_v41  ;;  %v6641_v23 = vmin.f32 %v6457_v31, %v2404_v20  ;;  %v6645_v3 = vadd.f32 %v6620_v40, %v4137_v60  ;;  %v6649_v4 = vadd.f32 %v6623_v11, %v4130_v56 }
 0x34f   :  { %v6653_v25 = vadd.f32 %v6626_v13, %v4139_v61  ;;  %v6657_v50 = vadd.f32 %v6629_v33, %v4132_v57  ;;  %v6661_v35 = vadd.f32 %v6632_v55, %v4137_v60  ;;  %v6665_v54 = vadd.f32 %v6635_v7, %v4130_v56 }
 0x350   :  { %v6669_v31 = vadd.f32 %v6638_v36, %v4139_v61  ;;  %v6673_v39 = vadd.f32 %v6641_v23, %v4132_v57  ;;  %v2427_v38 = vrot.slane %v6645_v3, 3  ;;  %v2428_v17 = vrot.slane %v6649_v4, 3 }
 0x351   :  { %v2430_v27 = vrot.slane %v6653_v25, 3  ;;  %v2432_v18 = vrot.slane %v6661_v35, 3  ;;  %v2449_v9 = vrot.slane %v6645_v3, 5  ;;  %v2433_v16 = vrot.slane %v6665_v54, 3 }
 0x352   :  { %v2435_v32 = vrot.slane %v6669_v31, 3  ;;  %v6683_v53 = vsel %vm285_vm12, 1e+09, %v2427_v38  ;;  %v2450_v14 = vrot.slane %v6649_v4, 5  ;;  %v6687_v15 = vsel %vm285_vm12, %v2427_v38, %v2428_v17 }
 0x353   :  { %v6692_v6 = vsel %vm285_vm12, %v2428_v17, %v2430_v27  ;;  %v6695_v12 = vsel %vm285_vm12, 1e+09, %v2432_v18  ;;  %v2452_v30 = vrot.slane %v6653_v25, 5  ;;  %v6699_v22 = vsel %vm285_vm12, %v2432_v18, %v2433_v16 }
 0x354   :  { %v6704_v26 = vsel %vm285_vm12, %v2433_v16, %v2435_v32  ;;  %v6707_v10 = vsel %vm303_vm13, %v2449_v9, %v2450_v14  ;;  %v2454_v48 = vrot.slane %v6657_v50, 5  ;;  %v2456_v63 = vrot.slane %v6661_v35, 5 }
 0x355   :  { %v6711_v51 = vsel %vm303_vm13, %v2450_v14, %v2452_v30  ;;  %v2457_v37 = vrot.slane %v6665_v54, 5  ;;  %v2459_v58 = vrot.slane %v6669_v31, 5  ;;  %v2461_v5 = vrot.slane %v6673_v39, 5 }
 0x356   :  { %v2455_v59 = vsel %vm303_vm13, %v2452_v30, %v2454_v48  ;;  %v2471_v8 = vrot.slane %v6645_v3, 7  ;;  %v2472_v0 = vrot.slane %v6649_v4, 7  ;;  %v2474_v43 = vrot.slane %v6653_v25, 7 }
 0x357   :  { %v6721_v29 = vsel %vm303_vm13, %v2456_v63, %v2457_v37  ;;  %v6724_v62 = vsel %vm303_vm13, %v2457_v37, %v2459_v58  ;;  %v2469_v52 = vsel %vm320_vm14, %v2455_v59, 1e+09  ;;  %v2462_v24 = vsel %vm303_vm13, %v2459_v58, %v2461_v5 }
 0x358   :  { %v2473_v21 = vsel %vm273_vm11, %v2471_v8, %v2472_v0  ;;  %v2476_v28 = vrot.slane %v6661_v35, 7  ;;  %v2477_v19 = vrot.slane %v6665_v54, 7  ;;  %v2470_v49 = vsel %vm320_vm14, %v2462_v24, 1e+09 }
 0x359   :  { %v2475_v34 = vsel %vm273_vm11, %v2472_v0, %v2474_v43  ;;  %v2479_v41 = vrot.slane %v6669_v31, 7  ;;  %v2489_v20 = vsel %vm273_vm11, 1e+09, %v2471_v8  ;;  %v2492_v9 = vsel %vm355_vm1, 1e+09, %v2473_v21 }
 0x35a   :  { %v2478_v38 = vsel %vm273_vm11, %v2476_v28, %v2477_v19  ;;  %v2490_v17 = vsel %vm273_vm11, 1e+09, %v2476_v28  ;;  %v2491_v18 = vsel %vm354_vm15, 1e+09, %v2489_v20  ;;  %v2493_v14 = vsel %vm356_vm4, 1e+09, %v2475_v34 }
 0x35b   :  { %v2480_v16 = vsel %vm273_vm11, %v2477_v19, %v2479_v41  ;;  %v2494_v30 = vsel %vm357_vm3, 1e+09, %v2474_v43  ;;  %v2495_v48 = vsel %vm354_vm15, 1e+09, %v2490_v17  ;;  %v2496_v63 = vsel %vm355_vm1, 1e+09, %v2478_v38 }
 0x35c   :  { %v2497_v37 = vsel %vm356_vm4, 1e+09, %v2480_v16  ;;  %v2498_v58 = vsel %vm357_vm3, 1e+09, %v2479_v41  ;;  %v2525_v59 = vmin.f32 %v6683_v53, %v6707_v10  ;;  %v2499_v5 = vrot.slane %v6645_v3, 1 }
 0x35d   :  { %v2500_v8 = vrot.slane %v6649_v4, 1  ;;  %v2502_v0 = vrot.slane %v6653_v25, 1  ;;  %v2504_v43 = vrot.slane %v6657_v50, 1  ;;  %v2506_v24 = vrot.slane %v6661_v35, 1 }
 0x35e   :  { %v2507_v21 = vrot.slane %v6665_v54, 1  ;;  %v2509_v28 = vrot.slane %v6669_v31, 1  ;;  %v2511_v19 = vrot.slane %v6673_v39, 1  ;;  %v2526_v4 = vmin.f32 %v6687_v15, %v6711_v51 }
 0x35f   :  { %v2501_v34 = vsel %vm364_vm2, %v2499_v5, %v2500_v8  ;;  %v2503_v53 = vsel %vm364_vm2, %v2500_v8, %v2502_v0  ;;  %v2505_v3 = vsel %vm364_vm2, %v2502_v0, %v2504_v43  ;;  %v2527_v15 = vmin.f32 %v6692_v6, %v2469_v52 }
 0x360   :  { %v2508_v10 = vsel %vm364_vm2, %v2506_v24, %v2507_v21  ;;  %v2510_v50 = vsel %vm364_vm2, %v2507_v21, %v2509_v28  ;;  %v2512_v35 = vsel %vm364_vm2, %v2509_v28, %v2511_v19  ;;  %v2519_v54 = vsel %vm393_vm5, 1e+09, %v2501_v34 }
 0x361   :  { %v2520_v39 = vsel %vm394_vm7, 1e+09, %v2503_v53  ;;  %v2521_v41 = vsel %vm395_vm6, 1e+09, %v2505_v3  ;;  %v2522_v20 = vsel %vm393_vm5, 1e+09, %v2508_v10  ;;  %v2529_v16 = vmin.f32 %v6695_v12, %v6721_v29 }
 0x362   :  { %v2523_v51 = vsel %vm394_vm7, 1e+09, %v2510_v50  ;;  %v2524_v38 = vsel %vm395_vm6, 1e+09, %v2512_v35  ;;  %v2528_v17 = vmin.f32 %v2430_v27, 1e+09  ;;  %v2530_v5 = vmin.f32 %v6699_v22, %v6724_v62 }
 0x363   :  { %v2531_v8 = vmin.f32 %v6704_v26, %v2470_v49  ;;  %v2532_v6 = vmin.f32 %v2435_v32, 1e+09  ;;  %v2533_v52 = vmin.f32 %v2491_v18, %v2519_v54  ;;  %v2534_v0 = vmin.f32 %v2492_v9, %v2520_v39 }
 0x364   :  { %v2535_v43 = vmin.f32 %v2493_v14, %v2521_v41  ;;  %v2536_v24 = vmin.f32 %v2494_v30, 1e+09  ;;  %v2537_v21 = vmin.f32 %v2495_v48, %v2522_v20  ;;  %v2538_v28 = vmin.f32 %v2496_v63, %v2523_v51 }
 0x365   :  { %v2539_v19 = vmin.f32 %v2497_v37, %v2524_v38  ;;  %v2540_v25 = vmin.f32 %v2498_v58, 1e+09  ;;  %v2541_v27 = vmin.f32 %v2525_v59, %v2533_v52  ;;  %v2542_v34 = vmin.f32 %v2526_v4, %v2534_v0 }
 0x366   :  { %v2543_v53 = vmin.f32 %v2527_v15, %v2535_v43  ;;  %v2544_v12 = vmin.f32 %v2528_v17, %v2536_v24  ;;  %v2545_v29 = vmin.f32 %v2529_v16, %v2537_v21  ;;  %v2546_v3 = vmin.f32 %v2530_v5, %v2538_v28 }
 0x367   :  { %v2547_v22 = vmin.f32 %v2531_v8, %v2539_v19  ;;  %v2548_v62 = vmin.f32 %v2532_v6, %v2540_v25  ;;  %v2549_v26 = vadd.f32 %v2541_v27, %v4137_v60  ;;  %v2550_v31 = vadd.f32 %v2542_v34, %v4130_v56 }
 0x368   :  { %v2551_v32 = vadd.f32 %v2543_v53, %v4139_v61  ;;  %v2552_v49 = vadd.f32 %v2544_v12, %v4132_v57  ;;  %v2553_v18 = vadd.f32 %v2545_v29, %v4137_v60  ;;  %v2554_v9 = vadd.f32 %v2546_v3, %v4130_v56 }
 0x369   :  { %v2555_v14 = vadd.f32 %v2547_v22, %v4139_v61  ;;  %v2556_v30 = vadd.f32 %v2548_v62, %v4132_v57  ;;  %v6804_v48 = vmin.f32 %v6620_v40, %v2549_v26  ;;  %v6807_v63 = vmin.f32 %v6623_v11, %v2550_v31 }
 0x36a   :  { %v6810_v37 = vmin.f32 %v6626_v13, %v2551_v32  ;;  %v6813_v58 = vmin.f32 %v6629_v33, %v2552_v49  ;;  %v6816_v59 = vmin.f32 %v6632_v55, %v2553_v18  ;;  %v6819_v4 = vmin.f32 %v6635_v7, %v2554_v9 }
 0x36b   :  { %v6822_v10 = vmin.f32 %v6638_v36, %v2555_v14  ;;  %v6825_v40 = vmin.f32 %v6641_v23, %v2556_v30  ;;  %v6829_v11 = vadd.f32 %v6804_v48, %v4137_v60  ;;  %v6833_v13 = vadd.f32 %v6807_v63, %v4130_v56 }
 0x36c   :  { %v6837_v33 = vadd.f32 %v6810_v37, %v4139_v61  ;;  %v6841_v55 = vadd.f32 %v6813_v58, %v4132_v57  ;;  %v6845_v7 = vadd.f32 %v6816_v59, %v4137_v60  ;;  %v6849_v36 = vadd.f32 %v6819_v4, %v4130_v56 }
 0x36d   :  { %v6853_v23 = vadd.f32 %v6822_v10, %v4139_v61  ;;  %v6857_v50 = vadd.f32 %v6825_v40, %v4132_v57  ;;  %v2579_v35 = vrot.slane %v6829_v11, 3  ;;  %v2580_v54 = vrot.slane %v6833_v13, 3 }
 0x36e   :  { %v2582_v39 = vrot.slane %v6837_v33, 3  ;;  %v2584_v41 = vrot.slane %v6845_v7, 3  ;;  %v2601_v20 = vrot.slane %v6829_v11, 5  ;;  %v2585_v15 = vrot.slane %v6849_v36, 3 }
 0x36f   :  { %v2587_v51 = vrot.slane %v6853_v23, 3  ;;  %v6867_v38 = vsel %vm285_vm12, 1e+09, %v2579_v35  ;;  %v2602_v17 = vrot.slane %v6833_v13, 5  ;;  %v6871_v16 = vsel %vm285_vm12, %v2579_v35, %v2580_v54 }
 0x370   :  { %v6876_v5 = vsel %vm285_vm12, %v2580_v54, %v2582_v39  ;;  %v6879_v8 = vsel %vm285_vm12, 1e+09, %v2584_v41  ;;  %v2604_v6 = vrot.slane %v6837_v33, 5  ;;  %v6883_v52 = vsel %vm285_vm12, %v2584_v41, %v2585_v15 }
 0x371   :  { %v6888_v0 = vsel %vm285_vm12, %v2585_v15, %v2587_v51  ;;  %v6891_v43 = vsel %vm303_vm13, %v2601_v20, %v2602_v17  ;;  %v2606_v24 = vrot.slane %v6841_v55, 5  ;;  %v2608_v28 = vrot.slane %v6845_v7, 5 }
 0x372   :  { %v6895_v21 = vsel %vm303_vm13, %v2602_v17, %v2604_v6  ;;  %v2609_v19 = vrot.slane %v6849_v36, 5  ;;  %v2611_v25 = vrot.slane %v6853_v23, 5  ;;  %v2613_v34 = vrot.slane %v6857_v50, 5 }
 0x373   :  { %v2607_v27 = vsel %vm303_vm13, %v2604_v6, %v2606_v24  ;;  %v2623_v53 = vrot.slane %v6829_v11, 7  ;;  %v2624_v12 = vrot.slane %v6833_v13, 7  ;;  %v2626_v62 = vrot.slane %v6837_v33, 7 }
 0x374   :  { %v6905_v29 = vsel %vm303_vm13, %v2608_v28, %v2609_v19  ;;  %v6908_v3 = vsel %vm303_vm13, %v2609_v19, %v2611_v25  ;;  %v2621_v22 = vsel %vm320_vm14, %v2607_v27, 1e+09  ;;  %v2614_v26 = vsel %vm303_vm13, %v2611_v25, %v2613_v34 }
 0x375   :  { %v2625_v31 = vsel %vm273_vm11, %v2623_v53, %v2624_v12  ;;  %v2628_v32 = vrot.slane %v6845_v7, 7  ;;  %v2629_v49 = vrot.slane %v6849_v36, 7  ;;  %v2622_v18 = vsel %vm320_vm14, %v2614_v26, 1e+09 }
 0x376   :  { %v2627_v9 = vsel %vm273_vm11, %v2624_v12, %v2626_v62  ;;  %v2631_v14 = vrot.slane %v6853_v23, 7  ;;  %v2641_v30 = vsel %vm273_vm11, 1e+09, %v2623_v53  ;;  %v2644_v20 = vsel %vm355_vm1, 1e+09, %v2625_v31 }
 0x377   :  { %v2630_v35 = vsel %vm273_vm11, %v2628_v32, %v2629_v49  ;;  %v2642_v54 = vsel %vm273_vm11, 1e+09, %v2628_v32  ;;  %v2643_v41 = vsel %vm354_vm15, 1e+09, %v2641_v30  ;;  %v2645_v17 = vsel %vm356_vm4, 1e+09, %v2627_v9 }
 0x378   :  { %v2632_v15 = vsel %vm273_vm11, %v2629_v49, %v2631_v14  ;;  %v2646_v6 = vsel %vm357_vm3, 1e+09, %v2626_v62  ;;  %v2647_v24 = vsel %vm354_vm15, 1e+09, %v2642_v54  ;;  %v2648_v28 = vsel %vm355_vm1, 1e+09, %v2630_v35 }
 0x379   :  { %v2649_v19 = vsel %vm356_vm4, 1e+09, %v2632_v15  ;;  %v2650_v25 = vsel %vm357_vm3, 1e+09, %v2631_v14  ;;  %v2677_v27 = vmin.f32 %v6867_v38, %v6891_v43  ;;  %v2651_v34 = vrot.slane %v6829_v11, 1 }
 0x37a   :  { %v2652_v53 = vrot.slane %v6833_v13, 1  ;;  %v2654_v12 = vrot.slane %v6837_v33, 1  ;;  %v2656_v62 = vrot.slane %v6841_v55, 1  ;;  %v2658_v26 = vrot.slane %v6845_v7, 1 }
 0x37b   :  { %v2659_v31 = vrot.slane %v6849_v36, 1  ;;  %v2661_v32 = vrot.slane %v6853_v23, 1  ;;  %v2663_v49 = vrot.slane %v6857_v50, 1  ;;  %v2678_v13 = vmin.f32 %v6871_v16, %v6895_v21 }
 0x37c   :  { %v2653_v9 = vsel %vm364_vm2, %v2651_v34, %v2652_v53  ;;  %v2655_v38 = vsel %vm364_vm2, %v2652_v53, %v2654_v12  ;;  %v2657_v11 = vsel %vm364_vm2, %v2654_v12, %v2656_v62  ;;  %v2679_v16 = vmin.f32 %v6876_v5, %v2621_v22 }
 0x37d   :  { %v2660_v43 = vsel %vm364_vm2, %v2658_v26, %v2659_v31  ;;  %v2662_v55 = vsel %vm364_vm2, %v2659_v31, %v2661_v32  ;;  %v2664_v7 = vsel %vm364_vm2, %v2661_v32, %v2663_v49  ;;  %v2671_v36 = vsel %vm393_vm5, 1e+09, %v2653_v9 }
 0x37e   :  { %v2672_v50 = vsel %vm394_vm7, 1e+09, %v2655_v38  ;;  %v2673_v14 = vsel %vm395_vm6, 1e+09, %v2657_v11  ;;  %v2674_v30 = vsel %vm393_vm5, 1e+09, %v2660_v43  ;;  %v2681_v15 = vmin.f32 %v6879_v8, %v6905_v29 }
 0x37f   :  { %v2675_v21 = vsel %vm394_vm7, 1e+09, %v2662_v55  ;;  %v2676_v35 = vsel %vm395_vm6, 1e+09, %v2664_v7  ;;  %v2680_v54 = vmin.f32 %v2582_v39, 1e+09  ;;  %v2682_v34 = vmin.f32 %v6883_v52, %v6908_v3 }
 0x380   :  { %v2683_v53 = vmin.f32 %v6888_v0, %v2622_v18  ;;  %v2684_v5 = vmin.f32 %v2587_v51, 1e+09  ;;  %v2685_v22 = vmin.f32 %v2643_v41, %v2671_v36  ;;  %v2686_v12 = vmin.f32 %v2644_v20, %v2672_v50 }
 0x381   :  { %v2687_v62 = vmin.f32 %v2645_v17, %v2673_v14  ;;  %v2688_v26 = vmin.f32 %v2646_v6, 1e+09  ;;  %v2689_v31 = vmin.f32 %v2647_v24, %v2674_v30  ;;  %v2690_v32 = vmin.f32 %v2648_v28, %v2675_v21 }
 0x382   :  { %v2691_v49 = vmin.f32 %v2649_v19, %v2676_v35  ;;  %v2692_v33 = vmin.f32 %v2650_v25, 1e+09  ;;  %v2693_v39 = vmin.f32 %v2677_v27, %v2685_v22  ;;  %v2694_v9 = vmin.f32 %v2678_v13, %v2686_v12 }
 0x383   :  { %v2695_v38 = vmin.f32 %v2679_v16, %v2687_v62  ;;  %v2696_v8 = vmin.f32 %v2680_v54, %v2688_v26  ;;  %v2697_v29 = vmin.f32 %v2681_v15, %v2689_v31  ;;  %v2698_v11 = vmin.f32 %v2682_v34, %v2690_v32 }
 0x384   :  { %v2699_v52 = vmin.f32 %v2683_v53, %v2691_v49  ;;  %v2700_v3 = vmin.f32 %v2684_v5, %v2692_v33  ;;  %v2701_v0 = vadd.f32 %v2693_v39, %v4137_v60  ;;  %v2702_v23 = vadd.f32 %v2694_v9, %v4130_v56 }
 0x385   :  { %v2703_v51 = vadd.f32 %v2695_v38, %v4139_v61  ;;  %v2704_v18 = vadd.f32 %v2696_v8, %v4132_v57  ;;  %v2705_v41 = vadd.f32 %v2697_v29, %v4137_v60  ;;  %v2706_v20 = vadd.f32 %v2698_v11, %v4130_v56 }
 0x386   :  { %v2707_v17 = vadd.f32 %v2699_v52, %v4139_v61  ;;  %v2708_v6 = vadd.f32 %v2700_v3, %v4132_v57  ;;  %v6988_v24 = vmin.f32 %v6804_v48, %v2701_v0  ;;  %v6991_v28 = vmin.f32 %v6807_v63, %v2702_v23 }
 0x387   :  { %v6994_v19 = vmin.f32 %v6810_v37, %v2703_v51  ;;  %v6997_v25 = vmin.f32 %v6813_v58, %v2704_v18  ;;  %v7000_v27 = vmin.f32 %v6816_v59, %v2705_v41  ;;  %v7003_v13 = vmin.f32 %v6819_v4, %v2706_v20 }
 0x388   :  { %v7006_v43 = vmin.f32 %v6822_v10, %v2707_v17  ;;  %v7009_v48 = vmin.f32 %v6825_v40, %v2708_v6  ;;  %v7013_v63 = vadd.f32 %v6988_v24, %v4137_v60  ;;  %v7017_v37 = vadd.f32 %v6991_v28, %v4130_v56 }
 0x389   :  { %v7021_v58 = vadd.f32 %v6994_v19, %v4139_v61  ;;  %v7025_v59 = vadd.f32 %v6997_v25, %v4132_v57  ;;  %v7029_v4 = vadd.f32 %v7000_v27, %v4137_v60  ;;  %v7033_v10 = vadd.f32 %v7003_v13, %v4130_v56 }
 0x38a   :  { %v7037_v40 = vadd.f32 %v7006_v43, %v4139_v61  ;;  %v7041_v55 = vadd.f32 %v7009_v48, %v4132_v57  ;;  %v2731_v7 = vrot.slane %v7013_v63, 3  ;;  %v2732_v36 = vrot.slane %v7017_v37, 3 }
 0x38b   :  { %v2734_v50 = vrot.slane %v7021_v58, 3  ;;  %v2736_v14 = vrot.slane %v7029_v4, 3  ;;  %v2753_v30 = vrot.slane %v7013_v63, 5  ;;  %v2737_v16 = vrot.slane %v7033_v10, 3 }
 0x38c   :  { %v2739_v21 = vrot.slane %v7037_v40, 3  ;;  %v7051_v35 = vsel %vm285_vm12, 1e+09, %v2731_v7  ;;  %v2754_v54 = vrot.slane %v7017_v37, 5  ;;  %v7055_v15 = vsel %vm285_vm12, %v2731_v7, %v2732_v36 }
 0x38d   :  { %v7060_v34 = vsel %vm285_vm12, %v2732_v36, %v2734_v50  ;;  %v7063_v53 = vsel %vm285_vm12, 1e+09, %v2736_v14  ;;  %v2756_v5 = vrot.slane %v7021_v58, 5  ;;  %v7067_v22 = vsel %vm285_vm12, %v2736_v14, %v2737_v16 }
 0x38e   :  { %v7072_v12 = vsel %vm285_vm12, %v2737_v16, %v2739_v21  ;;  %v7075_v62 = vsel %vm303_vm13, %v2753_v30, %v2754_v54  ;;  %v2758_v26 = vrot.slane %v7025_v59, 5  ;;  %v2760_v32 = vrot.slane %v7029_v4, 5 }
 0x38f   :  { %v7079_v31 = vsel %vm303_vm13, %v2754_v54, %v2756_v5  ;;  %v2761_v49 = vrot.slane %v7033_v10, 5  ;;  %v2763_v33 = vrot.slane %v7037_v40, 5  ;;  %v2765_v9 = vrot.slane %v7041_v55, 5 }
 0x390   :  { %v2759_v39 = vsel %vm303_vm13, %v2756_v5, %v2758_v26  ;;  %v2775_v38 = vrot.slane %v7013_v63, 7  ;;  %v2776_v8 = vrot.slane %v7017_v37, 7  ;;  %v2778_v3 = vrot.slane %v7021_v58, 7 }
 0x391   :  { %v7089_v29 = vsel %vm303_vm13, %v2760_v32, %v2761_v49  ;;  %v7092_v11 = vsel %vm303_vm13, %v2761_v49, %v2763_v33  ;;  %v2773_v52 = vsel %vm320_vm14, %v2759_v39, 1e+09  ;;  %v2766_v0 = vsel %vm303_vm13, %v2763_v33, %v2765_v9 }
 0x392   :  { %v2777_v23 = vsel %vm273_vm11, %v2775_v38, %v2776_v8  ;;  %v2780_v51 = vrot.slane %v7029_v4, 7  ;;  %v2781_v18 = vrot.slane %v7033_v10, 7  ;;  %v2774_v41 = vsel %vm320_vm14, %v2766_v0, 1e+09 }
 0x393   :  { %v2779_v20 = vsel %vm273_vm11, %v2776_v8, %v2778_v3  ;;  %v2783_v17 = vrot.slane %v7037_v40, 7  ;;  %v2793_v6 = vsel %vm273_vm11, 1e+09, %v2775_v38  ;;  %v2796_v30 = vsel %vm355_vm1, 1e+09, %v2777_v23 }
 0x394   :  { %v2782_v7 = vsel %vm273_vm11, %v2780_v51, %v2781_v18  ;;  %v2794_v36 = vsel %vm273_vm11, 1e+09, %v2780_v51  ;;  %v2795_v14 = vsel %vm354_vm15, 1e+09, %v2793_v6  ;;  %v2797_v54 = vsel %vm356_vm4, 1e+09, %v2779_v20 }
 0x395   :  { %v2784_v16 = vsel %vm273_vm11, %v2781_v18, %v2783_v17  ;;  %v2798_v5 = vsel %vm357_vm3, 1e+09, %v2778_v3  ;;  %v2799_v26 = vsel %vm354_vm15, 1e+09, %v2794_v36  ;;  %v2800_v32 = vsel %vm355_vm1, 1e+09, %v2782_v7 }
 0x396   :  { %v2801_v49 = vsel %vm356_vm4, 1e+09, %v2784_v16  ;;  %v2802_v33 = vsel %vm357_vm3, 1e+09, %v2783_v17  ;;  %v2829_v39 = vmin.f32 %v7051_v35, %v7075_v62  ;;  %v2803_v9 = vrot.slane %v7013_v63, 1 }
 0x397   :  { %v2804_v38 = vrot.slane %v7017_v37, 1  ;;  %v2806_v8 = vrot.slane %v7021_v58, 1  ;;  %v2808_v3 = vrot.slane %v7025_v59, 1  ;;  %v2810_v0 = vrot.slane %v7029_v4, 1 }
 0x398   :  { %v2811_v23 = vrot.slane %v7033_v10, 1  ;;  %v2813_v51 = vrot.slane %v7037_v40, 1  ;;  %v2815_v18 = vrot.slane %v7041_v55, 1  ;;  %v2830_v37 = vmin.f32 %v7055_v15, %v7079_v31 }
 0x399   :  { %v2805_v20 = vsel %vm364_vm2, %v2803_v9, %v2804_v38  ;;  %v2807_v35 = vsel %vm364_vm2, %v2804_v38, %v2806_v8  ;;  %v2809_v63 = vsel %vm364_vm2, %v2806_v8, %v2808_v3  ;;  %v2831_v15 = vmin.f32 %v7060_v34, %v2773_v52 }
 0x39a   :  { %v2812_v62 = vsel %vm364_vm2, %v2810_v0, %v2811_v23  ;;  %v2814_v59 = vsel %vm364_vm2, %v2811_v23, %v2813_v51  ;;  %v2816_v4 = vsel %vm364_vm2, %v2813_v51, %v2815_v18  ;;  %v2823_v10 = vsel %vm393_vm5, 1e+09, %v2805_v20 }
 0x39b   :  { %v2824_v55 = vsel %vm394_vm7, 1e+09, %v2807_v35  ;;  %v2825_v17 = vsel %vm395_vm6, 1e+09, %v2809_v63  ;;  %v2826_v6 = vsel %vm393_vm5, 1e+09, %v2812_v62  ;;  %v2833_v16 = vmin.f32 %v7063_v53, %v7089_v29 }
 0x39c   :  { %v2827_v31 = vsel %vm394_vm7, 1e+09, %v2814_v59  ;;  %v2828_v7 = vsel %vm395_vm6, 1e+09, %v2816_v4  ;;  %v2832_v36 = vmin.f32 %v2734_v50, 1e+09  ;;  %v2834_v9 = vmin.f32 %v7067_v22, %v7092_v11 }
 0x39d   :  { %v2835_v38 = vmin.f32 %v7072_v12, %v2774_v41  ;;  %v2836_v34 = vmin.f32 %v2739_v21, 1e+09  ;;  %v2837_v52 = vmin.f32 %v2795_v14, %v2823_v10  ;;  %v2838_v8 = vmin.f32 %v2796_v30, %v2824_v55 }
 0x39e   :  { %v2839_v3 = vmin.f32 %v2797_v54, %v2825_v17  ;;  %v2840_v0 = vmin.f32 %v2798_v5, 1e+09  ;;  %v2841_v23 = vmin.f32 %v2799_v26, %v2826_v6  ;;  %v2842_v51 = vmin.f32 %v2800_v32, %v2827_v31 }
 0x39f   :  { %v2843_v18 = vmin.f32 %v2801_v49, %v2828_v7  ;;  %v2844_v58 = vmin.f32 %v2802_v33, 1e+09  ;;  %v2845_v50 = vmin.f32 %v2829_v39, %v2837_v52  ;;  %v2846_v20 = vmin.f32 %v2830_v37, %v2838_v8 }
 0x3a0   :  { %v2847_v35 = vmin.f32 %v2831_v15, %v2839_v3  ;;  %v2848_v53 = vmin.f32 %v2832_v36, %v2840_v0  ;;  %v2849_v29 = vmin.f32 %v2833_v16, %v2841_v23  ;;  %v2850_v63 = vmin.f32 %v2834_v9, %v2842_v51 }
 0x3a1   :  { %v2851_v22 = vmin.f32 %v2835_v38, %v2843_v18  ;;  %v2852_v11 = vmin.f32 %v2836_v34, %v2844_v58  ;;  %v2853_v12 = vadd.f32 %v2845_v50, %v4137_v60  ;;  %v2854_v40 = vadd.f32 %v2846_v20, %v4130_v56 }
 0x3a2   :  { %v2855_v21 = vadd.f32 %v2847_v35, %v4139_v61  ;;  %v2856_v41 = vadd.f32 %v2848_v53, %v4132_v57  ;;  %v2857_v14 = vadd.f32 %v2849_v29, %v4137_v60  ;;  %v2858_v30 = vadd.f32 %v2850_v63, %v4130_v56 }
 0x3a3   :  { %v2859_v54 = vadd.f32 %v2851_v22, %v4139_v61  ;;  %v2860_v5 = vadd.f32 %v2852_v11, %v4132_v57  ;;  %v7172_v26 = vmin.f32 %v6988_v24, %v2853_v12  ;;  %v7175_v32 = vmin.f32 %v6991_v28, %v2854_v40 }
 0x3a4   :  { %v7178_v49 = vmin.f32 %v6994_v19, %v2855_v21  ;;  %v7181_v33 = vmin.f32 %v6997_v25, %v2856_v41  ;;  %v7184_v39 = vmin.f32 %v7000_v27, %v2857_v14  ;;  %v7187_v37 = vmin.f32 %v7003_v13, %v2858_v30 }
 0x3a5   :  { %v7190_v62 = vmin.f32 %v7006_v43, %v2859_v54  ;;  %v7193_v24 = vmin.f32 %v7009_v48, %v2860_v5  ;;  %v7197_v28 = vadd.f32 %v7172_v26, %v4137_v60  ;;  %v7201_v19 = vadd.f32 %v7175_v32, %v4130_v56 }
 0x3a6   :  { %v7205_v25 = vadd.f32 %v7178_v49, %v4139_v61  ;;  %v7209_v27 = vadd.f32 %v7181_v33, %v4132_v57  ;;  %v7213_v13 = vadd.f32 %v7184_v39, %v4137_v60  ;;  %v7217_v43 = vadd.f32 %v7187_v37, %v4130_v56 }
 0x3a7   :  { %v7221_v48 = vadd.f32 %v7190_v62, %v4139_v61  ;;  %v7225_v59 = vadd.f32 %v7193_v24, %v4132_v57  ;;  %v2883_v4 = vrot.slane %v7197_v28, 3  ;;  %v2884_v10 = vrot.slane %v7201_v19, 3 }
 0x3a8   :  { %v2886_v55 = vrot.slane %v7205_v25, 3  ;;  %v2888_v17 = vrot.slane %v7213_v13, 3  ;;  %v2905_v6 = vrot.slane %v7197_v28, 5  ;;  %v2889_v15 = vrot.slane %v7217_v43, 3 }
 0x3a9   :  { %v2891_v31 = vrot.slane %v7221_v48, 3  ;;  %v7235_v7 = vsel %vm285_vm12, 1e+09, %v2883_v4  ;;  %v2906_v36 = vrot.slane %v7201_v19, 5  ;;  %v7239_v16 = vsel %vm285_vm12, %v2883_v4, %v2884_v10 }
 0x3aa   :  { %v7244_v9 = vsel %vm285_vm12, %v2884_v10, %v2886_v55  ;;  %v7247_v38 = vsel %vm285_vm12, 1e+09, %v2888_v17  ;;  %v2908_v34 = vrot.slane %v7205_v25, 5  ;;  %v7251_v52 = vsel %vm285_vm12, %v2888_v17, %v2889_v15 }
 0x3ab   :  { %v7256_v8 = vsel %vm285_vm12, %v2889_v15, %v2891_v31  ;;  %v7259_v3 = vsel %vm303_vm13, %v2905_v6, %v2906_v36  ;;  %v2910_v0 = vrot.slane %v7209_v27, 5  ;;  %v2912_v51 = vrot.slane %v7213_v13, 5 }
 0x3ac   :  { %v7263_v23 = vsel %vm303_vm13, %v2906_v36, %v2908_v34  ;;  %v2913_v18 = vrot.slane %v7217_v43, 5  ;;  %v2915_v58 = vrot.slane %v7221_v48, 5  ;;  %v2917_v20 = vrot.slane %v7225_v59, 5 }
 0x3ad   :  { %v2911_v50 = vsel %vm303_vm13, %v2908_v34, %v2910_v0  ;;  %v2927_v35 = vrot.slane %v7197_v28, 7  ;;  %v2928_v53 = vrot.slane %v7201_v19, 7  ;;  %v2930_v11 = vrot.slane %v7205_v25, 7 }
 0x3ae   :  { %v7273_v29 = vsel %vm303_vm13, %v2912_v51, %v2913_v18  ;;  %v7276_v63 = vsel %vm303_vm13, %v2913_v18, %v2915_v58  ;;  %v2925_v22 = vsel %vm320_vm14, %v2911_v50, 1e+09  ;;  %v2918_v12 = vsel %vm303_vm13, %v2915_v58, %v2917_v20 }
 0x3af   :  { %v2929_v40 = vsel %vm273_vm11, %v2927_v35, %v2928_v53  ;;  %v2932_v21 = vrot.slane %v7213_v13, 7  ;;  %v2933_v41 = vrot.slane %v7217_v43, 7  ;;  %v2926_v14 = vsel %vm320_vm14, %v2918_v12, 1e+09 }
 0x3b0   :  { %v2931_v30 = vsel %vm273_vm11, %v2928_v53, %v2930_v11  ;;  %v2935_v54 = vrot.slane %v7221_v48, 7  ;;  %v2945_v5 = vsel %vm273_vm11, 1e+09, %v2927_v35  ;;  %v2948_v6 = vsel %vm355_vm1, 1e+09, %v2929_v40 }
 0x3b1   :  { %v2934_v4 = vsel %vm273_vm11, %v2932_v21, %v2933_v41  ;;  %v2946_v10 = vsel %vm273_vm11, 1e+09, %v2932_v21  ;;  %v2947_v17 = vsel %vm354_vm15, 1e+09, %v2945_v5  ;;  %v2949_v36 = vsel %vm356_vm4, 1e+09, %v2931_v30 }
 0x3b2   :  { %v2936_v15 = vsel %vm273_vm11, %v2933_v41, %v2935_v54  ;;  %v2950_v34 = vsel %vm357_vm3, 1e+09, %v2930_v11  ;;  %v2951_v0 = vsel %vm354_vm15, 1e+09, %v2946_v10  ;;  %v2952_v51 = vsel %vm355_vm1, 1e+09, %v2934_v4 }
 0x3b3   :  { %v2953_v18 = vsel %vm356_vm4, 1e+09, %v2936_v15  ;;  %v2954_v58 = vsel %vm357_vm3, 1e+09, %v2935_v54  ;;  %v2981_v50 = vmin.f32 %v7235_v7, %v7259_v3  ;;  %v2955_v20 = vrot.slane %v7197_v28, 1 }
 0x3b4   :  { %v2956_v35 = vrot.slane %v7201_v19, 1  ;;  %v2958_v53 = vrot.slane %v7205_v25, 1  ;;  %v2960_v11 = vrot.slane %v7209_v27, 1  ;;  %v2962_v12 = vrot.slane %v7213_v13, 1 }
 0x3b5   :  { %v2963_v40 = vrot.slane %v7217_v43, 1  ;;  %v2965_v21 = vrot.slane %v7221_v48, 1  ;;  %v2967_v41 = vrot.slane %v7225_v59, 1  ;;  %v2982_v19 = vmin.f32 %v7239_v16, %v7263_v23 }
 0x3b6   :  { %v2957_v30 = vsel %vm364_vm2, %v2955_v20, %v2956_v35  ;;  %v2959_v7 = vsel %vm364_vm2, %v2956_v35, %v2958_v53  ;;  %v2961_v28 = vsel %vm364_vm2, %v2958_v53, %v2960_v11  ;;  %v2983_v16 = vmin.f32 %v7244_v9, %v2925_v22 }
 0x3b7   :  { %v2964_v3 = vsel %vm364_vm2, %v2962_v12, %v2963_v40  ;;  %v2966_v27 = vsel %vm364_vm2, %v2963_v40, %v2965_v21  ;;  %v2968_v13 = vsel %vm364_vm2, %v2965_v21, %v2967_v41  ;;  %v2975_v43 = vsel %vm393_vm5, 1e+09, %v2957_v30 }
 0x3b8   :  { %v2976_v59 = vsel %vm394_vm7, 1e+09, %v2959_v7  ;;  %v2977_v54 = vsel %vm395_vm6, 1e+09, %v2961_v28  ;;  %v2978_v5 = vsel %vm393_vm5, 1e+09, %v2964_v3  ;;  %v2985_v15 = vmin.f32 %v7247_v38, %v7273_v29 }
 0x3b9   :  { %v2979_v23 = vsel %vm394_vm7, 1e+09, %v2966_v27  ;;  %v2980_v4 = vsel %vm395_vm6, 1e+09, %v2968_v13  ;;  %v2984_v10 = vmin.f32 %v2886_v55, 1e+09  ;;  %v2986_v20 = vmin.f32 %v7251_v52, %v7276_v63 }
 0x3ba   :  { %v2987_v35 = vmin.f32 %v7256_v8, %v2926_v14  ;;  %v2988_v9 = vmin.f32 %v2891_v31, 1e+09  ;;  %v2989_v22 = vmin.f32 %v2947_v17, %v2975_v43  ;;  %v2990_v53 = vmin.f32 %v2948_v6, %v2976_v59 }
 0x3bb   :  { %v2991_v11 = vmin.f32 %v2949_v36, %v2977_v54  ;;  %v2992_v12 = vmin.f32 %v2950_v34, 1e+09  ;;  %v2993_v40 = vmin.f32 %v2951_v0, %v2978_v5  ;;  %v2994_v21 = vmin.f32 %v2952_v51, %v2979_v23 }
 0x3bc   :  { %v2995_v41 = vmin.f32 %v2953_v18, %v2980_v4  ;;  %v2996_v25 = vmin.f32 %v2954_v58, 1e+09  ;;  %v2997_v55 = vmin.f32 %v2981_v50, %v2989_v22  ;;  %v2998_v30 = vmin.f32 %v2982_v19, %v2990_v53 }
 0x3bd   :  { %v2999_v7 = vmin.f32 %v2983_v16, %v2991_v11  ;;  %v3000_v38 = vmin.f32 %v2984_v10, %v2992_v12  ;;  %v3001_v29 = vmin.f32 %v2985_v15, %v2993_v40  ;;  %v3002_v28 = vmin.f32 %v2986_v20, %v2994_v21 }
 0x3be   :  { %v3003_v52 = vmin.f32 %v2987_v35, %v2995_v41  ;;  %v3004_v63 = vmin.f32 %v2988_v9, %v2996_v25  ;;  %v3005_v8 = vadd.f32 %v2997_v55, %v4137_v60  ;;  %v3006_v48 = vadd.f32 %v2998_v30, %v4130_v56 }
 0x3bf   :  { %v3007_v31 = vadd.f32 %v2999_v7, %v4139_v61  ;;  %v3008_v14 = vadd.f32 %v3000_v38, %v4132_v57  ;;  %v3009_v17 = vadd.f32 %v3001_v29, %v4137_v60  ;;  %v3010_v6 = vadd.f32 %v3002_v28, %v4130_v56 }
 0x3c0   :  { %v3011_v36 = vadd.f32 %v3003_v52, %v4139_v61  ;;  %v3012_v34 = vadd.f32 %v3004_v63, %v4132_v57  ;;  %v7356_v0 = vmin.f32 %v7172_v26, %v3005_v8  ;;  %v7359_v51 = vmin.f32 %v7175_v32, %v3006_v48 }
 0x3c1   :  { %v7362_v18 = vmin.f32 %v7178_v49, %v3007_v31  ;;  %v7365_v58 = vmin.f32 %v7181_v33, %v3008_v14  ;;  %v7368_v50 = vmin.f32 %v7184_v39, %v3009_v17  ;;  %v7371_v19 = vmin.f32 %v7187_v37, %v3010_v6 }
 0x3c2   :  { %v7374_v3 = vmin.f32 %v7190_v62, %v3011_v36  ;;  %v7377_v26 = vmin.f32 %v7193_v24, %v3012_v34  ;;  %v7381_v32 = vadd.f32 %v7356_v0, %v4137_v60  ;;  %v7385_v49 = vadd.f32 %v7359_v51, %v4130_v56 }
 0x3c3   :  { %v7389_v33 = vadd.f32 %v7362_v18, %v4139_v61  ;;  %v7393_v39 = vadd.f32 %v7365_v58, %v4132_v57  ;;  %v7397_v37 = vadd.f32 %v7368_v50, %v4137_v60  ;;  %v7401_v62 = vadd.f32 %v7371_v19, %v4130_v56 }
 0x3c4   :  { %v7405_v24 = vadd.f32 %v7374_v3, %v4139_v61  ;;  %v7409_v27 = vadd.f32 %v7377_v26, %v4132_v57  ;;  %v3035_v13 = vrot.slane %v7381_v32, 3  ;;  %v3036_v43 = vrot.slane %v7385_v49, 3 }
 0x3c5   :  { %v3038_v59 = vrot.slane %v7389_v33, 3  ;;  %v3040_v54 = vrot.slane %v7397_v37, 3  ;;  %v3057_v5 = vrot.slane %v7381_v32, 5  ;;  %v3041_v16 = vrot.slane %v7401_v62, 3 }
 0x3c6   :  { %v3043_v23 = vrot.slane %v7405_v24, 3  ;;  %v7419_v4 = vsel %vm285_vm12, 1e+09, %v3035_v13  ;;  %v3058_v10 = vrot.slane %v7385_v49, 5  ;;  %v7423_v15 = vsel %vm285_vm12, %v3035_v13, %v3036_v43 }
 0x3c7   :  { %v7428_v20 = vsel %vm285_vm12, %v3036_v43, %v3038_v59  ;;  %v7431_v35 = vsel %vm285_vm12, 1e+09, %v3040_v54  ;;  %v3060_v9 = vrot.slane %v7389_v33, 5  ;;  %v7435_v22 = vsel %vm285_vm12, %v3040_v54, %v3041_v16 }
 0x3c8   :  { %v7440_v53 = vsel %vm285_vm12, %v3041_v16, %v3043_v23  ;;  %v7443_v11 = vsel %vm303_vm13, %v3057_v5, %v3058_v10  ;;  %v3062_v12 = vrot.slane %v7393_v39, 5  ;;  %v3064_v21 = vrot.slane %v7397_v37, 5 }
 0x3c9   :  { %v7447_v40 = vsel %vm303_vm13, %v3058_v10, %v3060_v9  ;;  %v3065_v41 = vrot.slane %v7401_v62, 5  ;;  %v3067_v25 = vrot.slane %v7405_v24, 5  ;;  %v3069_v30 = vrot.slane %v7409_v27, 5 }
 0x3ca   :  { %v3063_v55 = vsel %vm303_vm13, %v3060_v9, %v3062_v12  ;;  %v3079_v7 = vrot.slane %v7381_v32, 7  ;;  %v3080_v38 = vrot.slane %v7385_v49, 7  ;;  %v3082_v63 = vrot.slane %v7389_v33, 7 }
 0x3cb   :  { %v7457_v29 = vsel %vm303_vm13, %v3064_v21, %v3065_v41  ;;  %v7460_v28 = vsel %vm303_vm13, %v3065_v41, %v3067_v25  ;;  %v3077_v52 = vsel %vm320_vm14, %v3063_v55, 1e+09  ;;  %v3070_v8 = vsel %vm303_vm13, %v3067_v25, %v3069_v30 }
 0x3cc   :  { %v3081_v48 = vsel %vm273_vm11, %v3079_v7, %v3080_v38  ;;  %v3084_v31 = vrot.slane %v7397_v37, 7  ;;  %v3085_v14 = vrot.slane %v7401_v62, 7  ;;  %v3078_v17 = vsel %vm320_vm14, %v3070_v8, 1e+09 }
 0x3cd   :  { %v3083_v6 = vsel %vm273_vm11, %v3080_v38, %v3082_v63  ;;  %v3087_v36 = vrot.slane %v7405_v24, 7  ;;  %v3097_v34 = vsel %vm273_vm11, 1e+09, %v3079_v7  ;;  %v3100_v5 = vsel %vm355_vm1, 1e+09, %v3081_v48 }
 0x3ce   :  { %v3086_v13 = vsel %vm273_vm11, %v3084_v31, %v3085_v14  ;;  %v3098_v43 = vsel %vm273_vm11, 1e+09, %v3084_v31  ;;  %v3099_v54 = vsel %vm354_vm15, 1e+09, %v3097_v34  ;;  %v3101_v10 = vsel %vm356_vm4, 1e+09, %v3083_v6 }
 0x3cf   :  { %v3088_v16 = vsel %vm273_vm11, %v3085_v14, %v3087_v36  ;;  %v3102_v9 = vsel %vm357_vm3, 1e+09, %v3082_v63  ;;  %v3103_v12 = vsel %vm354_vm15, 1e+09, %v3098_v43  ;;  %v3104_v21 = vsel %vm355_vm1, 1e+09, %v3086_v13 }
 0x3d0   :  { %v3105_v41 = vsel %vm356_vm4, 1e+09, %v3088_v16  ;;  %v3106_v25 = vsel %vm357_vm3, 1e+09, %v3087_v36  ;;  %v3133_v55 = vmin.f32 %v7419_v4, %v7443_v11  ;;  %v3107_v30 = vrot.slane %v7381_v32, 1 }
 0x3d1   :  { %v3108_v7 = vrot.slane %v7385_v49, 1  ;;  %v3110_v38 = vrot.slane %v7389_v33, 1  ;;  %v3112_v63 = vrot.slane %v7393_v39, 1  ;;  %v3114_v8 = vrot.slane %v7397_v37, 1 }
 0x3d2   :  { %v3115_v48 = vrot.slane %v7401_v62, 1  ;;  %v3117_v31 = vrot.slane %v7405_v24, 1  ;;  %v3119_v14 = vrot.slane %v7409_v27, 1  ;;  %v3134_v49 = vmin.f32 %v7423_v15, %v7447_v40 }
 0x3d3   :  { %v3109_v6 = vsel %vm364_vm2, %v3107_v30, %v3108_v7  ;;  %v3111_v4 = vsel %vm364_vm2, %v3108_v7, %v3110_v38  ;;  %v3113_v32 = vsel %vm364_vm2, %v3110_v38, %v3112_v63  ;;  %v3135_v15 = vmin.f32 %v7428_v20, %v3077_v52 }
 0x3d4   :  { %v3116_v11 = vsel %vm364_vm2, %v3114_v8, %v3115_v48  ;;  %v3118_v39 = vsel %vm364_vm2, %v3115_v48, %v3117_v31  ;;  %v3120_v37 = vsel %vm364_vm2, %v3117_v31, %v3119_v14  ;;  %v3127_v62 = vsel %vm393_vm5, 1e+09, %v3109_v6 }
 0x3d5   :  { %v3128_v27 = vsel %vm394_vm7, 1e+09, %v3111_v4  ;;  %v3129_v36 = vsel %vm395_vm6, 1e+09, %v3113_v32  ;;  %v3130_v34 = vsel %vm393_vm5, 1e+09, %v3116_v11  ;;  %v3137_v16 = vmin.f32 %v7431_v35, %v7457_v29 }
 0x3d6   :  { %v3131_v40 = vsel %vm394_vm7, 1e+09, %v3118_v39  ;;  %v3132_v13 = vsel %vm395_vm6, 1e+09, %v3120_v37  ;;  %v3136_v43 = vmin.f32 %v3038_v59, 1e+09  ;;  %v3138_v30 = vmin.f32 %v7435_v22, %v7460_v28 }
 0x3d7   :  { %v3139_v7 = vmin.f32 %v7440_v53, %v3078_v17  ;;  %v3140_v20 = vmin.f32 %v3043_v23, 1e+09  ;;  %v3141_v52 = vmin.f32 %v3099_v54, %v3127_v62  ;;  %v3142_v38 = vmin.f32 %v3100_v5, %v3128_v27 }
 0x3d8   :  { %v3143_v63 = vmin.f32 %v3101_v10, %v3129_v36  ;;  %v3144_v8 = vmin.f32 %v3102_v9, 1e+09  ;;  %v3145_v48 = vmin.f32 %v3103_v12, %v3130_v34  ;;  %v3146_v31 = vmin.f32 %v3104_v21, %v3131_v40 }
 0x3d9   :  { %v3147_v14 = vmin.f32 %v3105_v41, %v3132_v13  ;;  %v3148_v33 = vmin.f32 %v3106_v25, 1e+09  ;;  %v3149_v59 = vmin.f32 %v3133_v55, %v3141_v52  ;;  %v3150_v6 = vmin.f32 %v3134_v49, %v3142_v38 }
 0x3da   :  { %v3151_v4 = vmin.f32 %v3135_v15, %v3143_v63  ;;  %v3152_v35 = vmin.f32 %v3136_v43, %v3144_v8  ;;  %v3153_v29 = vmin.f32 %v3137_v16, %v3145_v48  ;;  %v3154_v32 = vmin.f32 %v3138_v30, %v3146_v31 }
 0x3db   :  { %v3155_v22 = vmin.f32 %v3139_v7, %v3147_v14  ;;  %v3156_v28 = vmin.f32 %v3140_v20, %v3148_v33  ;;  %v3157_v53 = vadd.f32 %v3149_v59, %v4137_v60  ;;  %v3158_v24 = vadd.f32 %v3150_v6, %v4130_v56 }
 0x3dc   :  { %v3159_v23 = vadd.f32 %v3151_v4, %v4139_v61  ;;  %v3160_v17 = vadd.f32 %v3152_v35, %v4132_v57  ;;  %v3161_v54 = vadd.f32 %v3153_v29, %v4137_v60  ;;  %v3162_v5 = vadd.f32 %v3154_v32, %v4130_v56 }
 0x3dd   :  { %v3163_v10 = vadd.f32 %v3155_v22, %v4139_v61  ;;  %v3164_v9 = vadd.f32 %v3156_v28, %v4132_v57  ;;  %v7540_v12 = vmin.f32 %v7356_v0, %v3157_v53  ;;  %v7543_v21 = vmin.f32 %v7359_v51, %v3158_v24 }
 0x3de   :  { %v7546_v41 = vmin.f32 %v7362_v18, %v3159_v23  ;;  %v7549_v25 = vmin.f32 %v7365_v58, %v3160_v17  ;;  %v7552_v55 = vmin.f32 %v7368_v50, %v3161_v54  ;;  %v7555_v49 = vmin.f32 %v7371_v19, %v3162_v5 }
 0x3df   :  { %v7558_v11 = vmin.f32 %v7374_v3, %v3163_v10  ;;  %v7561_v0 = vmin.f32 %v7377_v26, %v3164_v9  ;;  %v7565_v51 = vadd.f32 %v7540_v12, %v4137_v60  ;;  %v7569_v18 = vadd.f32 %v7543_v21, %v4130_v56 }
 0x3e0   :  { %v7573_v58 = vadd.f32 %v7546_v41, %v4139_v61  ;;  %v7577_v50 = vadd.f32 %v7549_v25, %v4132_v57  ;;  %v7581_v19 = vadd.f32 %v7552_v55, %v4137_v60  ;;  %v7585_v3 = vadd.f32 %v7555_v49, %v4130_v56 }
 0x3e1   :  { %v7589_v26 = vadd.f32 %v7558_v11, %v4139_v61  ;;  %v7593_v39 = vadd.f32 %v7561_v0, %v4132_v57  ;;  %v3187_v37 = vrot.slane %v7565_v51, 3  ;;  %v3188_v62 = vrot.slane %v7569_v18, 3 }
 0x3e2   :  { %v3190_v27 = vrot.slane %v7573_v58, 3  ;;  %v3192_v36 = vrot.slane %v7581_v19, 3  ;;  %v3209_v34 = vrot.slane %v7565_v51, 5  ;;  %v3193_v15 = vrot.slane %v7585_v3, 3 }
 0x3e3   :  { %v3195_v40 = vrot.slane %v7589_v26, 3  ;;  %v7603_v13 = vsel %vm285_vm12, 1e+09, %v3187_v37  ;;  %v3210_v43 = vrot.slane %v7569_v18, 5  ;;  %v7607_v16 = vsel %vm285_vm12, %v3187_v37, %v3188_v62 }
 0x3e4   :  { %v7612_v30 = vsel %vm285_vm12, %v3188_v62, %v3190_v27  ;;  %v7615_v7 = vsel %vm285_vm12, 1e+09, %v3192_v36  ;;  %v3212_v20 = vrot.slane %v7573_v58, 5  ;;  %v7619_v52 = vsel %vm285_vm12, %v3192_v36, %v3193_v15 }
 0x3e5   :  { %v7624_v38 = vsel %vm285_vm12, %v3193_v15, %v3195_v40  ;;  %v7627_v63 = vsel %vm303_vm13, %v3209_v34, %v3210_v43  ;;  %v3214_v8 = vrot.slane %v7577_v50, 5  ;;  %v3216_v31 = vrot.slane %v7581_v19, 5 }
 0x3e6   :  { %v7631_v48 = vsel %vm303_vm13, %v3210_v43, %v3212_v20  ;;  %v3217_v14 = vrot.slane %v7585_v3, 5  ;;  %v3219_v33 = vrot.slane %v7589_v26, 5  ;;  %v3221_v6 = vrot.slane %v7593_v39, 5 }
 0x3e7   :  { %v3215_v59 = vsel %vm303_vm13, %v3212_v20, %v3214_v8  ;;  %v3231_v4 = vrot.slane %v7565_v51, 7  ;;  %v3232_v35 = vrot.slane %v7569_v18, 7  ;;  %v3234_v28 = vrot.slane %v7573_v58, 7 }
 0x3e8   :  { %v7641_v29 = vsel %vm303_vm13, %v3216_v31, %v3217_v14  ;;  %v7644_v32 = vsel %vm303_vm13, %v3217_v14, %v3219_v33  ;;  %v3229_v22 = vsel %vm320_vm14, %v3215_v59, 1e+09  ;;  %v3222_v53 = vsel %vm303_vm13, %v3219_v33, %v3221_v6 }
 0x3e9   :  { %v3233_v24 = vsel %vm273_vm11, %v3231_v4, %v3232_v35  ;;  %v3236_v23 = vrot.slane %v7581_v19, 7  ;;  %v3237_v17 = vrot.slane %v7585_v3, 7  ;;  %v3230_v54 = vsel %vm320_vm14, %v3222_v53, 1e+09 }
 0x3ea   :  { %v3235_v5 = vsel %vm273_vm11, %v3232_v35, %v3234_v28  ;;  %v3239_v10 = vrot.slane %v7589_v26, 7  ;;  %v3249_v9 = vsel %vm273_vm11, 1e+09, %v3231_v4  ;;  %v3252_v34 = vsel %vm355_vm1, 1e+09, %v3233_v24 }
 0x3eb   :  { %v3238_v37 = vsel %vm273_vm11, %v3236_v23, %v3237_v17  ;;  %v3250_v62 = vsel %vm273_vm11, 1e+09, %v3236_v23  ;;  %v3251_v36 = vsel %vm354_vm15, 1e+09, %v3249_v9  ;;  %v3253_v43 = vsel %vm356_vm4, 1e+09, %v3235_v5 }
 0x3ec   :  { %v3240_v15 = vsel %vm273_vm11, %v3237_v17, %v3239_v10  ;;  %v3254_v20 = vsel %vm357_vm3, 1e+09, %v3234_v28  ;;  %v3255_v8 = vsel %vm354_vm15, 1e+09, %v3250_v62  ;;  %v3256_v31 = vsel %vm355_vm1, 1e+09, %v3238_v37 }
 0x3ed   :  { %v3257_v14 = vsel %vm356_vm4, 1e+09, %v3240_v15  ;;  %v3258_v33 = vsel %vm357_vm3, 1e+09, %v3239_v10  ;;  %v3285_v59 = vmin.f32 %v7603_v13, %v7627_v63  ;;  %v3259_v6 = vrot.slane %v7565_v51, 1 }
 0x3ee   :  { %v3260_v4 = vrot.slane %v7569_v18, 1  ;;  %v3262_v35 = vrot.slane %v7573_v58, 1  ;;  %v3264_v28 = vrot.slane %v7577_v50, 1  ;;  %v3266_v53 = vrot.slane %v7581_v19, 1 }
 0x3ef   :  { %v3267_v24 = vrot.slane %v7585_v3, 1  ;;  %v3269_v23 = vrot.slane %v7589_v26, 1  ;;  %v3271_v17 = vrot.slane %v7593_v39, 1  ;;  %v3286_v18 = vmin.f32 %v7607_v16, %v7631_v48 }
 0x3f0   :  { %v3261_v5 = vsel %vm364_vm2, %v3259_v6, %v3260_v4  ;;  %v3263_v13 = vsel %vm364_vm2, %v3260_v4, %v3262_v35  ;;  %v3265_v51 = vsel %vm364_vm2, %v3262_v35, %v3264_v28  ;;  %v3287_v16 = vmin.f32 %v7612_v30, %v3229_v22 }
 0x3f1   :  { %v3268_v63 = vsel %vm364_vm2, %v3266_v53, %v3267_v24  ;;  %v3270_v50 = vsel %vm364_vm2, %v3267_v24, %v3269_v23  ;;  %v3272_v19 = vsel %vm364_vm2, %v3269_v23, %v3271_v17  ;;  %v3279_v3 = vsel %vm393_vm5, 1e+09, %v3261_v5 }
 0x3f2   :  { %v3280_v39 = vsel %vm394_vm7, 1e+09, %v3263_v13  ;;  %v3281_v10 = vsel %vm395_vm6, 1e+09, %v3265_v51  ;;  %v3282_v9 = vsel %vm393_vm5, 1e+09, %v3268_v63  ;;  %v3289_v15 = vmin.f32 %v7615_v7, %v7641_v29 }
 0x3f3   :  { %v3283_v48 = vsel %vm394_vm7, 1e+09, %v3270_v50  ;;  %v3284_v37 = vsel %vm395_vm6, 1e+09, %v3272_v19  ;;  %v3288_v62 = vmin.f32 %v3190_v27, 1e+09  ;;  %v3290_v6 = vmin.f32 %v7619_v52, %v7644_v32 }
 0x3f4   :  { %v3291_v4 = vmin.f32 %v7624_v38, %v3230_v54  ;;  %v3292_v30 = vmin.f32 %v3195_v40, 1e+09  ;;  %v3293_v22 = vmin.f32 %v3251_v36, %v3279_v3  ;;  %v3294_v35 = vmin.f32 %v3252_v34, %v3280_v39 }
 0x3f5   :  { %v3295_v28 = vmin.f32 %v3253_v43, %v3281_v10  ;;  %v3296_v53 = vmin.f32 %v3254_v20, 1e+09  ;;  %v3297_v24 = vmin.f32 %v3255_v8, %v3282_v9  ;;  %v3298_v23 = vmin.f32 %v3256_v31, %v3283_v48 }
 0x3f6   :  { %v3299_v17 = vmin.f32 %v3257_v14, %v3284_v37  ;;  %v3300_v58 = vmin.f32 %v3258_v33, 1e+09  ;;  %v3301_v27 = vmin.f32 %v3285_v59, %v3293_v22  ;;  %v3302_v5 = vmin.f32 %v3286_v18, %v3294_v35 }
 0x3f7   :  { %v3303_v13 = vmin.f32 %v3287_v16, %v3295_v28  ;;  %v3304_v7 = vmin.f32 %v3288_v62, %v3296_v53  ;;  %v3305_v29 = vmin.f32 %v3289_v15, %v3297_v24  ;;  %v3306_v51 = vmin.f32 %v3290_v6, %v3298_v23 }
 0x3f8   :  { %v3307_v52 = vmin.f32 %v3291_v4, %v3299_v17  ;;  %v3308_v32 = vmin.f32 %v3292_v30, %v3300_v58  ;;  %v3309_v38 = vadd.f32 %v3301_v27, %v4137_v60  ;;  %v3310_v26 = vadd.f32 %v3302_v5, %v4130_v56 }
 0x3f9   :  { %v3311_v40 = vadd.f32 %v3303_v13, %v4139_v61  ;;  %v3312_v54 = vadd.f32 %v3304_v7, %v4132_v57  ;;  %v3313_v36 = vadd.f32 %v3305_v29, %v4137_v60  ;;  %v3314_v34 = vadd.f32 %v3306_v51, %v4130_v56 }
 0x3fa   :  { %v3315_v43 = vadd.f32 %v3307_v52, %v4139_v61  ;;  %v3316_v20 = vadd.f32 %v3308_v32, %v4132_v57  ;;  %v7724_v8 = vmin.f32 %v7540_v12, %v3309_v38  ;;  %v7727_v31 = vmin.f32 %v7543_v21, %v3310_v26 }
 0x3fb   :  { %v7730_v14 = vmin.f32 %v7546_v41, %v3311_v40  ;;  %v7733_v33 = vmin.f32 %v7549_v25, %v3312_v54  ;;  %v7736_v59 = vmin.f32 %v7552_v55, %v3313_v36  ;;  %v7739_v18 = vmin.f32 %v7555_v49, %v3314_v34 }
 0x3fc   :  { %v7742_v63 = vmin.f32 %v7558_v11, %v3315_v43  ;;  %v7745_v12 = vmin.f32 %v7561_v0, %v3316_v20  ;;  %v7749_v21 = vadd.f32 %v7724_v8, %v4137_v60  ;;  %v7753_v41 = vadd.f32 %v7727_v31, %v4130_v56 }
 0x3fd   :  { %v7757_v25 = vadd.f32 %v7730_v14, %v4139_v61  ;;  %v7761_v55 = vadd.f32 %v7733_v33, %v4132_v57  ;;  %v7765_v49 = vadd.f32 %v7736_v59, %v4137_v60  ;;  %v7769_v11 = vadd.f32 %v7739_v18, %v4130_v56 }
 0x3fe   :  { %v7773_v0 = vadd.f32 %v7742_v63, %v4139_v61  ;;  %v7777_v50 = vadd.f32 %v7745_v12, %v4132_v57  ;;  %v3339_v19 = vrot.slane %v7749_v21, 3  ;;  %v3340_v3 = vrot.slane %v7753_v41, 3 }
 0x3ff   :  { %v3342_v39 = vrot.slane %v7757_v25, 3  ;;  %v3344_v10 = vrot.slane %v7765_v49, 3  ;;  %v3361_v9 = vrot.slane %v7749_v21, 5  ;;  %v3345_v16 = vrot.slane %v7769_v11, 3 }
 0x400   :  { %v3347_v48 = vrot.slane %v7773_v0, 3  ;;  %v7787_v37 = vsel %vm285_vm12, 1e+09, %v3339_v19  ;;  %v3362_v62 = vrot.slane %v7753_v41, 5  ;;  %v7791_v15 = vsel %vm285_vm12, %v3339_v19, %v3340_v3 }
 0x401   :  { %v7796_v6 = vsel %vm285_vm12, %v3340_v3, %v3342_v39  ;;  %v7799_v4 = vsel %vm285_vm12, 1e+09, %v3344_v10  ;;  %v3364_v30 = vrot.slane %v7757_v25, 5  ;;  %v7803_v22 = vsel %vm285_vm12, %v3344_v10, %v3345_v16 }
 0x402   :  { %v7808_v35 = vsel %vm285_vm12, %v3345_v16, %v3347_v48  ;;  %v7811_v28 = vsel %vm303_vm13, %v3361_v9, %v3362_v62  ;;  %v3366_v53 = vrot.slane %v7761_v55, 5  ;;  %v3368_v23 = vrot.slane %v7765_v49, 5 }
 0x403   :  { %v7815_v24 = vsel %vm303_vm13, %v3362_v62, %v3364_v30  ;;  %v3369_v17 = vrot.slane %v7769_v11, 5  ;;  %v3371_v58 = vrot.slane %v7773_v0, 5  ;;  %v3373_v5 = vrot.slane %v7777_v50, 5 }
 0x404   :  { %v3367_v27 = vsel %vm303_vm13, %v3364_v30, %v3366_v53  ;;  %v3383_v13 = vrot.slane %v7749_v21, 7  ;;  %v3384_v7 = vrot.slane %v7753_v41, 7  ;;  %v3386_v32 = vrot.slane %v7757_v25, 7 }
 0x405   :  { %v7825_v29 = vsel %vm303_vm13, %v3368_v23, %v3369_v17  ;;  %v7828_v51 = vsel %vm303_vm13, %v3369_v17, %v3371_v58  ;;  %v3381_v52 = vsel %vm320_vm14, %v3367_v27, 1e+09  ;;  %v3374_v38 = vsel %vm303_vm13, %v3371_v58, %v3373_v5 }
 0x406   :  { %v3385_v26 = vsel %vm273_vm11, %v3383_v13, %v3384_v7  ;;  %v3388_v40 = vrot.slane %v7765_v49, 7  ;;  %v3389_v54 = vrot.slane %v7769_v11, 7  ;;  %v3382_v36 = vsel %vm320_vm14, %v3374_v38, 1e+09 }
 0x407   :  { %v3387_v34 = vsel %vm273_vm11, %v3384_v7, %v3386_v32  ;;  %v3391_v43 = vrot.slane %v7773_v0, 7  ;;  %v3401_v20 = vsel %vm273_vm11, 1e+09, %v3383_v13  ;;  %v3404_v9 = vsel %vm355_vm1, 1e+09, %v3385_v26 }
 0x408   :  { %v3390_v19 = vsel %vm273_vm11, %v3388_v40, %v3389_v54  ;;  %v3402_v3 = vsel %vm273_vm11, 1e+09, %v3388_v40  ;;  %v3403_v10 = vsel %vm354_vm15, 1e+09, %v3401_v20  ;;  %v3405_v62 = vsel %vm356_vm4, 1e+09, %v3387_v34 }
 0x409   :  { %v3392_v16 = vsel %vm273_vm11, %v3389_v54, %v3391_v43  ;;  %v3406_v30 = vsel %vm357_vm3, 1e+09, %v3386_v32  ;;  %v3407_v53 = vsel %vm354_vm15, 1e+09, %v3402_v3  ;;  %v3408_v23 = vsel %vm355_vm1, 1e+09, %v3390_v19 }
 0x40a   :  { %v3409_v17 = vsel %vm356_vm4, 1e+09, %v3392_v16  ;;  %v3410_v58 = vsel %vm357_vm3, 1e+09, %v3391_v43  ;;  %v3437_v27 = vmin.f32 %v7787_v37, %v7811_v28  ;;  %v3411_v5 = vrot.slane %v7749_v21, 1 }
 0x40b   :  { %v3412_v13 = vrot.slane %v7753_v41, 1  ;;  %v3414_v7 = vrot.slane %v7757_v25, 1  ;;  %v3416_v32 = vrot.slane %v7761_v55, 1  ;;  %v3418_v38 = vrot.slane %v7765_v49, 1 }
 0x40c   :  { %v3419_v26 = vrot.slane %v7769_v11, 1  ;;  %v3421_v40 = vrot.slane %v7773_v0, 1  ;;  %v3423_v54 = vrot.slane %v7777_v50, 1  ;;  %v3438_v41 = vmin.f32 %v7791_v15, %v7815_v24 }
 0x40d   :  { %v3413_v34 = vsel %vm364_vm2, %v3411_v5, %v3412_v13  ;;  %v3415_v37 = vsel %vm364_vm2, %v3412_v13, %v3414_v7  ;;  %v3417_v21 = vsel %vm364_vm2, %v3414_v7, %v3416_v32  ;;  %v3439_v15 = vmin.f32 %v7796_v6, %v3381_v52 }
 0x40e   :  { %v3420_v28 = vsel %vm364_vm2, %v3418_v38, %v3419_v26  ;;  %v3422_v55 = vsel %vm364_vm2, %v3419_v26, %v3421_v40  ;;  %v3424_v49 = vsel %vm364_vm2, %v3421_v40, %v3423_v54  ;;  %v3431_v11 = vsel %vm393_vm5, 1e+09, %v3413_v34 }
 0x40f   :  { %v3432_v50 = vsel %vm394_vm7, 1e+09, %v3415_v37  ;;  %v3433_v43 = vsel %vm395_vm6, 1e+09, %v3417_v21  ;;  %v3434_v20 = vsel %vm393_vm5, 1e+09, %v3420_v28  ;;  %v3441_v16 = vmin.f32 %v7799_v4, %v7825_v29 }
 0x410   :  { %v3435_v24 = vsel %vm394_vm7, 1e+09, %v3422_v55  ;;  %v3436_v19 = vsel %vm395_vm6, 1e+09, %v3424_v49  ;;  %v3440_v3 = vmin.f32 %v3342_v39, 1e+09  ;;  %v3442_v5 = vmin.f32 %v7803_v22, %v7828_v51 }
 0x411   :  { %v3443_v13 = vmin.f32 %v7808_v35, %v3382_v36  ;;  %v3444_v6 = vmin.f32 %v3347_v48, 1e+09  ;;  %v3445_v52 = vmin.f32 %v3403_v10, %v3431_v11  ;;  %v3446_v7 = vmin.f32 %v3404_v9, %v3432_v50 }
 0x412   :  { %v3447_v32 = vmin.f32 %v3405_v62, %v3433_v43  ;;  %v3448_v38 = vmin.f32 %v3406_v30, 1e+09  ;;  %v3449_v26 = vmin.f32 %v3407_v53, %v3434_v20  ;;  %v3450_v40 = vmin.f32 %v3408_v23, %v3435_v24 }
 0x413   :  { %v3451_v54 = vmin.f32 %v3409_v17, %v3436_v19  ;;  %v3452_v25 = vmin.f32 %v3410_v58, 1e+09  ;;  %v3453_v39 = vmin.f32 %v3437_v27, %v3445_v52  ;;  %v3454_v34 = vmin.f32 %v3438_v41, %v3446_v7 }
 0x414   :  { %v3455_v37 = vmin.f32 %v3439_v15, %v3447_v32  ;;  %v3456_v4 = vmin.f32 %v3440_v3, %v3448_v38  ;;  %v3457_v29 = vmin.f32 %v3441_v16, %v3449_v26  ;;  %v3458_v21 = vmin.f32 %v3442_v5, %v3450_v40 }
 0x415   :  { %v3459_v22 = vmin.f32 %v3443_v13, %v3451_v54  ;;  %v3460_v51 = vmin.f32 %v3444_v6, %v3452_v25  ;;  %v3461_v35 = vadd.f32 %v3453_v39, %v4137_v60  ;;  %v3462_v0 = vadd.f32 %v3454_v34, %v4130_v56 }
 0x416   :  { %v3463_v48 = vadd.f32 %v3455_v37, %v4139_v61  ;;  %v3464_v36 = vadd.f32 %v3456_v4, %v4132_v57  ;;  %v3465_v10 = vadd.f32 %v3457_v29, %v4137_v60  ;;  %v3466_v9 = vadd.f32 %v3458_v21, %v4130_v56 }
 0x417   :  { %v3467_v62 = vadd.f32 %v3459_v22, %v4139_v61  ;;  %v3468_v30 = vadd.f32 %v3460_v51, %v4132_v57  ;;  %v7908_v53 = vmin.f32 %v7724_v8, %v3461_v35  ;;  %v7911_v23 = vmin.f32 %v7727_v31, %v3462_v0 }
 0x418   :  { %v7914_v17 = vmin.f32 %v7730_v14, %v3463_v48  ;;  %v7917_v58 = vmin.f32 %v7733_v33, %v3464_v36  ;;  %v7920_v27 = vmin.f32 %v7736_v59, %v3465_v10  ;;  %v7923_v41 = vmin.f32 %v7739_v18, %v3466_v9 }
 0x419   :  { %v7926_v28 = vmin.f32 %v7742_v63, %v3467_v62  ;;  %v7929_v8 = vmin.f32 %v7745_v12, %v3468_v30  ;;  %v7933_v31 = vadd.f32 %v7908_v53, %v4137_v60  ;;  %v7937_v14 = vadd.f32 %v7911_v23, %v4130_v56 }
 0x41a   :  { %v7941_v33 = vadd.f32 %v7914_v17, %v4139_v61  ;;  %v7945_v59 = vadd.f32 %v7917_v58, %v4132_v57  ;;  %v7949_v18 = vadd.f32 %v7920_v27, %v4137_v60  ;;  %v7953_v63 = vadd.f32 %v7923_v41, %v4130_v56 }
 0x41b   :  { %v7957_v12 = vadd.f32 %v7926_v28, %v4139_v61  ;;  %v7961_v55 = vadd.f32 %v7929_v8, %v4132_v57  ;;  %v3491_v49 = vrot.slane %v7933_v31, 3  ;;  %v3492_v11 = vrot.slane %v7937_v14, 3 }
 0x41c   :  { %v3494_v50 = vrot.slane %v7941_v33, 3  ;;  %v3496_v43 = vrot.slane %v7949_v18, 3  ;;  %v3513_v20 = vrot.slane %v7933_v31, 5  ;;  %v3497_v15 = vrot.slane %v7953_v63, 3 }
 0x41d   :  { %v3499_v24 = vrot.slane %v7957_v12, 3  ;;  %v7971_v19 = vsel %vm285_vm12, 1e+09, %v3491_v49  ;;  %v3514_v3 = vrot.slane %v7937_v14, 5  ;;  %v7975_v16 = vsel %vm285_vm12, %v3491_v49, %v3492_v11 }
 0x41e   :  { %v7980_v5 = vsel %vm285_vm12, %v3492_v11, %v3494_v50  ;;  %v7983_v13 = vsel %vm285_vm12, 1e+09, %v3496_v43  ;;  %v3516_v6 = vrot.slane %v7941_v33, 5  ;;  %v7987_v52 = vsel %vm285_vm12, %v3496_v43, %v3497_v15 }
 0x41f   :  { %v7992_v7 = vsel %vm285_vm12, %v3497_v15, %v3499_v24  ;;  %v7995_v32 = vsel %vm303_vm13, %v3513_v20, %v3514_v3  ;;  %v3518_v38 = vrot.slane %v7945_v59, 5  ;;  %v3520_v40 = vrot.slane %v7949_v18, 5 }
 0x420   :  { %v7999_v26 = vsel %vm303_vm13, %v3514_v3, %v3516_v6  ;;  %v3521_v54 = vrot.slane %v7953_v63, 5  ;;  %v3523_v25 = vrot.slane %v7957_v12, 5  ;;  %v3525_v34 = vrot.slane %v7961_v55, 5 }
 0x421   :  { %v3519_v39 = vsel %vm303_vm13, %v3516_v6, %v3518_v38  ;;  %v3535_v37 = vrot.slane %v7933_v31, 7  ;;  %v3536_v4 = vrot.slane %v7937_v14, 7  ;;  %v3538_v51 = vrot.slane %v7941_v33, 7 }
 0x422   :  { %v8009_v29 = vsel %vm303_vm13, %v3520_v40, %v3521_v54  ;;  %v8012_v21 = vsel %vm303_vm13, %v3521_v54, %v3523_v25  ;;  %v3533_v22 = vsel %vm320_vm14, %v3519_v39, 1e+09  ;;  %v3526_v35 = vsel %vm303_vm13, %v3523_v25, %v3525_v34 }
 0x423   :  { %v3537_v0 = vsel %vm273_vm11, %v3535_v37, %v3536_v4  ;;  %v3540_v48 = vrot.slane %v7949_v18, 7  ;;  %v3541_v36 = vrot.slane %v7953_v63, 7  ;;  %v3534_v10 = vsel %vm320_vm14, %v3526_v35, 1e+09 }
 0x424   :  { %v3539_v9 = vsel %vm273_vm11, %v3536_v4, %v3538_v51  ;;  %v3543_v62 = vrot.slane %v7957_v12, 7  ;;  %v3553_v30 = vsel %vm273_vm11, 1e+09, %v3535_v37  ;;  %v3556_v20 = vsel %vm355_vm1, 1e+09, %v3537_v0 }
 0x425   :  { %v3542_v49 = vsel %vm273_vm11, %v3540_v48, %v3541_v36  ;;  %v3554_v11 = vsel %vm273_vm11, 1e+09, %v3540_v48  ;;  %v3555_v43 = vsel %vm354_vm15, 1e+09, %v3553_v30  ;;  %v3557_v3 = vsel %vm356_vm4, 1e+09, %v3539_v9 }
 0x426   :  { %v3544_v15 = vsel %vm273_vm11, %v3541_v36, %v3543_v62  ;;  %v3558_v6 = vsel %vm357_vm3, 1e+09, %v3538_v51  ;;  %v3559_v38 = vsel %vm354_vm15, 1e+09, %v3554_v11  ;;  %v3560_v40 = vsel %vm355_vm1, 1e+09, %v3542_v49 }
 0x427   :  { %v3561_v54 = vsel %vm356_vm4, 1e+09, %v3544_v15  ;;  %v3562_v25 = vsel %vm357_vm3, 1e+09, %v3543_v62  ;;  %v3589_v39 = vmin.f32 %v7971_v19, %v7995_v32  ;;  %v3563_v34 = vrot.slane %v7933_v31, 1 }
 0x428   :  { %v3564_v37 = vrot.slane %v7937_v14, 1  ;;  %v3566_v4 = vrot.slane %v7941_v33, 1  ;;  %v3568_v51 = vrot.slane %v7945_v59, 1  ;;  %v3570_v35 = vrot.slane %v7949_v18, 1 }
 0x429   :  { %v3571_v0 = vrot.slane %v7953_v63, 1  ;;  %v3573_v48 = vrot.slane %v7957_v12, 1  ;;  %v3575_v36 = vrot.slane %v7961_v55, 1  ;;  %v3590_v14 = vmin.f32 %v7975_v16, %v7999_v26 }
 0x42a   :  { %v3565_v9 = vsel %vm364_vm2, %v3563_v34, %v3564_v37  ;;  %v3567_v19 = vsel %vm364_vm2, %v3564_v37, %v3566_v4  ;;  %v3569_v31 = vsel %vm364_vm2, %v3566_v4, %v3568_v51  ;;  %v3591_v16 = vmin.f32 %v7980_v5, %v3533_v22 }
 0x42b   :  { %v3572_v32 = vsel %vm364_vm2, %v3570_v35, %v3571_v0  ;;  %v3574_v59 = vsel %vm364_vm2, %v3571_v0, %v3573_v48  ;;  %v3576_v18 = vsel %vm364_vm2, %v3573_v48, %v3575_v36  ;;  %v3583_v63 = vsel %vm393_vm5, 1e+09, %v3565_v9 }
 0x42c   :  { %v3584_v55 = vsel %vm394_vm7, 1e+09, %v3567_v19  ;;  %v3585_v62 = vsel %vm395_vm6, 1e+09, %v3569_v31  ;;  %v3586_v30 = vsel %vm393_vm5, 1e+09, %v3572_v32  ;;  %v3593_v15 = vmin.f32 %v7983_v13, %v8009_v29 }
 0x42d   :  { %v3587_v26 = vsel %vm394_vm7, 1e+09, %v3574_v59  ;;  %v3588_v49 = vsel %vm395_vm6, 1e+09, %v3576_v18  ;;  %v3592_v11 = vmin.f32 %v3494_v50, 1e+09  ;;  %v3594_v34 = vmin.f32 %v7987_v52, %v8012_v21 }
 0x42e   :  { %v3595_v37 = vmin.f32 %v7992_v7, %v3534_v10  ;;  %v3596_v5 = vmin.f32 %v3499_v24, 1e+09  ;;  %v3597_v22 = vmin.f32 %v3555_v43, %v3583_v63  ;;  %v3598_v4 = vmin.f32 %v3556_v20, %v3584_v55 }
 0x42f   :  { %v3599_v51 = vmin.f32 %v3557_v3, %v3585_v62  ;;  %v3600_v35 = vmin.f32 %v3558_v6, 1e+09  ;;  %v3601_v0 = vmin.f32 %v3559_v38, %v3586_v30  ;;  %v3602_v48 = vmin.f32 %v3560_v40, %v3587_v26 }
 0x430   :  { %v3603_v36 = vmin.f32 %v3561_v54, %v3588_v49  ;;  %v3604_v33 = vmin.f32 %v3562_v25, 1e+09  ;;  %v3605_v50 = vmin.f32 %v3589_v39, %v3597_v22  ;;  %v3606_v9 = vmin.f32 %v3590_v14, %v3598_v4 }
 0x431   :  { %v3607_v19 = vmin.f32 %v3591_v16, %v3599_v51  ;;  %v3608_v13 = vmin.f32 %v3592_v11, %v3600_v35  ;;  %v3609_v29 = vmin.f32 %v3593_v15, %v3601_v0  ;;  %v3610_v31 = vmin.f32 %v3594_v34, %v3602_v48 }
 0x432   :  { %v3611_v52 = vmin.f32 %v3595_v37, %v3603_v36  ;;  %v3612_v21 = vmin.f32 %v3596_v5, %v3604_v33  ;;  %v3613_v7 = vadd.f32 %v3605_v50, %v4137_v60  ;;  %v3614_v12 = vadd.f32 %v3606_v9, %v4130_v56 }
 0x433   :  { %v3615_v24 = vadd.f32 %v3607_v19, %v4139_v61  ;;  %v3616_v10 = vadd.f32 %v3608_v13, %v4132_v57  ;;  %v3617_v43 = vadd.f32 %v3609_v29, %v4137_v60  ;;  %v3618_v20 = vadd.f32 %v3610_v31, %v4130_v56 }
 0x434   :  { %v3619_v3 = vadd.f32 %v3611_v52, %v4139_v61  ;;  %v3620_v6 = vadd.f32 %v3612_v21, %v4132_v57  ;;  %v8092_v38 = vmin.f32 %v7908_v53, %v3613_v7  ;;  %v8095_v40 = vmin.f32 %v7911_v23, %v3614_v12 }
 0x435   :  { %v8098_v54 = vmin.f32 %v7914_v17, %v3615_v24  ;;  %v8101_v25 = vmin.f32 %v7917_v58, %v3616_v10  ;;  %v8104_v39 = vmin.f32 %v7920_v27, %v3617_v43  ;;  %v8107_v14 = vmin.f32 %v7923_v41, %v3618_v20 }
 0x436   :  { %v8110_v32 = vmin.f32 %v7926_v28, %v3619_v3  ;;  %v8113_v53 = vmin.f32 %v7929_v8, %v3620_v6  ;;  %v8117_v23 = vadd.f32 %v8092_v38, %v4137_v60  ;;  %v8121_v17 = vadd.f32 %v8095_v40, %v4130_v56 }
 0x437   :  { %v8125_v58 = vadd.f32 %v8098_v54, %v4139_v61  ;;  %v8129_v27 = vadd.f32 %v8101_v25, %v4132_v57  ;;  %v8133_v41 = vadd.f32 %v8104_v39, %v4137_v60  ;;  %v8137_v28 = vadd.f32 %v8107_v14, %v4130_v56 }
 0x438   :  { %v8141_v8 = vadd.f32 %v8110_v32, %v4139_v61  ;;  %v8145_v59 = vadd.f32 %v8113_v53, %v4132_v57  ;;  %v3643_v18 = vrot.slane %v8117_v23, 3  ;;  %v3644_v63 = vrot.slane %v8121_v17, 3 }
 0x439   :  { %v3646_v55 = vrot.slane %v8125_v58, 3  ;;  %v3648_v62 = vrot.slane %v8133_v41, 3  ;;  %v3665_v30 = vrot.slane %v8117_v23, 5  ;;  %v3649_v16 = vrot.slane %v8137_v28, 3 }
 0x43a   :  { %v3651_v26 = vrot.slane %v8141_v8, 3  ;;  %v8155_v49 = vsel %vm285_vm12, 1e+09, %v3643_v18  ;;  %v3666_v11 = vrot.slane %v8121_v17, 5  ;;  %v8159_v15 = vsel %vm285_vm12, %v3643_v18, %v3644_v63 }
 0x43b   :  { %v8164_v34 = vsel %vm285_vm12, %v3644_v63, %v3646_v55  ;;  %v8167_v37 = vsel %vm285_vm12, 1e+09, %v3648_v62  ;;  %v3668_v5 = vrot.slane %v8125_v58, 5  ;;  %v8171_v22 = vsel %vm285_vm12, %v3648_v62, %v3649_v16 }
 0x43c   :  { %v8176_v4 = vsel %vm285_vm12, %v3649_v16, %v3651_v26  ;;  %v8179_v51 = vsel %vm303_vm13, %v3665_v30, %v3666_v11  ;;  %v3670_v35 = vrot.slane %v8129_v27, 5  ;;  %v3672_v48 = vrot.slane %v8133_v41, 5 }
 0x43d   :  { %v8183_v0 = vsel %vm303_vm13, %v3666_v11, %v3668_v5  ;;  %v3673_v36 = vrot.slane %v8137_v28, 5  ;;  %v3675_v33 = vrot.slane %v8141_v8, 5  ;;  %v3677_v9 = vrot.slane %v8145_v59, 5 }
 0x43e   :  { %v3671_v50 = vsel %vm303_vm13, %v3668_v5, %v3670_v35  ;;  %v3687_v19 = vrot.slane %v8117_v23, 7  ;;  %v3688_v13 = vrot.slane %v8121_v17, 7  ;;  %v3690_v21 = vrot.slane %v8125_v58, 7 }
 0x43f   :  { %v8193_v29 = vsel %vm303_vm13, %v3672_v48, %v3673_v36  ;;  %v8196_v31 = vsel %vm303_vm13, %v3673_v36, %v3675_v33  ;;  %v3685_v52 = vsel %vm320_vm14, %v3671_v50, 1e+09  ;;  %v3678_v7 = vsel %vm303_vm13, %v3675_v33, %v3677_v9 }
 0x440   :  { %v3689_v12 = vsel %vm273_vm11, %v3687_v19, %v3688_v13  ;;  %v3692_v24 = vrot.slane %v8133_v41, 7  ;;  %v3693_v10 = vrot.slane %v8137_v28, 7  ;;  %v3686_v43 = vsel %vm320_vm14, %v3678_v7, 1e+09 }
 0x441   :  { %v3691_v20 = vsel %vm273_vm11, %v3688_v13, %v3690_v21  ;;  %v3695_v3 = vrot.slane %v8141_v8, 7  ;;  %v3705_v6 = vsel %vm273_vm11, 1e+09, %v3687_v19  ;;  %v3708_v30 = vsel %vm355_vm1, 1e+09, %v3689_v12 }
 0x442   :  { %v3694_v18 = vsel %vm273_vm11, %v3692_v24, %v3693_v10  ;;  %v3706_v63 = vsel %vm273_vm11, 1e+09, %v3692_v24  ;;  %v3707_v62 = vsel %vm354_vm15, 1e+09, %v3705_v6  ;;  %v3709_v11 = vsel %vm356_vm4, 1e+09, %v3691_v20 }
 0x443   :  { %v3696_v16 = vsel %vm273_vm11, %v3693_v10, %v3695_v3  ;;  %v3710_v5 = vsel %vm357_vm3, 1e+09, %v3690_v21  ;;  %v3711_v35 = vsel %vm354_vm15, 1e+09, %v3706_v63  ;;  %v3712_v48 = vsel %vm355_vm1, 1e+09, %v3694_v18 }
 0x444   :  { %v3713_v36 = vsel %vm356_vm4, 1e+09, %v3696_v16  ;;  %v3714_v33 = vsel %vm357_vm3, 1e+09, %v3695_v3  ;;  %v3741_v50 = vmin.f32 %v8155_v49, %v8179_v51  ;;  %v3715_v9 = vrot.slane %v8117_v23, 1 }
 0x445   :  { %v3716_v19 = vrot.slane %v8121_v17, 1  ;;  %v3718_v13 = vrot.slane %v8125_v58, 1  ;;  %v3720_v21 = vrot.slane %v8129_v27, 1  ;;  %v3722_v7 = vrot.slane %v8133_v41, 1 }
 0x446   :  { %v3723_v12 = vrot.slane %v8137_v28, 1  ;;  %v3725_v24 = vrot.slane %v8141_v8, 1  ;;  %v3727_v10 = vrot.slane %v8145_v59, 1  ;;  %v3742_v17 = vmin.f32 %v8159_v15, %v8183_v0 }
 0x447   :  { %v3717_v20 = vsel %vm364_vm2, %v3715_v9, %v3716_v19  ;;  %v3719_v49 = vsel %vm364_vm2, %v3716_v19, %v3718_v13  ;;  %v3721_v23 = vsel %vm364_vm2, %v3718_v13, %v3720_v21  ;;  %v3743_v15 = vmin.f32 %v8164_v34, %v3685_v52 }
 0x448   :  { %v3724_v51 = vsel %vm364_vm2, %v3722_v7, %v3723_v12  ;;  %v3726_v27 = vsel %vm364_vm2, %v3723_v12, %v3725_v24  ;;  %v3728_v41 = vsel %vm364_vm2, %v3725_v24, %v3727_v10  ;;  %v3735_v28 = vsel %vm393_vm5, 1e+09, %v3717_v20 }
 0x449   :  { %v3736_v59 = vsel %vm394_vm7, 1e+09, %v3719_v49  ;;  %v3737_v3 = vsel %vm395_vm6, 1e+09, %v3721_v23  ;;  %v3738_v6 = vsel %vm393_vm5, 1e+09, %v3724_v51  ;;  %v3745_v16 = vmin.f32 %v8167_v37, %v8193_v29 }
 0x44a   :  { %v3739_v0 = vsel %vm394_vm7, 1e+09, %v3726_v27  ;;  %v3740_v18 = vsel %vm395_vm6, 1e+09, %v3728_v41  ;;  %v3744_v63 = vmin.f32 %v3646_v55, 1e+09  ;;  %v3746_v9 = vmin.f32 %v8171_v22, %v8196_v31 }
 0x44b   :  { %v3747_v19 = vmin.f32 %v8176_v4, %v3686_v43  ;;  %v3748_v34 = vmin.f32 %v3651_v26, 1e+09  ;;  %v3749_v52 = vmin.f32 %v3707_v62, %v3735_v28  ;;  %v3750_v13 = vmin.f32 %v3708_v30, %v3736_v59 }
 0x44c   :  { %v3751_v21 = vmin.f32 %v3709_v11, %v3737_v3  ;;  %v3752_v7 = vmin.f32 %v3710_v5, 1e+09  ;;  %v3753_v12 = vmin.f32 %v3711_v35, %v3738_v6  ;;  %v3754_v24 = vmin.f32 %v3712_v48, %v3739_v0 }
 0x44d   :  { %v3755_v10 = vmin.f32 %v3713_v36, %v3740_v18  ;;  %v3756_v58 = vmin.f32 %v3714_v33, 1e+09  ;;  %v3757_v55 = vmin.f32 %v3741_v50, %v3749_v52  ;;  %v3758_v20 = vmin.f32 %v3742_v17, %v3750_v13 }
 0x44e   :  { %v3759_v49 = vmin.f32 %v3743_v15, %v3751_v21  ;;  %v3760_v37 = vmin.f32 %v3744_v63, %v3752_v7  ;;  %v3761_v29 = vmin.f32 %v3745_v16, %v3753_v12  ;;  %v3762_v23 = vmin.f32 %v3746_v9, %v3754_v24 }
 0x44f   :  { %v3763_v22 = vmin.f32 %v3747_v19, %v3755_v10  ;;  %v3764_v31 = vmin.f32 %v3748_v34, %v3756_v58  ;;  %v3765_v4 = vadd.f32 %v3757_v55, %v4137_v60  ;;  %v3766_v8 = vadd.f32 %v3758_v20, %v4130_v56 }
 0x450   :  { %v3767_v26 = vadd.f32 %v3759_v49, %v4139_v61  ;;  %v3768_v43 = vadd.f32 %v3760_v37, %v4132_v57  ;;  %v3769_v62 = vadd.f32 %v3761_v29, %v4137_v60  ;;  %v3770_v30 = vadd.f32 %v3762_v23, %v4130_v56 }
 0x451   :  { %v3771_v11 = vadd.f32 %v3763_v22, %v4139_v61  ;;  %v3772_v5 = vadd.f32 %v3764_v31, %v4132_v57  ;;  %v8276_v35 = vmin.f32 %v8092_v38, %v3765_v4  ;;  %v8279_v48 = vmin.f32 %v8095_v40, %v3766_v8 }
 0x452   :  { %v8282_v36 = vmin.f32 %v8098_v54, %v3767_v26  ;;  %v8285_v33 = vmin.f32 %v8101_v25, %v3768_v43  ;;  %v8288_v50 = vmin.f32 %v8104_v39, %v3769_v62  ;;  %v8291_v17 = vmin.f32 %v8107_v14, %v3770_v30 }
 0x453   :  { %v8294_v51 = vmin.f32 %v8110_v32, %v3771_v11  ;;  %v8297_v38 = vmin.f32 %v8113_v53, %v3772_v5  ;;  %v8301_v40 = vadd.f32 %v8276_v35, %v4137_v60  ;;  %v8305_v54 = vadd.f32 %v8279_v48, %v4130_v56 }
 0x454   :  { %v8309_v25 = vadd.f32 %v8282_v36, %v4139_v61  ;;  %v8313_v39 = vadd.f32 %v8285_v33, %v4132_v57  ;;  %v8317_v14 = vadd.f32 %v8288_v50, %v4137_v60  ;;  %v8321_v32 = vadd.f32 %v8291_v17, %v4130_v56 }
 0x455   :  { %v8325_v53 = vadd.f32 %v8294_v51, %v4139_v61  ;;  %v8329_v27 = vadd.f32 %v8297_v38, %v4132_v57  ;;  %v3795_v41 = vrot.slane %v8301_v40, 3  ;;  %v3796_v28 = vrot.slane %v8305_v54, 3 }
 0x456   :  { %v3798_v59 = vrot.slane %v8309_v25, 3  ;;  %v3800_v3 = vrot.slane %v8317_v14, 3  ;;  %v3817_v6 = vrot.slane %v8301_v40, 5  ;;  %v3801_v15 = vrot.slane %v8321_v32, 3 }
 0x457   :  { %v3803_v0 = vrot.slane %v8325_v53, 3  ;;  %v8339_v18 = vsel %vm285_vm12, 1e+09, %v3795_v41  ;;  %v3818_v63 = vrot.slane %v8305_v54, 5  ;;  %v8343_v16 = vsel %vm285_vm12, %v3795_v41, %v3796_v28 }
 0x458   :  { %v8348_v9 = vsel %vm285_vm12, %v3796_v28, %v3798_v59  ;;  %v8351_v19 = vsel %vm285_vm12, 1e+09, %v3800_v3  ;;  %v3820_v34 = vrot.slane %v8309_v25, 5  ;;  %v8355_v52 = vsel %vm285_vm12, %v3800_v3, %v3801_v15 }
 0x459   :  { %v8360_v13 = vsel %vm285_vm12, %v3801_v15, %v3803_v0  ;;  %v8363_v21 = vsel %vm303_vm13, %v3817_v6, %v3818_v63  ;;  %v3822_v7 = vrot.slane %v8313_v39, 5  ;;  %v3824_v24 = vrot.slane %v8317_v14, 5 }
 0x45a   :  { %v8367_v12 = vsel %vm303_vm13, %v3818_v63, %v3820_v34  ;;  %v3825_v10 = vrot.slane %v8321_v32, 5  ;;  %v3827_v58 = vrot.slane %v8325_v53, 5  ;;  %v3829_v20 = vrot.slane %v8329_v27, 5 }
 0x45b   :  { %v3823_v55 = vsel %vm303_vm13, %v3820_v34, %v3822_v7  ;;  %v3839_v49 = vrot.slane %v8301_v40, 7  ;;  %v3840_v37 = vrot.slane %v8305_v54, 7  ;;  %v3842_v31 = vrot.slane %v8309_v25, 7 }
 0x45c   :  { %v8377_v29 = vsel %vm303_vm13, %v3824_v24, %v3825_v10  ;;  %v8380_v23 = vsel %vm303_vm13, %v3825_v10, %v3827_v58  ;;  %v3837_v22 = vsel %vm320_vm14, %v3823_v55, 1e+09  ;;  %v3830_v4 = vsel %vm303_vm13, %v3827_v58, %v3829_v20 }
 0x45d   :  { %v3841_v8 = vsel %vm273_vm11, %v3839_v49, %v3840_v37  ;;  %v3844_v26 = vrot.slane %v8317_v14, 7  ;;  %v3845_v43 = vrot.slane %v8321_v32, 7  ;;  %v3838_v62 = vsel %vm320_vm14, %v3830_v4, 1e+09 }
 0x45e   :  { %v3843_v30 = vsel %vm273_vm11, %v3840_v37, %v3842_v31  ;;  %v3847_v11 = vrot.slane %v8325_v53, 7  ;;  %v3857_v5 = vsel %vm273_vm11, 1e+09, %v3839_v49  ;;  %v3860_v6 = vsel %vm355_vm1, 1e+09, %v3841_v8 }
 0x45f   :  { %v3846_v41 = vsel %vm273_vm11, %v3844_v26, %v3845_v43  ;;  %v3858_v28 = vsel %vm273_vm11, 1e+09, %v3844_v26  ;;  %v3859_v3 = vsel %vm354_vm15, 1e+09, %v3857_v5  ;;  %v3861_v63 = vsel %vm356_vm4, 1e+09, %v3843_v30 }
 0x460   :  { %v3848_v15 = vsel %vm273_vm11, %v3845_v43, %v3847_v11  ;;  %v3862_v34 = vsel %vm357_vm3, 1e+09, %v3842_v31  ;;  %v3863_v7 = vsel %vm354_vm15, 1e+09, %v3858_v28  ;;  %v3864_v24 = vsel %vm355_vm1, 1e+09, %v3846_v41 }
 0x461   :  { %v3865_v10 = vsel %vm356_vm4, 1e+09, %v3848_v15  ;;  %v3866_v58 = vsel %vm357_vm3, 1e+09, %v3847_v11  ;;  %v3893_v55 = vmin.f32 %v8339_v18, %v8363_v21  ;;  %v3867_v20 = vrot.slane %v8301_v40, 1 }
 0x462   :  { %v3868_v49 = vrot.slane %v8305_v54, 1  ;;  %v3870_v37 = vrot.slane %v8309_v25, 1  ;;  %v3872_v42 = vrot.slane %v8313_v39, 1  ;;  %v3874_v45 = vrot.slane %v8317_v14, 1 }
 0x463   :  { %v3875_v31 = vrot.slane %v8321_v32, 1  ;;  %v3877_v44 = vrot.slane %v8325_v53, 1  ;;  %v3879_v47 = vrot.slane %v8329_v27, 1  ;;  %v3894_v54 = vmin.f32 %v8343_v16, %v8367_v12 }
 0x464   :  { %v3869_v4 = vsel %vm364_vm2, %v3867_v20, %v3868_v49  ;;  %v3871_v18 = vsel %vm364_vm2, %v3868_v49, %v3870_v37  ;;  %v3873_v40 = vsel %vm364_vm2, %v3870_v37, %v3872_v42  ;;  %v3895_v16 = vmin.f32 %v8348_v9, %v3837_v22 }
 0x465   :  { %v3876_v21 = vsel %vm364_vm2, %v3874_v45, %v3875_v31  ;;  %v3878_v39 = vsel %vm364_vm2, %v3875_v31, %v3877_v44  ;;  %v3880_v14 = vsel %vm364_vm2, %v3877_v44, %v3879_v47  ;;  %v3887_v32 = vsel %vm393_vm5, 1e+09, %v3869_v4 }
 0x466   :  { %v3888_v27 = vsel %vm394_vm7, 1e+09, %v3871_v18  ;;  %v3889_v8 = vsel %vm395_vm6, 1e+09, %v3873_v40  ;;  %v3890_v26 = vsel %vm393_vm5, 1e+09, %v3876_v21  ;;  %v3897_v11 = vmin.f32 %v8351_v19, %v8377_v29 }
 0x467   :  { %v3891_v12 = vsel %vm394_vm7, 1e+09, %v3878_v39  ;;  %v3892_v43 = vsel %vm395_vm6, 1e+09, %v3880_v14  ;;  %v3896_v30 = vmin.f32 %v3798_v59, 1e+09  ;;  %v3898_v5 = vmin.f32 %v8355_v52, %v8380_v23 }
 0x468   :  { %v3899_v46 = vmin.f32 %v8360_v13, %v3838_v62  ;;  %v3900_v9 = vmin.f32 %v3803_v0, 1e+09  ;;  %v3901_v22 = vmin.f32 %v3859_v3, %v3887_v32  ;;  %v3902_v2 = vmin.f32 %v3860_v6, %v3888_v27 }
 0x469   :  { %v3903_v41 = vmin.f32 %v3861_v63, %v3889_v8  ;;  %v3904_v28 = vmin.f32 %v3862_v34, 1e+09  ;;  %v3905_v1 = vmin.f32 %v3863_v7, %v3890_v26  ;;  %v3906_v15 = vmin.f32 %v3864_v24, %v3891_v12 }
 0x46a   :  { %v3907_v20 = vmin.f32 %v3865_v10, %v3892_v43  ;;  %v3908_v25 = vmin.f32 %v3866_v58, 1e+09  ;;  %v3909_v59 = vmin.f32 %v3893_v55, %v3901_v22  ;;  %v3910_v49 = vmin.f32 %v3894_v54, %v3902_v2 }
 0x46b   :  { %v3912_v37 = vmin.f32 %v3896_v30, %v3904_v28  ;;  %v3911_v19 = vmin.f32 %v3895_v16, %v3903_v41  ;;  %v3913_v29 = vmin.f32 %v3897_v11, %v3905_v1  ;;  %v3914_v42 = vmin.f32 %v3898_v5, %v3906_v15 }
 0x46c   :  { %v3915_v52 = vmin.f32 %v3899_v46, %v3907_v20  ;;  %v3916_v23 = vmin.f32 %v3900_v9, %v3908_v25  ;;  %v3917_v53 = vadd.f32 %v3909_v59, %v4137_v60  ;;  %v3918_v0 = vadd.f32 %v3910_v49, %v4130_v56 }
 0x46d   :  { %v3920_v13 = vadd.f32 %v3912_v37, %v4132_v57  ;;  %v3919_v3 = vadd.f32 %v3911_v19, %v4139_v61  ;;  %v3921_v6 = vadd.f32 %v3913_v29, %v4137_v60  ;;  %v3922_v63 = vadd.f32 %v3914_v42, %v4130_v56 }
 0x46e   :  { %v3941_v34 = vlaneseq  ;;  %v3923_v7 = vadd.f32 %v3915_v52, %v4139_v61  ;;  %v3924_v24 = vadd.f32 %v3916_v23, %v4132_v57  ;;  %v3925_v55 = vmin.f32 %v8276_v35, %v3917_v53 }
 0x46f   :  { %v3928_v62 = vmin.f32 %v8285_v33, %v3920_v13  ;;  %v3926_v31 = vmin.f32 %v8279_v48, %v3918_v0  ;;  %v3927_v33 = vmin.f32 %v8282_v36, %v3919_v3  ;;  %v3929_v44 = vmin.f32 %v8288_v50, %v3921_v6 }
 0x470   :  { %v3942_v58 = vshrl.u32 %v3941_v34, 7  ;;  %v3930_v60 = vmin.f32 %v8291_v17, %v3922_v63  ;;  %v3931_v56 = vmin.f32 %v8294_v51, %v3923_v7  ;;  %v3932_v47 = vmin.f32 %v8297_v38, %v3924_v24 }
 0x471   :  { %v3933_v10 = vand.u32 2147483647, %v3928_v62  ;;  %v3936_v18 = vadd.f32 %v3929_v44, %v3925_v55  ;;  %v4013_v48 = vmov 0.0  }
 0x472   :  { %v3943_v4 = vsub.s32 0, %v3942_v58  ;;  %v3937_v40 = vadd.f32 %v3930_v60, %v3926_v31  ;;  %v3938_v54 = vadd.f32 %v3931_v56, %v3927_v33  ;;  %v3939_v35 = vadd.f32 %v3932_v47, %v3928_v62 }
 0x473   :  { %v3934_v45 = vadd.f32 1.0, %v3933_v10 }
 0x475   :  { %v3935_v61 = vmul.f32 0.0001, %v3934_v45 }
 0x477   :  { %v3940_v57 = vadd.f32 %v3935_v61, %v3928_v62 }
 0x479   :  { %v3944_v21 = vrot.slane %v3940_v57, %v3943_v4 }
 0x47b   :  { %vm3945_vm9 = vcmp.le.f32.partialorder %v3936_v18, %v3944_v21  ;;  %vm3946_vm10 = vcmp.le.f32.partialorder %v3937_v40, %v3944_v21  ;;  %vm3947_vm11 = vcmp.le.f32.partialorder %v3938_v54, %v3944_v21  ;;  %vm3948_vm12 = vcmp.le.f32.partialorder %v3939_v35, %v3944_v21 }
 0x47c   :  { %v3972_v36 = vsel %vm3945_vm9, 1.0, %v4013_v48  ;;  %v3973_v50 = vsel %vm3946_vm10, 1.0, %v4013_v48  ;;  %v3974_v17 = vsel %vm3947_vm11, 1.0, %v4013_v48  ;;  %v3975_v51 = vsel %vm3948_vm12, 1.0, %v4013_v48 }
 0x47d   :  { %3957 = vst.msk [vmem:[%s8489_s7] sm:$0xff] %vm41_vm0, %v3972_v36  ;;  %3958 = vst.msk [vmem:[%s8489_s7 + $0x8] sm:$0xff] %vm41_vm0, %v3973_v50 }
 0x47e   :  { %3959 = vst.msk [vmem:[%s8489_s7 + $0x10] sm:$0xff] %vm41_vm0, %v3974_v17 }
 0x47f   :  { %3961 = vst.msk [vmem:[%s8489_s7 + $0x18] sm:$0x1] %vm3960_vm8, %v3975_v51 }

</bundles_post_ra>
